<compile_context>
chip_gen: v6e
topology: v6e:2x2x1
jax: 0.10.0
libtpu: 0.0.40
codegen_flags: <defaults>
</compile_context>

<pallas_src>
import jax
import jax.numpy as jnp
from jax.experimental import pallas as pl
from jax.experimental.pallas import tpu as pltpu

C_IN, C1, C2, C3 = 864, 512, 256, 128
BN_EPS = 1e-5


def _round_up(x, m):
    return ((x + m - 1) // m) * m


def _cdiv(a, b):
    return -(-a // b)


def convfeat_kernel(x_ref, w1_ref, b1_ref, w2_ref, b2_ref, w3_ref, b3_ref, o_ref):
    # x_ref:  (1, 864, TN)  bf16 preferred (f32 also works), channels on sublanes.
    # w*_ref: (Cout, Cin)   bfloat16 (BN-folded).
    # b*_ref: (Cout, 1)     float32  (BN-folded), broadcast across lanes.
    # o_ref:  (1, 128, TN)  output dtype (bf16 by default).
    x = x_ref[0].astype(jnp.bfloat16)  # no-op when the HBM stream is already bf16

    h1 = jnp.dot(w1_ref[...], x, preferred_element_type=jnp.float32)    # (512, TN)
    h1 = jnp.maximum(h1 + b1_ref[...], 0.0).astype(jnp.bfloat16)

    h2 = jnp.dot(w2_ref[...], h1, preferred_element_type=jnp.float32)   # (256, TN)
    h2 = jnp.maximum(h2 + b2_ref[...], 0.0).astype(jnp.bfloat16)

    h3 = jnp.dot(w3_ref[...], h2, preferred_element_type=jnp.float32)   # (128, TN)
    h3 = jnp.maximum(h3 + b3_ref[...], 0.0)

    o_ref[0] = h3.astype(o_ref.dtype)


def _device_defaults():
    """Per-generation (lane_tile, vmem_limit_bytes), per the perf review."""
    kind = ""
    try:
        kind = jax.devices()[0].device_kind.lower()
    except Exception:
        pass
    if "v5e" in kind or "v5 lite" in kind or "v5lite" in kind:
        # v5e: MXU-bound here (intensity ~305 FLOP/B > ~240 crossover); TN=512
        # is already near its roofline and fits the 16 MiB scoped default.
        return 512, 48 * 1024 * 1024
    # v6e / v7x: HBM-bound on the input stream -> bigger lane tile.  TN=1024
    # keeps the double-buffered per-step working set well under v7x's 64 MiB
    # physical VMEM, so the same default is safe on both generations.
    return 1024, 48 * 1024 * 1024


def _choose_tile(N, B, max_tile):
    """Pick the lane tile (multiple of 128) along the point axis N.

    Preference: exact divisors of N (no jnp.pad / output-slice HBM round trip),
    largest first.  When B == 1, prefer tiles giving an even number (>= 2) of
    grid steps so both v7x TensorCores stay busy.
    """
    max_tile = max(128, (min(max_tile, _round_up(N, 128)) // 128) * 128)
    candidates = list(range(max_tile, 0, -128))
    exact = [t for t in candidates if N % t == 0]
    pool = exact if exact else candidates
    if B == 1:
        even = [t for t in pool if _cdiv(N, t) >= 2 and _cdiv(N, t) % 2 == 0]
        if even:
            return even[0]
        multi = [t for t in pool if _cdiv(N, t) >= 2]
        if multi:
            return multi[0]
    return pool[0]


def conv_feat_forward(emb, params, *, tn=None, out_dtype=None,
                      single_buffer_params=False):
    """emb: (B, 864, N) NCW, bfloat16 preferred. Returns (B, 128, N) in out_dtype."""
    B, C, N = emb.shape
    assert C == C_IN
    if out_dtype is None:
        out_dtype = emb.dtype

    default_tn, vmem_limit = _device_defaults()
    tile = _choose_tile(N, B, tn if tn is not None else default_tn)

    Np = _round_up(N, tile)
    # Fallback only (ragged N with no 128-multiple divisor): jnp.pad is a full
    # extra HBM pass, which _choose_tile tries hard to avoid.
    x = emb if Np == N else jnp.pad(emb, ((0, 0), (0, 0), (0, Np - N)))

    grid = (B, Np // tile)

    def const_spec(shape):
        # Full-array block with a constant index map -> resident across the
        # grid (not re-DMA'd per step).  Optional single-buffering frees the
        # redundant second buffer (~1.6 MB of weights + lane-padded biases) for
        # extra VMEM headroom on v7x; off by default.
        if single_buffer_params:
            return pl.BlockSpec(shape, lambda b, n: (0, 0),
                                pipeline_mode=pl.Buffered(1))
        return pl.BlockSpec(shape, lambda b, n: (0, 0))

    out = pl.pallas_call(
        convfeat_kernel,
        out_shape=jax.ShapeDtypeStruct((B, C3, Np), out_dtype),
        grid_spec=pltpu.PrefetchScalarGridSpec(
            num_scalar_prefetch=0,
            grid=grid,
            in_specs=[
                pl.BlockSpec((1, C_IN, tile), lambda b, n: (b, 0, n)),
                const_spec((C1, C_IN)), const_spec((C1, 1)),
                const_spec((C2, C1)), const_spec((C2, 1)),
                const_spec((C3, C2)), const_spec((C3, 1)),
            ],
            out_specs=pl.BlockSpec((1, C3, tile), lambda b, n: (b, 0, n)),
        ),
        compiler_params=pltpu.CompilerParams(
            dimension_semantics=("parallel", "parallel"),
            vmem_limit_bytes=vmem_limit,
        ),
    )(x, params["w1"], params["b1"], params["w2"], params["b2"],
      params["w3"], params["b3"])

    return out if Np == N else out[:, :, :N]


def _fold_bn(w_oc_ic, bias, gamma, beta, mean, var):
    """Fold conv bias + eval-mode BN into (Cout, Cin) bf16 weight and (Cout, 1) f32 bias."""
    scale = gamma / jnp.sqrt(var + BN_EPS)                 # (Cout,)
    w_folded = w_oc_ic * scale[:, None]                    # (Cout, Cin)
    b_folded = (bias - mean) * scale + beta                # (Cout,)
    return w_folded.astype(jnp.bfloat16), b_folded[:, None].astype(jnp.float32)


def init_params(key):
    """Deterministic synthetic parameters matching ConvFeat.__init__ shapes."""

    def conv_bn(k, cin, cout):
        kw, kb, kg, kbe, km, kv = jax.random.split(k, 6)
        w = jax.random.normal(kw, (cout, cin), jnp.float32) / jnp.sqrt(cin)
        b = 0.01 * jax.random.normal(kb, (cout,), jnp.float32)
        gamma = 1.0 + 0.1 * jax.random.normal(kg, (cout,), jnp.float32)
        beta = 0.1 * jax.random.normal(kbe, (cout,), jnp.float32)
        mean = 0.05 * jax.random.normal(km, (cout,), jnp.float32)
        var = jnp.abs(jax.random.normal(kv, (cout,), jnp.float32)) + 0.5
        return _fold_bn(w, b, gamma, beta, mean, var)

    k1, k2, k3 = jax.random.split(key, 3)
    w1, b1 = conv_bn(k1, C_IN, C1)
    w2, b2 = conv_bn(k2, C1, C2)
    w3, b3 = conv_bn(k3, C2, C3)
    return {"w1": w1, "b1": b1, "w2": w2, "b2": b2, "w3": w3, "b3": b3}


def reference_forward(emb, params):
    """Pure-JAX f32 reference with identical folded-BN semantics."""

    def layer(x, w, b):
        y = jnp.einsum("oi,bin->bon", w.astype(jnp.float32), x) + b[None]
        return jnp.maximum(y, 0.0)

    h = layer(emb.astype(jnp.float32), params["w1"], params["b1"])
    h = layer(h, params["w2"], params["b2"])
    h = layer(h, params["w3"], params["b3"])
    return h


if __name__ == "__main__":
    key = jax.random.PRNGKey(0)
    k_emb, k_par = jax.random.split(key)

    B, N = 2, 256  # small point count; channel dims fixed by the module (864->...->128)
    # Upstream producer emits bf16: halves the HBM input stream the kernel reads.
    emb = jax.random.normal(k_emb, (B, C_IN, N), jnp.float32).astype(jnp.bfloat16)
    params = init_params(k_par)

    out = jax.block_until_ready(conv_feat_forward(emb, params))
    ref = jax.block_until_ready(reference_forward(emb, params))

    assert out.shape == (B, C3, N)
    assert out.dtype == emb.dtype
    out_f32 = out.astype(jnp.float32)
    # bf16 activations/weights with f32 MXU accumulation vs f32 reference.
    assert jnp.allclose(out_f32, ref, atol=5e-2, rtol=5e-2), float(
        jnp.max(jnp.abs(out_f32 - ref)))

    print("KERNEL_OK")
</pallas_src>

<mosaic_0001>
module attributes {stable_mosaic.version = 11 : i64} {
  func.func @convfeat_kernel(%arg0: i32, %arg1: i32, %arg2: memref<1x864x256xbf16, #tpu.memory_space<vmem>>, %arg3: memref<512x864xbf16, #tpu.memory_space<vmem>>, %arg4: memref<512x1xf32, #tpu.memory_space<vmem>>, %arg5: memref<256x512xbf16, #tpu.memory_space<vmem>>, %arg6: memref<256x1xf32, #tpu.memory_space<vmem>>, %arg7: memref<128x256xbf16, #tpu.memory_space<vmem>>, %arg8: memref<128x1xf32, #tpu.memory_space<vmem>>, %arg9: memref<1x128x256xbf16, #tpu.memory_space<vmem>>) attributes {dimension_semantics = [#tpu.dimension_semantics<parallel>, #tpu.dimension_semantics<parallel>], iteration_bounds = array<i64: 2, 1>, scalar_prefetch = 0 : i64, scratch_operands = 0 : i64, tpu.core_type = #tpu.core_type<tc>, window_params = [{transform_indices = @transform_0, window_bounds = array<i64: 1, 864, 256>}, {pipeline_mode = #tpu.pipeline_mode<synchronous>, transform_indices = @transform_1, window_bounds = array<i64: 512, 864>}, {pipeline_mode = #tpu.pipeline_mode<synchronous>, transform_indices = @transform_2, window_bounds = array<i64: 512, 1>}, {pipeline_mode = #tpu.pipeline_mode<synchronous>, transform_indices = @transform_3, window_bounds = array<i64: 256, 512>}, {pipeline_mode = #tpu.pipeline_mode<synchronous>, transform_indices = @transform_4, window_bounds = array<i64: 256, 1>}, {pipeline_mode = #tpu.pipeline_mode<synchronous>, transform_indices = @transform_5, window_bounds = array<i64: 128, 256>}, {pipeline_mode = #tpu.pipeline_mode<synchronous>, transform_indices = @transform_6, window_bounds = array<i64: 128, 1>}, {transform_indices = @transform_7, window_bounds = array<i64: 1, 128, 256>}]} {
    %c0 = arith.constant 0 : index
    %c0_0 = arith.constant 0 : index
    %c0_1 = arith.constant 0 : index
    %0 = vector.load %arg2[%c0, %c0_0, %c0_1] : memref<1x864x256xbf16, #tpu.memory_space<vmem>>, vector<1x864x256xbf16>
    %1 = vector.shape_cast %0 : vector<1x864x256xbf16> to vector<864x256xbf16>
    %c0_2 = arith.constant 0 : index
    %c0_3 = arith.constant 0 : index
    %2 = vector.load %arg3[%c0_2, %c0_3] : memref<512x864xbf16, #tpu.memory_space<vmem>>, vector<512x864xbf16>
    %cst = arith.constant dense<0.000000e+00> : vector<512x256xf32>
    %3 = tpu.matmul %2, %1, %cst {dimension_numbers = #tpu.dot_dimension_numbers<[1], [0], [0], [1], [0, 0, 1, 1], [], []>} : vector<512x864xbf16>, vector<864x256xbf16>, vector<512x256xf32> -> vector<512x256xf32>
    %c0_4 = arith.constant 0 : index
    %c0_5 = arith.constant 0 : index
    %4 = vector.load %arg4[%c0_4, %c0_5] : memref<512x1xf32, #tpu.memory_space<vmem>>, vector<512x1xf32>
    %5 = vector.broadcast %4 : vector<512x1xf32> to vector<512x256xf32>
    %6 = arith.addf %3, %5 : vector<512x256xf32>
    %cst_6 = arith.constant 0.000000e+00 : f32
    %7 = vector.broadcast %cst_6 : f32 to vector<512x256xf32>
    %8 = arith.maximumf %6, %7 : vector<512x256xf32>
    %9 = arith.truncf %8 : vector<512x256xf32> to vector<512x256xbf16>
    %c0_7 = arith.constant 0 : index
    %c0_8 = arith.constant 0 : index
    %10 = vector.load %arg5[%c0_7, %c0_8] : memref<256x512xbf16, #tpu.memory_space<vmem>>, vector<256x512xbf16>
    %cst_9 = arith.constant dense<0.000000e+00> : vector<256x256xf32>
    %11 = tpu.matmul %10, %9, %cst_9 {dimension_numbers = #tpu.dot_dimension_numbers<[1], [0], [0], [1], [0, 0, 1, 1], [], []>} : vector<256x512xbf16>, vector<512x256xbf16>, vector<256x256xf32> -> vector<256x256xf32>
    %c0_10 = arith.constant 0 : index
    %c0_11 = arith.constant 0 : index
    %12 = vector.load %arg6[%c0_10, %c0_11] : memref<256x1xf32, #tpu.memory_space<vmem>>, vector<256x1xf32>
    %13 = vector.broadcast %12 : vector<256x1xf32> to vector<256x256xf32>
    %14 = arith.addf %11, %13 : vector<256x256xf32>
    %cst_12 = arith.constant 0.000000e+00 : f32
    %15 = vector.broadcast %cst_12 : f32 to vector<256x256xf32>
    %16 = arith.maximumf %14, %15 : vector<256x256xf32>
    %17 = arith.truncf %16 : vector<256x256xf32> to vector<256x256xbf16>
    %c0_13 = arith.constant 0 : index
    %c0_14 = arith.constant 0 : index
    %18 = vector.load %arg7[%c0_13, %c0_14] : memref<128x256xbf16, #tpu.memory_space<vmem>>, vector<128x256xbf16>
    %cst_15 = arith.constant dense<0.000000e+00> : vector<128x256xf32>
    %19 = tpu.matmul %18, %17, %cst_15 {dimension_numbers = #tpu.dot_dimension_numbers<[1], [0], [0], [1], [0, 0, 1, 1], [], []>} : vector<128x256xbf16>, vector<256x256xbf16>, vector<128x256xf32> -> vector<128x256xf32>
    %c0_16 = arith.constant 0 : index
    %c0_17 = arith.constant 0 : index
    %20 = vector.load %arg8[%c0_16, %c0_17] : memref<128x1xf32, #tpu.memory_space<vmem>>, vector<128x1xf32>
    %21 = vector.broadcast %20 : vector<128x1xf32> to vector<128x256xf32>
    %22 = arith.addf %19, %21 : vector<128x256xf32>
    %cst_18 = arith.constant 0.000000e+00 : f32
    %23 = vector.broadcast %cst_18 : f32 to vector<128x256xf32>
    %24 = arith.maximumf %22, %23 : vector<128x256xf32>
    %25 = arith.truncf %24 : vector<128x256xf32> to vector<128x256xbf16>
    %c0_19 = arith.constant 0 : index
    %c0_20 = arith.constant 0 : index
    %c0_21 = arith.constant 0 : index
    %26 = vector.load %arg9[%c0_19, %c0_20, %c0_21] : memref<1x128x256xbf16, #tpu.memory_space<vmem>>, vector<1x128x256xbf16>
    %27 = vector.shape_cast %26 : vector<1x128x256xbf16> to vector<128x256xbf16>
    %28 = vector.shape_cast %25 : vector<128x256xbf16> to vector<1x128x256xbf16>
    tpu.vector_store %arg9[%c0_19, %c0_20, %c0_21], %28 {strides = array<i32>} : memref<1x128x256xbf16, #tpu.memory_space<vmem>>, vector<1x128x256xbf16>,
    return
  }
  func.func @transform_0(%arg0: i32, %arg1: i32) -> (i32, i32, i32) {
    %c0_i32 = arith.constant 0 : i32
    %c0_i32_0 = arith.constant 0 : i32
    return %arg0, %c0_i32, %arg1 : i32, i32, i32
  }
  func.func @transform_1(%arg0: i32, %arg1: i32) -> (i32, i32) {
    %c0_i32 = arith.constant 0 : i32
    %c0_i32_0 = arith.constant 0 : i32
    %c0_i32_1 = arith.constant 0 : i32
    return %c0_i32, %c0_i32_0 : i32, i32
  }
  func.func @transform_2(%arg0: i32, %arg1: i32) -> (i32, i32) {
    %c0_i32 = arith.constant 0 : i32
    %c0_i32_0 = arith.constant 0 : i32
    %c0_i32_1 = arith.constant 0 : i32
    return %c0_i32, %c0_i32_0 : i32, i32
  }
  func.func @transform_3(%arg0: i32, %arg1: i32) -> (i32, i32) {
    %c0_i32 = arith.constant 0 : i32
    %c0_i32_0 = arith.constant 0 : i32
    %c0_i32_1 = arith.constant 0 : i32
    return %c0_i32, %c0_i32_0 : i32, i32
  }
  func.func @transform_4(%arg0: i32, %arg1: i32) -> (i32, i32) {
    %c0_i32 = arith.constant 0 : i32
    %c0_i32_0 = arith.constant 0 : i32
    %c0_i32_1 = arith.constant 0 : i32
    return %c0_i32, %c0_i32_0 : i32, i32
  }
  func.func @transform_5(%arg0: i32, %arg1: i32) -> (i32, i32) {
    %c0_i32 = arith.constant 0 : i32
    %c0_i32_0 = arith.constant 0 : i32
    %c0_i32_1 = arith.constant 0 : i32
    return %c0_i32, %c0_i32_0 : i32, i32
  }
  func.func @transform_6(%arg0: i32, %arg1: i32) -> (i32, i32) {
    %c0_i32 = arith.constant 0 : i32
    %c0_i32_0 = arith.constant 0 : i32
    %c0_i32_1 = arith.constant 0 : i32
    return %c0_i32, %c0_i32_0 : i32, i32
  }
  func.func @transform_7(%arg0: i32, %arg1: i32) -> (i32, i32, i32) {
    %c0_i32 = arith.constant 0 : i32
    %c0_i32_0 = arith.constant 0 : i32
    return %arg0, %c0_i32, %arg1 : i32, i32, i32
  }
}

</mosaic_0001>

<bundles_post_ra>
// kernel: tpu_custom_call.1
= control target key start
LH: loop header
LB: loop body
LE: loop exit
PB: predicated region body
PF: predicated region fallthrough
CT: control target
= control target key end

     0   :  { %12 = vsyncpa [#allocation3], 0  ;;  %s10394_s0 = inlined_call_operand.vmem [shape: bf16[2,864,256], index: 0, kind: input, shape index: {}]   ;;  %s10395_s1 = inlined_call_operand.vmem [shape: bf16[512,864], index: 1, kind: input, shape index: {}]   ;;  %s10396_s2 = inlined_call_operand.vmem [shape: f32[512,1], index: 2, kind: input, shape index: {}]   ;;  %s10397_s3 = inlined_call_operand.vmem [shape: bf16[256,512], index: 3, kind: input, shape index: {}]   ;;  %s10398_s4 = inlined_call_operand.vmem [shape: f32[256,1], index: 4, kind: input, shape index: {}]   ;;  %s10399_s5 = inlined_call_operand.vmem [shape: bf16[128,256], index: 5, kind: input, shape index: {}]   ;;  %s10400_s6 = inlined_call_operand.vmem [shape: f32[128,1], index: 6, kind: input, shape index: {}]   ;;  %s10401_s7 = inlined_call_operand.hbm [shape: bf16[2,128,256], index: 7, kind: output, shape index: {}]  }
   0x1   :  { %14 = vsyncpa [#allocation3 + $0x1], 0  ;;  %s7326_s24 = smov 0   ;;  %s7328_s25 = smov 0  }
   0x2   :  { %s7330_s26 = smov 0   ;;  %s7332_s27 = smov 0  }
   0x3   :  { %s7334_s28 = smov 0   ;;  %s7336_s29 = smov 0  }
   0x4 LB: > { %s6020_s30 = sadd.s32 4294967295, %s7280_s29   ;;  %s6021_s8 = sadd.s32 4294967294, %s7280_s29   ;;  %s7280_s29 = sphi %s7336_s29, %s20_s29   ;;  %s7276_s28 = sphi %s7334_s28, %s10719_s28   ;;  %s7272_s27 = sphi %s7332_s27, %s10718_s27   ;;  %s7268_s26 = sphi %s7330_s26, %s10717_s26   ;;  %s7264_s25 = sphi %s7328_s25, %s10716_s25   ;;  %s7260_s24 = sphi %s7326_s24, %s10715_s24  }
   0x5   : > { %s32_s9 = sadd.s32 1, %s7276_s28  ;;  %s195_s10 = sadd.s32 1, %s7268_s26 }
   0x6   : > { %p34_p0 = scmp.ge.s32.totalorder %s32_s9, 2  ;;  %p205_p1 = scmp.ne.s32.totalorder %s7268_s26, %s7264_s25 }
   0x7   : > { %p206_p2 = scmp.eq.s32.totalorder %s6020_s30, 1  ;;  %p211_p3 = scmp.ne.s32.totalorder %s7264_s25, %s7260_s24 }
   0x8   : > { %s10721_s9 = smov (%p34_p0, %s32_s9), 0  ;;  %p212_p5 = scmp.eq.s32.totalorder %s6021_s8, 1 }
   0x9   : > { %p7366_p4 = por %p206_p2, %p205_p1  ;;  %s190_s12 = ssub.s32 %s7276_s28, %s10721_s9 }
   0xa   : > { %p6024_p6 = scmp.ge.s32.totalorder %s7280_s29, 1  ;;  %p193_p7 = scmp.eq.s32.totalorder %s190_s12, 0 }
   0xb   : > { %p7373_p8 = por %p212_p5, %p211_p3  ;;  %p261_p9 = scmp.lt.s32.totalorder %s7280_s29, 3 }
   0xc   : > { %s7379_s14 = scalar_select %p193_p7, %s7268_s26, %s195_s10  }
   0xd   : > { %p262_p10 = pnand %p6024_p6, %p261_p9 }
   0xf   : > { %265 = sbr.rel (%p262_p10) target bundleno = 1498 (0x5da), region = 48 }
  0x14   : > { %p298_p11 = scmp.lt.s32.totalorder %s7272_s27, 1  ;;  %v6700_v0 = vld [vmem:[%s10395_s1 + $0x4] ss:$28 sps:$4 sm:$0xff]   ;;  %v10402_v1 = vmov 0   ;;  %v6703_v2 = vld [vmem:[%s10395_s1 + $0xc] ss:$28 sps:$4 sm:$0xff]  }
  0x15   : > { %6600 = vset.pattern.permute.xlu0 %v10402_v1  ;;  %6601 = vset.pattern.permute.xlu1 %v10402_v1  ;;  %v687_v3 = vld [vmem:[%s10396_s2 + $0x70] sm:$0xff]  ;;  %v688_v54 = vld [vmem:[%s10396_s2 + $0x78] sm:$0xff]  ;;  %v685_v57 = vld [vmem:[%s10396_s2 + $0x60] sm:$0xff]  ;;  %vm2717_vm0 = vcmask 785408   ;;  %s7283_s23 = smov [#allocation2]  }
  0x16   : > { %s299_s17 = scalar_select %p298_p11, %s7272_s27, 1  ;;  %2846 = vmatprep.mubr.bf16.mxu0 %v6700_v0  ;;  %3199 = vmatprep.mubr.bf16.mxu1 %v6703_v2  ;;  %v719_v53 = vld [vmem:[%s10396_s2 + $0x170] sm:$0xff]  ;;  %v720_v56 = vld [vmem:[%s10396_s2 + $0x178] sm:$0xff]  ;;  %v686_v62 = vld [vmem:[%s10396_s2 + $0x68] sm:$0xff] }
  0x17   : > { %809 = vperm.xlu0 %6600, %v687_v3   ;;  %969 = vperm.xlu1 %6601, %v719_v53   ;;  %v717_v63 = vld [vmem:[%s10396_s2 + $0x160] sm:$0xff]  ;;  %v674_v53 = vld [vmem:[%s10396_s2 + $0x8] sm:$0xff]  ;;  %s7208_s30 = sshll.u32 %s7283_s23, 4  ;;  %s7209_s30 = int_to_ptr.vmem [resolvable:$false] %s7208_s30 }
  0x18   : > { %s6541_s20 = smul.u32 864, %s299_s17  ;;  %s6508_s17 = sshll.u32 %s7272_s27, 11 }
  0x19   : > { %s10342_s21 = scalar_lea.hbm %s10401_s7, %s6508_s17  ;;  %s7210_s10 = scalar_lea.vmem %s7209_s30, 4096 }
  0x1a   : > { %s7397_s8 = scalar_lea.vmem %s10394_s0, %s6541_s20 }
  0x1b   : > { %v6602_v4 = vld [vmem:[%s7397_s8 + $0x74] ss:$8 sps:$4 sm:$0xff]   ;;  %v6606_v6 = vld [vmem:[%s7397_s8 + $0x70] ss:$8 sps:$4 sm:$0xff]   ;;  %v6608_v8 = vld [vmem:[%s7397_s8 + $0x64] ss:$8 sps:$4 sm:$0xff]   ;;  %814 = vperm.xlu0 %6600, %v688_v54   ;;  %974 = vperm.xlu1 %6601, %v720_v56  }
  0x1c   : > { %v6604_v5 = vld [vmem:[%s7397_s8 + $0x174] ss:$8 sps:$4 sm:$0xff]   ;;  %2814 = vmatprep.subr.bf16.mxu0 %v6602_v4  ;;  %v6607_v7 = vld [vmem:[%s7397_s8 + $0x170] ss:$8 sps:$4 sm:$0xff]   ;;  %v6610_v9 = vld [vmem:[%s7397_s8 + $0x164] ss:$8 sps:$4 sm:$0xff]  }
  0x1d   : > { %3167 = vmatprep.subr.bf16.mxu1 %v6604_v5  ;;  %2815 = vmatpush1.bf16.msra.mxu0 %v6606_v6  ;;  %v6612_v10 = vld [vmem:[%s7397_s8 + $0x60] ss:$8 sps:$4 sm:$0xff]   ;;  %v6614_v12 = vld [vmem:[%s7397_s8 + $0x54] ss:$8 sps:$4 sm:$0xff]   ;;  %v6618_v14 = vld [vmem:[%s7397_s8 + $0x50] ss:$8 sps:$4 sm:$0xff]  }
  0x1e   : > { %3168 = vmatpush1.bf16.msra.mxu1 %v6607_v7  ;;  %2816 = vmatprep.subr.bf16.mxu0 %v6608_v8  ;;  %v6613_v11 = vld [vmem:[%s7397_s8 + $0x160] ss:$8 sps:$4 sm:$0xff]   ;;  %v6616_v13 = vld [vmem:[%s7397_s8 + $0x154] ss:$8 sps:$4 sm:$0xff]   ;;  %v6619_v15 = vld [vmem:[%s7397_s8 + $0x150] ss:$8 sps:$4 sm:$0xff]  }
  0x1f   : > { %3169 = vmatprep.subr.bf16.mxu1 %v6610_v9  ;;  %v6620_v16 = vld [vmem:[%s7397_s8 + $0x44] ss:$8 sps:$4 sm:$0xff]   ;;  %v6624_v18 = vld [vmem:[%s7397_s8 + $0x40] ss:$8 sps:$4 sm:$0xff]   ;;  %v6626_v20 = vld [vmem:[%s7397_s8 + $0x34] ss:$8 sps:$4 sm:$0xff]   ;;  %799 = vperm.xlu0 %6600, %v685_v57  }
  0x20   : > { %v6622_v17 = vld [vmem:[%s7397_s8 + $0x144] ss:$8 sps:$4 sm:$0xff]   ;;  %v6625_v19 = vld [vmem:[%s7397_s8 + $0x140] ss:$8 sps:$4 sm:$0xff]   ;;  %v6628_v21 = vld [vmem:[%s7397_s8 + $0x134] ss:$8 sps:$4 sm:$0xff]   ;;  %804 = vperm.xlu1 %6601, %v686_v62  }
  0x21   : > { %2817 = vmatpush1.bf16.msra.mxu0 %v6612_v10  ;;  %v6630_v22 = vld [vmem:[%s7397_s8 + $0x30] ss:$8 sps:$4 sm:$0xff]   ;;  %v6632_v24 = vld [vmem:[%s7397_s8 + $0x24] ss:$8 sps:$4 sm:$0xff]   ;;  %v6636_v26 = vld [vmem:[%s7397_s8 + $0x20] ss:$8 sps:$4 sm:$0xff]  }
  0x22   : > { %3170 = vmatpush1.bf16.msra.mxu1 %v6613_v11  ;;  %2818 = vmatprep.subr.bf16.mxu0 %v6614_v12  ;;  %v6631_v23 = vld [vmem:[%s7397_s8 + $0x130] ss:$8 sps:$4 sm:$0xff]   ;;  %v6634_v25 = vld [vmem:[%s7397_s8 + $0x124] ss:$8 sps:$4 sm:$0xff]   ;;  %v6637_v27 = vld [vmem:[%s7397_s8 + $0x120] ss:$8 sps:$4 sm:$0xff]  }
  0x23   : > { %3171 = vmatprep.subr.bf16.mxu1 %v6616_v13  ;;  %v6638_v28 = vld [vmem:[%s7397_s8 + $0x14] ss:$8 sps:$4 sm:$0xff]   ;;  %v6642_v30 = vld [vmem:[%s7397_s8 + $0x10] ss:$8 sps:$4 sm:$0xff]   ;;  %v6644_v32 = vld [vmem:[%s7397_s8 + $0x4] ss:$8 sps:$4 sm:$0xff]   ;;  %959 = vperm.xlu0 %6600, %v717_v63  }
  0x24   : > { %v6640_v29 = vld [vmem:[%s7397_s8 + $0x114] ss:$8 sps:$4 sm:$0xff]   ;;  %v6643_v31 = vld [vmem:[%s7397_s8 + $0x110] ss:$8 sps:$4 sm:$0xff]   ;;  %v6646_v33 = vld [vmem:[%s7397_s8 + $0x104] ss:$8 sps:$4 sm:$0xff]  }
  0x25   : > { %2819 = vmatpush1.bf16.msra.mxu0 %v6618_v14  ;;  %v6648_v34 = vld [vmem:[%s7397_s8] ss:$8 sps:$4 sm:$0xff]   ;;  %v6650_v36 = vld [vmem:[%s7397_s8 + $0xf4] ss:$8 sps:$4 sm:$0xff]   ;;  %v6654_v38 = vld [vmem:[%s7397_s8 + $0xf0] ss:$8 sps:$4 sm:$0xff]  }
  0x26   : > { %3172 = vmatpush1.bf16.msra.mxu1 %v6619_v15  ;;  %2820 = vmatprep.subr.bf16.mxu0 %v6620_v16  ;;  %v6649_v35 = vld [vmem:[%s7397_s8 + $0x100] ss:$8 sps:$4 sm:$0xff]   ;;  %v6652_v37 = vld [vmem:[%s7397_s8 + $0x1f4] ss:$8 sps:$4 sm:$0xff]   ;;  %v6655_v39 = vld [vmem:[%s7397_s8 + $0x1f0] ss:$8 sps:$4 sm:$0xff]  }
  0x27   : > { %3173 = vmatprep.subr.bf16.mxu1 %v6622_v17  ;;  %v6656_v40 = vld [vmem:[%s7397_s8 + $0xe4] ss:$8 sps:$4 sm:$0xff]   ;;  %v6660_v42 = vld [vmem:[%s7397_s8 + $0xe0] ss:$8 sps:$4 sm:$0xff]   ;;  %v6662_v44 = vld [vmem:[%s7397_s8 + $0xd4] ss:$8 sps:$4 sm:$0xff]  }
  0x28   : > { %v6658_v41 = vld [vmem:[%s7397_s8 + $0x1e4] ss:$8 sps:$4 sm:$0xff]   ;;  %v6661_v43 = vld [vmem:[%s7397_s8 + $0x1e0] ss:$8 sps:$4 sm:$0xff]   ;;  %v6664_v45 = vld [vmem:[%s7397_s8 + $0x1d4] ss:$8 sps:$4 sm:$0xff]  }
  0x29   : > { %2821 = vmatpush1.bf16.msra.mxu0 %v6624_v18  ;;  %v6666_v46 = vld [vmem:[%s7397_s8 + $0xd0] ss:$8 sps:$4 sm:$0xff]   ;;  %v6668_v48 = vld [vmem:[%s7397_s8 + $0xc4] ss:$8 sps:$4 sm:$0xff]   ;;  %v6672_v50 = vld [vmem:[%s7397_s8 + $0xc0] ss:$8 sps:$4 sm:$0xff]  }
  0x2a   : > { %3174 = vmatpush1.bf16.msra.mxu1 %v6625_v19  ;;  %2822 = vmatprep.subr.bf16.mxu0 %v6626_v20  ;;  %v6667_v47 = vld [vmem:[%s7397_s8 + $0x1d0] ss:$8 sps:$4 sm:$0xff]   ;;  %v6670_v49 = vld [vmem:[%s7397_s8 + $0x1c4] ss:$8 sps:$4 sm:$0xff]   ;;  %v6673_v51 = vld [vmem:[%s7397_s8 + $0x1c0] ss:$8 sps:$4 sm:$0xff]  }
  0x2b   : > { %3175 = vmatprep.subr.bf16.mxu1 %v6628_v21  ;;  %v6674_v52 = vld [vmem:[%s7397_s8 + $0xb4] ss:$8 sps:$4 sm:$0xff]   ;;  %v6678_v58 = vld [vmem:[%s7397_s8 + $0xb0] ss:$8 sps:$4 sm:$0xff]   ;;  %v6680_v60 = vld [vmem:[%s7397_s8 + $0xa4] ss:$8 sps:$4 sm:$0xff]  }
  0x2c   : > { %v6676_v55 = vld [vmem:[%s7397_s8 + $0x1b4] ss:$8 sps:$4 sm:$0xff]   ;;  %v6679_v59 = vld [vmem:[%s7397_s8 + $0x1b0] ss:$8 sps:$4 sm:$0xff]   ;;  %v6682_v61 = vld [vmem:[%s7397_s8 + $0x1a4] ss:$8 sps:$4 sm:$0xff]  }
  0x2d   : > { %2823 = vmatpush1.bf16.msra.mxu0 %v6630_v22  ;;  %v6684_v0 = vld [vmem:[%s7397_s8 + $0xa0] ss:$8 sps:$4 sm:$0xff]   ;;  %v6686_v3 = vld [vmem:[%s7397_s8 + $0x94] ss:$8 sps:$4 sm:$0xff]   ;;  %v6690_v7 = vld [vmem:[%s7397_s8 + $0x90] ss:$8 sps:$4 sm:$0xff]  }
  0x2e   : > { %3176 = vmatpush1.bf16.msra.mxu1 %v6631_v23  ;;  %2824 = vmatprep.subr.bf16.mxu0 %v6632_v24  ;;  %v6685_v2 = vld [vmem:[%s7397_s8 + $0x1a0] ss:$8 sps:$4 sm:$0xff]   ;;  %v6688_v4 = vld [vmem:[%s7397_s8 + $0x194] ss:$8 sps:$4 sm:$0xff]   ;;  %v6691_v8 = vld [vmem:[%s7397_s8 + $0x190] ss:$8 sps:$4 sm:$0xff]  }
  0x2f   : > { %3177 = vmatprep.subr.bf16.mxu1 %v6634_v25  ;;  %v718_v5 = vld [vmem:[%s10396_s2 + $0x168] sm:$0xff]  ;;  %v683_v6 = vld [vmem:[%s10396_s2 + $0x50] sm:$0xff]  ;;  %v684_v11 = vld [vmem:[%s10396_s2 + $0x58] sm:$0xff] }
  0x30   : > { %v6692_v9 = vld [vmem:[%s7397_s8 + $0x84] ss:$8 sps:$4 sm:$0xff]   ;;  %964 = vperm.xlu1 %6601, %v718_v5   ;;  %789 = vperm.xlu0 %6600, %v683_v6   ;;  %v715_v12 = vld [vmem:[%s10396_s2 + $0x150] sm:$0xff]  ;;  %v6696_v13 = vld [vmem:[%s7397_s8 + $0x80] ss:$8 sps:$4 sm:$0xff]  }
  0x31   : > { %2825 = vmatpush1.bf16.msra.mxu0 %v6636_v26  ;;  %v6694_v10 = vld [vmem:[%s7397_s8 + $0x184] ss:$8 sps:$4 sm:$0xff]   ;;  %v6697_v14 = vld [vmem:[%s7397_s8 + $0x180] ss:$8 sps:$4 sm:$0xff]   ;;  %v716_v17 = vld [vmem:[%s10396_s2 + $0x158] sm:$0xff] }
  0x32   : > { %3178 = vmatpush1.bf16.msra.mxu1 %v6637_v27  ;;  %2826 = vmatprep.subr.bf16.mxu0 %v6638_v28  ;;  %v6698_v15 = vld [vmem:[%s10395_s1] ss:$28 sps:$4 sm:$0xff]   ;;  %v6701_v16 = vld [vmem:[%s10395_s1 + $0x8] ss:$28 sps:$4 sm:$0xff]   ;;  %v6708_v23 = vld [vmem:[%s10395_s1 + $0x38] ss:$28 sps:$4 sm:$0xff]  }
  0x33   : > { %3179 = vmatprep.subr.bf16.mxu1 %v6640_v29  ;;  %v681_v18 = vld [vmem:[%s10396_s2 + $0x40] sm:$0xff]  ;;  %v6704_v19 = vld [vmem:[%s10395_s1 + $0x3c] ss:$28 sps:$4 sm:$0xff]   ;;  %v682_v21 = vld [vmem:[%s10396_s2 + $0x48] sm:$0xff] }
  0x34   : > { %794 = vperm.xlu1 %6601, %v684_v11   ;;  %949 = vperm.xlu0 %6600, %v715_v12   ;;  %v6706_v20 = vld [vmem:[%s10395_s1 + $0x44] ss:$28 sps:$4 sm:$0xff]   ;;  %v714_v25 = vld [vmem:[%s10396_s2 + $0x148] sm:$0xff]  ;;  %v679_v26 = vld [vmem:[%s10396_s2 + $0x30] sm:$0xff] }
  0x35   : > { %2827 = vmatpush1.bf16.msra.mxu0 %v6642_v30  ;;  %v713_v22 = vld [vmem:[%s10396_s2 + $0x140] sm:$0xff]  ;;  %v6710_v27 = vld [vmem:[%s10395_s1 + $0x74] ss:$28 sps:$4 sm:$0xff]   ;;  %v6712_v28 = vld [vmem:[%s10395_s1 + $0x7c] ss:$28 sps:$4 sm:$0xff]  }
  0x36   : > { %3180 = vmatpush1.bf16.msra.mxu1 %v6643_v31  ;;  %2828 = vmatprep.subr.bf16.mxu0 %v6644_v32  ;;  %v6709_v24 = vld [vmem:[%s10395_s1 + $0x40] ss:$28 sps:$4 sm:$0xff]   ;;  %v711_v30 = vld [vmem:[%s10396_s2 + $0x130] sm:$0xff] }
  0x37   : > { %3181 = vmatprep.subr.bf16.mxu1 %v6646_v33  ;;  %v680_v29 = vld [vmem:[%s10396_s2 + $0x38] sm:$0xff]  ;;  %v6714_v31 = vld [vmem:[%s10395_s1 + $0x70] ss:$28 sps:$4 sm:$0xff]   ;;  %v705_v54 = vld [vmem:[%s10396_s2 + $0x100] sm:$0xff] }
  0x38   : > { %954 = vperm.xlu1 %6601, %v716_v17   ;;  %779 = vperm.xlu0 %6600, %v681_v18   ;;  %v6715_v32 = vld [vmem:[%s10395_s1 + $0x78] ss:$28 sps:$4 sm:$0xff]   ;;  %v6733_v56 = vld [vmem:[%s10395_s1 + $0x120] ss:$28 sps:$4 sm:$0xff]   ;;  %v6738_v63 = vld [vmem:[%s10395_s1 + $0x150] ss:$28 sps:$4 sm:$0xff]  }
  0x39   : > { %2829 = vmatpush1.bf16.msra.mxu0 %v6648_v34  ;;  %v712_v33 = vld [vmem:[%s10396_s2 + $0x138] sm:$0xff]  ;;  %v677_v34 = vld [vmem:[%s10396_s2 + $0x20] sm:$0xff]  ;;  %v6734_v57 = vld [vmem:[%s10395_s1 + $0x154] ss:$28 sps:$4 sm:$0xff]  }
  0x3a   : > { %3182 = vmatpush1.bf16.msra.mxu1 %v6649_v35  ;;  %2830 = vmatprep.subr.bf16.mxu0 %v6650_v36  ;;  %v6716_v35 = vld [vmem:[%s10395_s1 + $0xac] ss:$28 sps:$4 sm:$0xff]   ;;  %v6718_v36 = vld [vmem:[%s10395_s1 + $0xb4] ss:$28 sps:$4 sm:$0xff]   ;;  %v6746_v12 = vld [vmem:[%s10395_s1 + $0x1c4] ss:$28 sps:$4 sm:$0xff]  }
  0x3b   : > { %3183 = vmatprep.subr.bf16.mxu1 %v6652_v37  ;;  %v678_v37 = vld [vmem:[%s10396_s2 + $0x28] sm:$0xff]  ;;  %v735_v62 = vld [vmem:[%s10396_s2 + $0x1f0] sm:$0xff]  ;;  %v700_v17 = vld [vmem:[%s10396_s2 + $0xd8] sm:$0xff] }
  0x3c   : > { %784 = vperm.xlu1 %6601, %v682_v21   ;;  %939 = vperm.xlu0 %6600, %v713_v22   ;;  %v6742_v5 = vld [vmem:[%s10395_s1 + $0x194] ss:$28 sps:$4 sm:$0xff]   ;;  %v6751_v21 = vld [vmem:[%s10395_s1 + $0x1c8] ss:$28 sps:$4 sm:$0xff]   ;;  %v732_v22 = vld [vmem:[%s10396_s2 + $0x1d8] sm:$0xff] }
  0x3d   : > { %2831 = vmatpush2.bf16.msra.mxu0 %v6654_v38  ;;  %v709_v38 = vld [vmem:[%s10396_s2 + $0x120] sm:$0xff]  ;;  %v6826_v6 = vld [vmem:[%s7397_s8 + $0x274] ss:$8 sps:$4 sm:$0xff]   ;;  %v6745_v11 = vld [vmem:[%s10395_s1 + $0x190] ss:$28 sps:$4 sm:$0xff]  }
  0x3e   : > { %3184 = vmatpush2.bf16.msra.mxu1 %v6655_v39  ;;  %2832 = vmatprep.subr.bf16.mxu0 %v6656_v40  ;;  %v6720_v39 = vld [vmem:[%s10395_s1 + $0xa8] ss:$28 sps:$4 sm:$0xff]   ;;  %v6721_v40 = vld [vmem:[%s10395_s1 + $0xb0] ss:$28 sps:$4 sm:$0xff]  }
  0x3f   : > { %3185 = vmatprep.subr.bf16.mxu1 %v6658_v41  ;;  %v710_v41 = vld [vmem:[%s10396_s2 + $0x128] sm:$0xff]  ;;  %v731_v18 = vld [vmem:[%s10396_s2 + $0x1d0] sm:$0xff] }
  0x40   : > { %944 = vperm.xlu1 %6601, %v714_v25   ;;  %769 = vperm.xlu0 %6600, %v679_v26   ;;  %v6754_v25 = vld [vmem:[%s10395_s1 + $0x204] ss:$28 sps:$4 sm:$0xff]   ;;  %v698_v26 = vld [vmem:[%s10396_s2 + $0xc8] sm:$0xff] }
  0x41   : > { %2833 = vmatpush2.bf16.msra.mxu0 %v6660_v42  ;;  %v675_v42 = vld [vmem:[%s10396_s2 + $0x10] sm:$0xff] }
  0x42   : > { %3186 = vmatpush2.bf16.msra.mxu1 %v6661_v43  ;;  %2834 = vmatprep.subr.bf16.mxu0 %v6662_v44  ;;  %v6722_v43 = vld [vmem:[%s10395_s1 + $0xe4] ss:$28 sps:$4 sm:$0xff]   ;;  %v6724_v44 = vld [vmem:[%s10395_s1 + $0xec] ss:$28 sps:$4 sm:$0xff]  }
  0x43   : > { %3187 = vmatprep.subr.bf16.mxu1 %v6664_v45  ;;  %v676_v45 = vld [vmem:[%s10396_s2 + $0x18] sm:$0xff] }
  0x44   : > { %774 = vperm.xlu1 %6601, %v680_v29   ;;  %929 = vperm.xlu0 %6600, %v711_v30   ;;  %v6757_v29 = vld [vmem:[%s10395_s1 + $0x200] ss:$28 sps:$4 sm:$0xff]   ;;  %v730_v30 = vld [vmem:[%s10396_s2 + $0x1c8] sm:$0xff] }
  0x45   : > { %2835 = vmatpush2.bf16.msra.mxu0 %v6666_v46  ;;  %v707_v46 = vld [vmem:[%s10396_s2 + $0x110] sm:$0xff] }
  0x46   : > { %3188 = vmatpush2.bf16.msra.mxu1 %v6667_v47  ;;  %2836 = vmatprep.subr.bf16.mxu0 %v6668_v48  ;;  %v6726_v47 = vld [vmem:[%s10395_s1 + $0xe0] ss:$28 sps:$4 sm:$0xff]   ;;  %v6727_v48 = vld [vmem:[%s10395_s1 + $0xe8] ss:$28 sps:$4 sm:$0xff]  }
  0x47   : > { %3189 = vmatprep.subr.bf16.mxu1 %v6670_v49  ;;  %v708_v49 = vld [vmem:[%s10396_s2 + $0x118] sm:$0xff] }
  0x48   : > { %934 = vperm.xlu1 %6601, %v712_v33   ;;  %759 = vperm.xlu0 %6600, %v677_v34   ;;  %v6856_v33 = vld [vmem:[%s7397_s8 + $0x254] ss:$8 sps:$4 sm:$0xff]  }
  0x49   : > { %2837 = vmatpush2.bf16.msra.mxu0 %v6672_v50  ;;  %v673_v50 = vld [vmem:[%s10396_s2] sm:$0xff]  ;;  %v6758_v34 = vld [vmem:[%s10395_s1 + $0x234] ss:$28 sps:$4 sm:$0xff]  }
  0x4a   : > { %3190 = vmatpush2.bf16.msra.mxu1 %v6673_v51  ;;  %2838 = vmatprep.subr.bf16.mxu0 %v6674_v52  ;;  %v6728_v51 = vld [vmem:[%s10395_s1 + $0x11c] ss:$28 sps:$4 sm:$0xff]   ;;  %v6730_v52 = vld [vmem:[%s10395_s1 + $0x124] ss:$28 sps:$4 sm:$0xff]  }
  0x4b   : > { %3191 = vmatprep.subr.bf16.mxu1 %v6676_v55  ;;  %v6732_v55 = vld [vmem:[%s10395_s1 + $0x118] ss:$28 sps:$4 sm:$0xff]  }
  0x4c   : > { %764 = vperm.xlu1 %6601, %v678_v37   ;;  %919 = vperm.xlu0 %6600, %v709_v38   ;;  %v727_v37 = vld [vmem:[%s10396_s2 + $0x1b0] sm:$0xff] }
  0x4d   : > { %2839 = vmatpush2.bf16.msra.mxu0 %v6678_v58  ;;  %v706_v58 = vld [vmem:[%s10396_s2 + $0x108] sm:$0xff] }
  0x4e   : > { %3192 = vmatpush2.bf16.msra.mxu1 %v6679_v59  ;;  %2840 = vmatprep.subr.bf16.mxu0 %v6680_v60  ;;  %v703_v59 = vld [vmem:[%s10396_s2 + $0xf0] sm:$0xff]  ;;  %v6736_v60 = vld [vmem:[%s10395_s1 + $0x15c] ss:$28 sps:$4 sm:$0xff]  }
  0x4f   : > { %3193 = vmatprep.subr.bf16.mxu1 %v6682_v61  ;;  %v704_v61 = vld [vmem:[%s10396_s2 + $0xf8] sm:$0xff]  ;;  %v6762_v38 = vld [vmem:[%s10395_s1 + $0x230] ss:$28 sps:$4 sm:$0xff]  }
  0x50   : > { %924 = vperm.xlu1 %6601, %v710_v41   ;;  %749 = vperm.xlu0 %6600, %v675_v42   ;;  %v693_v41 = vld [vmem:[%s10396_s2 + $0xa0] sm:$0xff] }
  0x51   : > { %2841 = vmatpush2.bf16.msra.mxu0 %v6684_v0  ;;  %v6739_v0 = vld [vmem:[%s10395_s1 + $0x158] ss:$28 sps:$4 sm:$0xff]   ;;  %v6865_v42 = vld [vmem:[%s7397_s8 + $0x244] ss:$8 sps:$4 sm:$0xff]  }
  0x52   : > { %3194 = vmatpush2.bf16.msra.mxu1 %v6685_v2  ;;  %2842 = vmatprep.subr.bf16.mxu0 %v6686_v3  ;;  %v6740_v2 = vld [vmem:[%s10395_s1 + $0x18c] ss:$28 sps:$4 sm:$0xff]   ;;  %v736_v3 = vld [vmem:[%s10396_s2 + $0x1f8] sm:$0xff] }
  0x53   : > { %3195 = vmatprep.subr.bf16.mxu1 %v6688_v4  ;;  %v701_v4 = vld [vmem:[%s10396_s2 + $0xe0] sm:$0xff] }
  0x54   : > { %754 = vperm.xlu1 %6601, %v676_v45   ;;  %909 = vperm.xlu0 %6600, %v707_v46   ;;  %v6766_v45 = vld [vmem:[%s10395_s1 + $0x274] ss:$28 sps:$4 sm:$0xff]   ;;  %v694_v46 = vld [vmem:[%s10396_s2 + $0xa8] sm:$0xff] }
  0x55   : > { %2843 = vmatpush2.bf16.msra.mxu0 %v6690_v7  ;;  %v702_v7 = vld [vmem:[%s10396_s2 + $0xe8] sm:$0xff] }
  0x56   : > { %3196 = vmatpush2.bf16.msra.mxu1 %v6691_v8  ;;  %2844 = vmatprep.subr.bf16.mxu0 %v6692_v9  ;;  %v733_v8 = vld [vmem:[%s10396_s2 + $0x1e0] sm:$0xff]  ;;  %v6824_v9 = vld [vmem:[%s7397_s8 + $0x270] ss:$8 sps:$4 sm:$0xff]  }
  0x57   : > { %3197 = vmatprep.subr.bf16.mxu1 %v6694_v10  ;;  %v6744_v10 = vld [vmem:[%s10395_s1 + $0x188] ss:$28 sps:$4 sm:$0xff]  }
  0x58   : > { %914 = vperm.xlu1 %6601, %v708_v49   ;;  %739 = vperm.xlu0 %6600, %v673_v50   ;;  %v6872_v49 = vld [vmem:[%s7397_s8 + $0x230] ss:$8 sps:$4 sm:$0xff]   ;;  %v6768_v50 = vld [vmem:[%s10395_s1 + $0x268] ss:$28 sps:$4 sm:$0xff]  }
  0x59   : > { %2845 = vmatpush2.bf16.msra.mxu0 %v6696_v13  ;;  %v734_v13 = vld [vmem:[%s10396_s2 + $0x1e8] sm:$0xff] }
  0x5a   : > { %3198 = vmatpush2.bf16.msra.mxu1 %v6697_v14  ;;  %3520 = vmatprep.subr.bf16.mxu0 %v6826_v6  ;;  %v699_v14 = vld [vmem:[%s10396_s2 + $0xd0] sm:$0xff] }
  0x5b   : > { %6509 = vmatprep.subr.bf16.mxu1 %v6826_v6  ;;  %v6887_v6 = vld [vmem:[%s7397_s8 + $0x200] ss:$8 sps:$4 sm:$0xff]  }
  0x5c   : > { %2847 = vmatmul.mubr.bf16.vlgmr.msra.gmra.mxu0 %v6698_v15  ;;  %744 = vperm.xlu1 %6601, %v674_v53   ;;  %v6748_v15 = vld [vmem:[%s10395_s1 + $0x1cc] ss:$28 sps:$4 sm:$0xff]  }
  0x5d   : > { %3200 = vmatmul.mubr.bf16.vlgmr.msra.gmra.mxu1 %v6701_v16  ;;  %2856 = vmatprep.mubr.bf16.mxu0 %v6704_v19  ;;  %v6841_v16 = vld [vmem:[%s7397_s8 + $0x264] ss:$8 sps:$4 sm:$0xff]   ;;  %v6839_v19 = vld [vmem:[%s7397_s8 + $0x260] ss:$8 sps:$4 sm:$0xff]  }
  0x5e   : > { %3209 = vmatprep.mubr.bf16.mxu1 %v6706_v20  ;;  %899 = vperm.xlu0 %6600, %v705_v54   ;;  %v6750_v20 = vld [vmem:[%s10395_s1 + $0x1c0] ss:$28 sps:$4 sm:$0xff]   ;;  %v6877_v53 = vld [vmem:[%s7397_s8 + $0x224] ss:$8 sps:$4 sm:$0xff]   ;;  %v691_v54 = vld [vmem:[%s10396_s2 + $0x90] sm:$0xff] }
  0x5f   : > { %6525 = vmatpush1.bf16.msra.mxu1 %v6824_v9  ;;  %3521 = vmatpush1.bf16.msra.mxu0 %v6824_v9 }
  0x60   : > { %904 = vperm.xlu1 %6601, %v706_v58   ;;  %6510 = vmatprep.subr.bf16.mxu1 %v6841_v16  ;;  %v723_v58 = vld [vmem:[%s10396_s2 + $0x190] sm:$0xff] }
  0x61   : > { %3522 = vmatprep.subr.bf16.mxu0 %v6841_v16 }
  0x62   : > { %889 = vperm.xlu0 %6600, %v703_v59   ;;  %v6875_v59 = vld [vmem:[%s7397_s8 + $0x220] ss:$8 sps:$4 sm:$0xff]  }
  0x63   : > { %6526 = vmatpush1.bf16.msra.mxu1 %v6839_v19  ;;  %3523 = vmatpush1.bf16.msra.mxu0 %v6839_v19  ;;  %v6910_v19 = vld [vmem:[%s7397_s8 + $0x2d4] ss:$8 sps:$4 sm:$0xff]  }
  0x64   : > { %2857 = vmatmul.mubr.bf16.gmra.mxu0 %v6708_v23  ;;  %894 = vperm.xlu1 %6601, %v704_v61   ;;  %v697_v23 = vld [vmem:[%s10396_s2 + $0xc0] sm:$0xff] }
  0x65   : > { %3210 = vmatmul.mubr.bf16.gmra.mxu1 %v6709_v24  ;;  %2866 = vmatprep.mubr.bf16.mxu0 %v6710_v27  ;;  %v6752_v24 = vld [vmem:[%s10395_s1 + $0x1fc] ss:$28 sps:$4 sm:$0xff]   ;;  %v729_v27 = vld [vmem:[%s10396_s2 + $0x1c0] sm:$0xff] }
  0x66   : > { %3219 = vmatprep.mubr.bf16.mxu1 %v6712_v28  ;;  %1049 = vperm.xlu0 %6600, %v735_v62   ;;  %v6756_v28 = vld [vmem:[%s10395_s1 + $0x1f8] ss:$28 sps:$4 sm:$0xff]   ;;  %v6774_v61 = vld [vmem:[%s10395_s1 + $0x2a0] ss:$28 sps:$4 sm:$0xff]   ;;  %v6775_v62 = vld [vmem:[%s10395_s1 + $0x2a8] ss:$28 sps:$4 sm:$0xff]  }
  0x67   : > { %6511 = vmatprep.subr.bf16.mxu1 %v6856_v33  ;;  %3524 = vmatprep.subr.bf16.mxu0 %v6856_v33  ;;  %v6793_v33 = vld [vmem:[%s10395_s1 + $0x350] ss:$28 sps:$4 sm:$0xff]  }
  0x68   : > { %1054 = vperm.xlu1 %6601, %v736_v3   ;;  %v6776_v3 = vld [vmem:[%s10395_s1 + $0x2dc] ss:$28 sps:$4 sm:$0xff]  }
  0x6a   : > { %879 = vperm.xlu0 %6600, %v701_v4   ;;  %v6778_v4 = vld [vmem:[%s10395_s1 + $0x2e4] ss:$28 sps:$4 sm:$0xff]  }
  0x6c   : > { %2867 = vmatmul.mubr.bf16.gmra.mxu0 %v6714_v31  ;;  %884 = vperm.xlu1 %6601, %v702_v7   ;;  %v695_v31 = vld [vmem:[%s10396_s2 + $0xb0] sm:$0xff]  ;;  %v6889_v7 = vld [vmem:[%s7397_s8 + $0x204] ss:$8 sps:$4 sm:$0xff]  }
  0x6d   : > { %3220 = vmatmul.mubr.bf16.gmra.mxu1 %v6715_v32  ;;  %2876 = vmatprep.mubr.bf16.mxu0 %v6716_v35  ;;  %v6854_v32 = vld [vmem:[%s7397_s8 + $0x250] ss:$8 sps:$4 sm:$0xff]  }
  0x6e   : > { %3229 = vmatprep.mubr.bf16.mxu1 %v6718_v36  ;;  %1039 = vperm.xlu0 %6600, %v733_v8   ;;  %v6760_v35 = vld [vmem:[%s10395_s1 + $0x23c] ss:$28 sps:$4 sm:$0xff]  }
  0x6f   : > { %v696_v36 = vld [vmem:[%s10396_s2 + $0xb8] sm:$0xff]  ;;  %6527 = vmatpush1.bf16.msra.mxu1 %v6854_v32  ;;  %3525 = vmatpush1.bf16.msra.mxu0 %v6854_v32  ;;  %v6792_v32 = vld [vmem:[%s10395_s1 + $0x348] ss:$28 sps:$4 sm:$0xff]  }
  0x70   : > { %1044 = vperm.xlu1 %6601, %v734_v13   ;;  %3526 = vmatprep.subr.bf16.mxu0 %v6865_v42  ;;  %v6898_v8 = vld [vmem:[%s7397_s8 + $0x2f4] ss:$8 sps:$4 sm:$0xff]  }
  0x71   : > { %6512 = vmatprep.subr.bf16.mxu1 %v6865_v42  ;;  %v6782_v13 = vld [vmem:[%s10395_s1 + $0x314] ss:$28 sps:$4 sm:$0xff]   ;;  %v6925_v42 = vld [vmem:[%s7397_s8 + $0x2a4] ss:$8 sps:$4 sm:$0xff]  }
  0x72   : > { %869 = vperm.xlu0 %6600, %v699_v14   ;;  %v6784_v14 = vld [vmem:[%s10395_s1 + $0x31c] ss:$28 sps:$4 sm:$0xff]  }
  0x74   : > { %2877 = vmatmul.mubr.bf16.gmra.mxu0 %v6720_v39  ;;  %874 = vperm.xlu1 %6601, %v700_v17   ;;  %v6763_v39 = vld [vmem:[%s10395_s1 + $0x238] ss:$28 sps:$4 sm:$0xff]   ;;  %v6899_v17 = vld [vmem:[%s7397_s8 + $0x2e0] ss:$8 sps:$4 sm:$0xff]  }
  0x75   : > { %3230 = vmatmul.mubr.bf16.gmra.mxu1 %v6721_v40  ;;  %2886 = vmatprep.mubr.bf16.mxu0 %v6722_v43  ;;  %v728_v40 = vld [vmem:[%s10396_s2 + $0x1b8] sm:$0xff]  ;;  %v6863_v43 = vld [vmem:[%s7397_s8 + $0x240] ss:$8 sps:$4 sm:$0xff]  }
  0x76   : > { %3239 = vmatprep.mubr.bf16.mxu1 %v6724_v44  ;;  %1029 = vperm.xlu0 %6600, %v731_v18   ;;  %v6764_v44 = vld [vmem:[%s10395_s1 + $0x26c] ss:$28 sps:$4 sm:$0xff]  }
  0x77   : > { %3527 = vmatpush1.bf16.msra.mxu0 %v6863_v43  ;;  %6528 = vmatpush1.bf16.msra.mxu1 %v6863_v43  ;;  %v6901_v18 = vld [vmem:[%s7397_s8 + $0x2e4] ss:$8 sps:$4 sm:$0xff]   ;;  %v6934_v43 = vld [vmem:[%s7397_s8 + $0x294] ss:$8 sps:$4 sm:$0xff]  }
  0x78   : > { %1034 = vperm.xlu1 %6601, %v732_v22  }
  0x7a   : > { %859 = vperm.xlu0 %6600, %v697_v23  }
  0x7c   : > { %2887 = vmatmul.mubr.bf16.gmra.mxu0 %v6726_v47  ;;  %864 = vperm.xlu1 %6601, %v698_v26   ;;  %v725_v47 = vld [vmem:[%s10396_s2 + $0x1a0] sm:$0xff]  ;;  %v6790_v26 = vld [vmem:[%s10395_s1 + $0x354] ss:$28 sps:$4 sm:$0xff]  }
  0x7d   : > { %3240 = vmatmul.mubr.bf16.gmra.mxu1 %v6727_v48  ;;  %2896 = vmatprep.mubr.bf16.mxu0 %v6728_v51  ;;  %v6874_v48 = vld [vmem:[%s7397_s8 + $0x234] ss:$8 sps:$4 sm:$0xff]   ;;  %v6769_v51 = vld [vmem:[%s10395_s1 + $0x270] ss:$28 sps:$4 sm:$0xff]  }
  0x7e   : > { %3249 = vmatprep.mubr.bf16.mxu1 %v6730_v52  ;;  %1019 = vperm.xlu0 %6600, %v729_v27   ;;  %v726_v52 = vld [vmem:[%s10396_s2 + $0x1a8] sm:$0xff] }
  0x7f   : > { %3528 = vmatprep.subr.bf16.mxu0 %v6874_v48  ;;  %6513 = vmatprep.subr.bf16.mxu1 %v6874_v48  ;;  %v6932_v48 = vld [vmem:[%s7397_s8 + $0x290] ss:$8 sps:$4 sm:$0xff]  }
  0x80   : > { %1024 = vperm.xlu1 %6601, %v730_v30   ;;  %3529 = vmatpush1.bf16.msra.mxu0 %v6872_v49  ;;  %v6913_v30 = vld [vmem:[%s7397_s8 + $0x2c4] ss:$8 sps:$4 sm:$0xff]  }
  0x81   : > { %6529 = vmatpush1.bf16.msra.mxu1 %v6872_v49  ;;  %3530 = vmatprep.subr.bf16.mxu0 %v6877_v53  ;;  %v6800_v49 = vld [vmem:[%s10395_s1 + $0x3bc] ss:$28 sps:$4 sm:$0xff]  }
  0x82   : > { %849 = vperm.xlu0 %6600, %v695_v31   ;;  %6514 = vmatprep.subr.bf16.mxu1 %v6877_v53  ;;  %v6922_v31 = vld [vmem:[%s7397_s8 + $0x2b4] ss:$8 sps:$4 sm:$0xff]   ;;  %v6935_v53 = vld [vmem:[%s7397_s8 + $0x280] ss:$8 sps:$4 sm:$0xff]  }
  0x84   : > { %2897 = vmatmul.mubr.bf16.gmra.mxu0 %v6732_v55  ;;  %854 = vperm.xlu1 %6601, %v696_v36   ;;  %v6770_v55 = vld [vmem:[%s10395_s1 + $0x2a4] ss:$28 sps:$4 sm:$0xff]   ;;  %v6920_v36 = vld [vmem:[%s7397_s8 + $0x2b0] ss:$8 sps:$4 sm:$0xff]  }
  0x85   : > { %3250 = vmatmul.mubr.bf16.gmra.mxu1 %v6733_v56  ;;  %2906 = vmatprep.mubr.bf16.mxu0 %v6734_v57  ;;  %v6772_v56 = vld [vmem:[%s10395_s1 + $0x2ac] ss:$28 sps:$4 sm:$0xff]   ;;  %v692_v57 = vld [vmem:[%s10396_s2 + $0x98] sm:$0xff] }
  0x86   : > { %3259 = vmatprep.mubr.bf16.mxu1 %v6736_v60  ;;  %1009 = vperm.xlu0 %6600, %v727_v37   ;;  %v6886_v60 = vld [vmem:[%s7397_s8 + $0x214] ss:$8 sps:$4 sm:$0xff]   ;;  %v6794_v37 = vld [vmem:[%s10395_s1 + $0x384] ss:$28 sps:$4 sm:$0xff]  }
  0x87   : > { %3531 = vmatpush1.bf16.msra.mxu0 %v6875_v59  ;;  %6530 = vmatpush1.bf16.msra.mxu1 %v6875_v59  ;;  %v721_v59 = vld [vmem:[%s10396_s2 + $0x180] sm:$0xff] }
  0x88   : > { %1014 = vperm.xlu1 %6601, %v728_v40   ;;  %3532 = vmatprep.subr.bf16.mxu0 %v6886_v60 }
  0x89   : > { %6515 = vmatprep.subr.bf16.mxu1 %v6886_v60  ;;  %v6806_v60 = vld [vmem:[%s10395_s1 + $0x3f4] ss:$28 sps:$4 sm:$0xff]  }
  0x8a   : > { %839 = vperm.xlu0 %6600, %v693_v41   ;;  %v6923_v41 = vld [vmem:[%s7397_s8 + $0x2a0] ss:$8 sps:$4 sm:$0xff]  }
  0x8c   : > { %2907 = vmatmul.mubr.bf16.gmra.mxu0 %v6738_v63  ;;  %844 = vperm.xlu1 %6601, %v694_v46   ;;  %v724_v63 = vld [vmem:[%s10396_s2 + $0x198] sm:$0xff] }
  0x8d   : > { %3260 = vmatmul.mubr.bf16.gmra.mxu1 %v6739_v0  ;;  %2916 = vmatprep.mubr.bf16.mxu0 %v6740_v2  ;;  %v6884_v0 = vld [vmem:[%s7397_s8 + $0x210] ss:$8 sps:$4 sm:$0xff]   ;;  %v689_v2 = vld [vmem:[%s10396_s2 + $0x80] sm:$0xff] }
  0x8e   : > { %3269 = vmatprep.mubr.bf16.mxu1 %v6742_v5  ;;  %999 = vperm.xlu0 %6600, %v725_v47   ;;  %v690_v5 = vld [vmem:[%s10396_s2 + $0x88] sm:$0xff] }
  0x8f   : > { %3533 = vmatpush1.bf16.msra.mxu0 %v6884_v0  ;;  %6531 = vmatpush1.bf16.msra.mxu1 %v6884_v0  ;;  %v6952_v0 = vld [vmem:[%s7397_s8 + $0x354] ss:$8 sps:$4 sm:$0xff]  }
  0x90   : > { %1004 = vperm.xlu1 %6601, %v726_v52   ;;  %3534 = vmatprep.subr.bf16.mxu0 %v6889_v7 }
  0x91   : > { %6516 = vmatprep.subr.bf16.mxu1 %v6889_v7  ;;  %v6812_v7 = vld [vmem:[%s10395_s1 + $0x42c] ss:$28 sps:$4 sm:$0xff]  }
  0x92   : > { %829 = vperm.xlu0 %6600, %v691_v54   ;;  %v7819_v9 = vpop.permute.xlu0 %809  ;;  %v6937_v54 = vld [vmem:[%s7397_s8 + $0x284] ss:$8 sps:$4 sm:$0xff]  }
  0x93   : > { %3535 = vmatpush1.bf16.msra.mxu0 %v6887_v6  ;;  %6532 = vmatpush1.bf16.msra.mxu1 %v6887_v6  ;;  %v6811_v6 = vld [vmem:[%s10395_s1 + $0x3f8] ss:$28 sps:$4 sm:$0xff]  }
  0x94   : > { %2917 = vmatmul.mubr.bf16.gmra.mxu0 %v6744_v10  ;;  %834 = vperm.xlu1 %6601, %v692_v57   ;;  %v6780_v10 = vld [vmem:[%s10395_s1 + $0x2d8] ss:$28 sps:$4 sm:$0xff]  }
  0x95   : > { %3270 = vmatmul.mubr.bf16.gmra.mxu1 %v6745_v11  ;;  %2926 = vmatprep.mubr.bf16.mxu0 %v6746_v12  ;;  %v6781_v11 = vld [vmem:[%s10395_s1 + $0x2e0] ss:$28 sps:$4 sm:$0xff]   ;;  %v6896_v12 = vld [vmem:[%s7397_s8 + $0x2f0] ss:$8 sps:$4 sm:$0xff]  }
  0x96   : > { %3279 = vmatprep.mubr.bf16.mxu1 %v6748_v15  ;;  %989 = vperm.xlu0 %6600, %v723_v58   ;;  %v7834_v15 = vpop.permute.xlu1 %969  ;;  %v7836_v16 = vpop.permute.xlu0 %814 }
  0x97   : > { %3536 = vmatprep.subr.bf16.mxu0 %v6898_v8  ;;  %6517 = vmatprep.subr.bf16.mxu1 %v6898_v8  ;;  %v6814_v8 = vld [vmem:[%s10395_s1 + $0x434] ss:$28 sps:$4 sm:$0xff]  }
  0x98   : > { %994 = vperm.xlu1 %6601, %v724_v63   ;;  %3537 = vmatpush2.bf16.msra.mxu0 %v6896_v12 }
  0x99   : > { %6533 = vmatpush2.bf16.msra.mxu1 %v6896_v12  ;;  %3538 = vmatprep.subr.bf16.mxu0 %v6901_v18  ;;  %v6816_v12 = vld [vmem:[%s10395_s1 + $0x428] ss:$28 sps:$4 sm:$0xff]  }
  0x9a   : > { %819 = vperm.xlu0 %6600, %v689_v2   ;;  %v7847_v22 = vpop.permute.xlu1 %974  ;;  %v7849_v23 = vpop.permute.xlu0 %799  ;;  %6518 = vmatprep.subr.bf16.mxu1 %v6901_v18  ;;  %v722_v2 = vld [vmem:[%s10396_s2 + $0x188] sm:$0xff]  ;;  %v6818_v18 = vld [vmem:[%s10395_s1 + $0x464] ss:$28 sps:$4 sm:$0xff]  }
  0x9c   : > { %2927 = vmatmul.mubr.bf16.gmra.mxu0 %v6750_v20  ;;  %824 = vperm.xlu1 %6601, %v690_v5   ;;  %v6786_v20 = vld [vmem:[%s10395_s1 + $0x310] ss:$28 sps:$4 sm:$0xff]  }
  0x9d   : > { %3280 = vmatmul.mubr.bf16.gmra.mxu1 %v6751_v21  ;;  %2936 = vmatprep.mubr.bf16.mxu0 %v6752_v24  ;;  %v6787_v21 = vld [vmem:[%s10395_s1 + $0x318] ss:$28 sps:$4 sm:$0xff]  }
  0x9e   : > { %3289 = vmatprep.mubr.bf16.mxu1 %v6754_v25  ;;  %3539 = vmatpush2.bf16.msra.mxu0 %v6899_v17  ;;  %v6908_v24 = vld [vmem:[%s7397_s8 + $0x2d0] ss:$8 sps:$4 sm:$0xff]   ;;  %v6788_v25 = vld [vmem:[%s10395_s1 + $0x34c] ss:$28 sps:$4 sm:$0xff]   ;;  %v7858_v27 = vpop.permute.xlu1 %804 }
  0x9f   : > { %3540 = vmatprep.subr.bf16.mxu0 %v6910_v19  ;;  %6534 = vmatpush2.bf16.msra.mxu1 %v6899_v17  ;;  %v6817_v17 = vld [vmem:[%s10395_s1 + $0x430] ss:$28 sps:$4 sm:$0xff]  }
  0xa0   : > { %6519 = vmatprep.subr.bf16.mxu1 %v6910_v19  ;;  %979 = vperm.xlu0 %6600, %v721_v59   ;;  %v6820_v19 = vld [vmem:[%s10395_s1 + $0x46c] ss:$28 sps:$4 sm:$0xff]  }
  0xa1   : > { %984 = vperm.xlu1 %6601, %v722_v2  }
  0xa2   : > { %3541 = vmatpush2.bf16.msra.mxu0 %v6908_v24 }
  0xa3   : > { %6535 = vmatpush2.bf16.msra.mxu1 %v6908_v24  ;;  %3542 = vmatprep.subr.bf16.mxu0 %v6913_v30  ;;  %v6822_v24 = vld [vmem:[%s10395_s1 + $0x460] ss:$28 sps:$4 sm:$0xff]  }
  0xa4   : > { %2937 = vmatmul.mubr.bf16.gmra.mxu0 %v6756_v28  ;;  %v7860_v28 = vpop.permute.xlu0 %959  ;;  %6520 = vmatprep.subr.bf16.mxu1 %v6913_v30  ;;  %v6829_v30 = vld [vmem:[%s10395_s1 + $0x4a4] ss:$28 sps:$4 sm:$0xff]  }
  0xa5   : > { %3290 = vmatmul.mubr.bf16.gmra.mxu1 %v6757_v29  ;;  %2946 = vmatprep.mubr.bf16.mxu0 %v6758_v34  ;;  %v6911_v29 = vld [vmem:[%s7397_s8 + $0x2c0] ss:$8 sps:$4 sm:$0xff]  }
  0xa6   : > { %3299 = vmatprep.mubr.bf16.mxu1 %v6760_v35  ;;  %3543 = vmatpush2.bf16.msra.mxu0 %v6911_v29 }
  0xa7   : > { %3544 = vmatprep.subr.bf16.mxu0 %v6922_v31  ;;  %6536 = vmatpush2.bf16.msra.mxu1 %v6911_v29 }
  0xa8   : > { %6521 = vmatprep.subr.bf16.mxu1 %v6922_v31 }
  0xaa   : > { %3545 = vmatpush2.bf16.msra.mxu0 %v6920_v36 }
  0xab   : > { %v7871_v34 = vpop.permute.xlu1 %964  ;;  %v7873_v35 = vpop.permute.xlu0 %789  ;;  %6537 = vmatpush2.bf16.msra.mxu1 %v6920_v36  ;;  %3546 = vmatprep.subr.bf16.mxu0 %v6925_v42  ;;  %v6832_v36 = vld [vmem:[%s10395_s1 + $0x4a0] ss:$28 sps:$4 sm:$0xff]  }
  0xac   : > { %2947 = vmatmul.mubr.bf16.gmra.mxu0 %v6762_v38  ;;  %v6796_v38 = vld [vmem:[%s10395_s1 + $0x38c] ss:$28 sps:$4 sm:$0xff]   ;;  %6522 = vmatprep.subr.bf16.mxu1 %v6925_v42 }
  0xad   : > { %3300 = vmatmul.mubr.bf16.gmra.mxu1 %v6763_v39  ;;  %2956 = vmatprep.mubr.bf16.mxu0 %v6764_v44  ;;  %v6798_v44 = vld [vmem:[%s10395_s1 + $0x380] ss:$28 sps:$4 sm:$0xff]  }
  0xae   : > { %3309 = vmatprep.mubr.bf16.mxu1 %v6766_v45  ;;  %v6799_v45 = vld [vmem:[%s10395_s1 + $0x388] ss:$28 sps:$4 sm:$0xff]   ;;  %3547 = vmatpush2.bf16.msra.mxu0 %v6923_v41 }
  0xaf   : > { %v7882_v39 = vpop.permute.xlu1 %794  ;;  %v7884_v40 = vpop.permute.xlu0 %949  ;;  %3548 = vmatprep.subr.bf16.mxu0 %v6934_v43  ;;  %6538 = vmatpush2.bf16.msra.mxu1 %v6923_v41  ;;  %v6835_v41 = vld [vmem:[%s10395_s1 + $0x4dc] ss:$28 sps:$4 sm:$0xff]  }
  0xb0   : > { %6523 = vmatprep.subr.bf16.mxu1 %v6934_v43 }
  0xb2   : > { %3549 = vmatpush2.bf16.msra.mxu0 %v6932_v48 }
  0xb3   : > { %v7895_v46 = vpop.permute.xlu1 %954  ;;  %v7897_v47 = vpop.permute.xlu0 %779  ;;  %6539 = vmatpush2.bf16.msra.mxu1 %v6932_v48  ;;  %3550 = vmatprep.subr.bf16.mxu0 %v6937_v54  ;;  %v6842_v48 = vld [vmem:[%s10395_s1 + $0x50c] ss:$28 sps:$4 sm:$0xff]  }
  0xb4   : > { %2957 = vmatmul.mubr.bf16.gmra.mxu0 %v6768_v50  ;;  %v6802_v50 = vld [vmem:[%s10395_s1 + $0x3c4] ss:$28 sps:$4 sm:$0xff]   ;;  %6524 = vmatprep.subr.bf16.mxu1 %v6937_v54 }
  0xb5   : > { %3310 = vmatmul.mubr.bf16.gmra.mxu1 %v6769_v51  ;;  %2966 = vmatprep.mubr.bf16.mxu0 %v6770_v55  ;;  %v6804_v55 = vld [vmem:[%s10395_s1 + $0x3b8] ss:$28 sps:$4 sm:$0xff]   ;;  %v6846_v54 = vld [vmem:[%s10395_s1 + $0x508] ss:$28 sps:$4 sm:$0xff]  }
  0xb6   : > { %3319 = vmatprep.mubr.bf16.mxu1 %v6772_v56  ;;  %v6805_v56 = vld [vmem:[%s10395_s1 + $0x3c0] ss:$28 sps:$4 sm:$0xff]   ;;  %3551 = vmatpush2.bf16.msra.mxu0 %v6935_v53 }
  0xb7   : > { %v7906_v51 = vpop.permute.xlu1 %784  ;;  %v7908_v52 = vpop.permute.xlu0 %939  ;;  %6540 = vmatpush2.bf16.msra.mxu1 %v6935_v53 }
  0xb8   : > { %3877 = vmatprep.subr.bf16.mxu1 %v6952_v0 }
  0xbb   : > { %v7918_v57 = vpop.permute.xlu1 %944  ;;  %v7920_v58 = vpop.permute.xlu0 %769 }
  0xbc   : > { %2967 = vmatmul.mubr.bf16.gmra.mxu0 %v6774_v61  ;;  %v6808_v61 = vld [vmem:[%s10395_s1 + $0x3fc] ss:$28 sps:$4 sm:$0xff]  }
  0xbd   : > { %3320 = vmatmul.mubr.bf16.gmra.mxu1 %v6775_v62  ;;  %2976 = vmatprep.mubr.bf16.mxu0 %v6776_v3  ;;  %v6810_v3 = vld [vmem:[%s10395_s1 + $0x3f0] ss:$28 sps:$4 sm:$0xff]  }
  0xbe   : > { %3329 = vmatprep.mubr.bf16.mxu1 %v6778_v4 }
  0xbf   : > { %v7931_v62 = vpop.permute.xlu1 %774  ;;  %v7933_v63 = vpop.permute.xlu0 %929 }
  0xc3   : > { %v7942_v4 = vpop.permute.xlu1 %934  ;;  %v7944_v5 = vpop.permute.xlu0 %759 }
  0xc4   : > { %2977 = vmatmul.mubr.bf16.gmra.mxu0 %v6780_v10 }
  0xc5   : > { %3330 = vmatmul.mubr.bf16.gmra.mxu1 %v6781_v11  ;;  %2986 = vmatprep.mubr.bf16.mxu0 %v6782_v13 }
  0xc6   : > { %3339 = vmatprep.mubr.bf16.mxu1 %v6784_v14 }
  0xc7   : > { %v7955_v10 = vpop.permute.xlu1 %764  ;;  %v7957_v11 = vpop.permute.xlu0 %919 }
  0xcb   : > { %v7962_v13 = vpop.permute.xlu1 %924  ;;  %v7964_v14 = vpop.permute.xlu0 %749 }
  0xcc   : > { %2987 = vmatmul.mubr.bf16.gmra.mxu0 %v6786_v20 }
  0xcd   : > { %3340 = vmatmul.mubr.bf16.gmra.mxu1 %v6787_v21  ;;  %2996 = vmatprep.mubr.bf16.mxu0 %v6788_v25  ;;  %v6823_v25 = vld [vmem:[%s10395_s1 + $0x468] ss:$28 sps:$4 sm:$0xff]  }
  0xce   : > { %3349 = vmatprep.mubr.bf16.mxu1 %v6790_v26  ;;  %v6827_v26 = vld [vmem:[%s10395_s1 + $0x49c] ss:$28 sps:$4 sm:$0xff]  }
  0xcf   : > { %v7975_v20 = vpop.permute.xlu1 %754  ;;  %v7977_v21 = vpop.permute.xlu0 %909 }
  0xd3   : > { %v7988_v29 = vpop.permute.xlu1 %914  ;;  %v740_v31 = vpop.permute.xlu0 %739 }
  0xd4   : > { %2997 = vmatmul.mubr.bf16.gmra.mxu0 %v6792_v32 }
  0xd5   : > { %3350 = vmatmul.mubr.bf16.gmra.mxu1 %v6793_v33  ;;  %3006 = vmatprep.mubr.bf16.mxu0 %v6794_v37  ;;  %v6831_v33 = vld [vmem:[%s10395_s1 + $0x498] ss:$28 sps:$4 sm:$0xff]  }
  0xd6   : > { %3359 = vmatprep.mubr.bf16.mxu1 %v6796_v38  ;;  %v6833_v37 = vld [vmem:[%s10395_s1 + $0x4d4] ss:$28 sps:$4 sm:$0xff]  }
  0xd7   : > { %v7993_v32 = vpop.permute.xlu1 %744 }
  0xd9   : > { %v8004_v38 = vpop.permute.xlu0 %899 }
  0xdb   : > { %v8009_v42 = vpop.permute.xlu1 %904 }
  0xdc   : > { %3007 = vmatmul.mubr.bf16.gmra.mxu0 %v6798_v44  ;;  %v6837_v44 = vld [vmem:[%s10395_s1 + $0x4d0] ss:$28 sps:$4 sm:$0xff]  }
  0xdd   : > { %3360 = vmatmul.mubr.bf16.gmra.mxu1 %v6799_v45  ;;  %3016 = vmatprep.mubr.bf16.mxu0 %v6800_v49  ;;  %v8011_v43 = vpop.permute.xlu0 %889  ;;  %v6838_v45 = vld [vmem:[%s10395_s1 + $0x4d8] ss:$28 sps:$4 sm:$0xff]  }
  0xde   : > { %3369 = vmatprep.mubr.bf16.mxu1 %v6802_v50  ;;  %v6844_v49 = vld [vmem:[%s10395_s1 + $0x514] ss:$28 sps:$4 sm:$0xff]  }
  0xdf   : > { %v8025_v50 = vpop.permute.xlu1 %894 }
  0xe1   : > { %v8027_v53 = vpop.permute.xlu0 %1049 }
  0xe2   : > { %10420 = vst [vmem:[#allocation5_spill] sm:$0xff] %v8027_v53  ;;  %v6953_v53 = vld [vmem:[%s7397_s8 + $0x340] ss:$8 sps:$4 sm:$0xff]  }
  0xe3   : > { %v8038_v59 = vpop.permute.xlu1 %1054 }
  0xe4   : > { %3017 = vmatmul.mubr.bf16.gmra.mxu0 %v6804_v55  ;;  %v6847_v55 = vld [vmem:[%s10395_s1 + $0x510] ss:$28 sps:$4 sm:$0xff]   ;;  %10421 = vst [vmem:[#allocation6_spill] sm:$0xff] %v8038_v59 }
  0xe5   : > { %3370 = vmatmul.mubr.bf16.gmra.mxu1 %v6805_v56  ;;  %3026 = vmatprep.mubr.bf16.mxu0 %v6806_v60  ;;  %v6848_v56 = vld [vmem:[%s10395_s1 + $0x544] ss:$28 sps:$4 sm:$0xff]   ;;  %v6850_v60 = vld [vmem:[%s10395_s1 + $0x54c] ss:$28 sps:$4 sm:$0xff]  }
  0xe6   : > { %3379 = vmatprep.mubr.bf16.mxu1 %v6808_v61  ;;  %v8043_v61 = vpop.permute.xlu0 %879 }
  0xe7   : > { %v8045_v0 = vpop.permute.xlu1 %884 }
  0xea   : > { %v8047_v2 = vpop.permute.xlu0 %1039 }
  0xec   : > { %3027 = vmatmul.mubr.bf16.gmra.mxu0 %v6810_v3  ;;  %v6852_v3 = vld [vmem:[%s10395_s1 + $0x540] ss:$28 sps:$4 sm:$0xff]  }
  0xed   : > { %3380 = vmatmul.mubr.bf16.gmra.mxu1 %v6811_v6  ;;  %3036 = vmatprep.mubr.bf16.mxu0 %v6812_v7  ;;  %v6853_v6 = vld [vmem:[%s10395_s1 + $0x548] ss:$28 sps:$4 sm:$0xff]   ;;  %v6857_v7 = vld [vmem:[%s10395_s1 + $0x57c] ss:$28 sps:$4 sm:$0xff]  }
  0xee   : > { %3389 = vmatprep.mubr.bf16.mxu1 %v6814_v8  ;;  %v6859_v8 = vld [vmem:[%s10395_s1 + $0x584] ss:$28 sps:$4 sm:$0xff]  }
  0xf4   : > { %3037 = vmatmul.mubr.bf16.gmra.mxu0 %v6816_v12  ;;  %v8061_v12 = vpop.permute.xlu1 %1044 }
  0xf5   : > { %3390 = vmatmul.mubr.bf16.gmra.mxu1 %v6817_v17  ;;  %3046 = vmatprep.mubr.bf16.mxu0 %v6818_v18 }
  0xf6   : > { %3399 = vmatprep.mubr.bf16.mxu1 %v6820_v19 }
  0xfc   : > { %3047 = vmatmul.mubr.bf16.gmra.mxu0 %v6822_v24  ;;  %v8063_v24 = vpop.permute.xlu0 %869 }
  0xfd   : > { %3400 = vmatmul.mubr.bf16.gmra.mxu1 %v6823_v25  ;;  %3056 = vmatprep.mubr.bf16.mxu0 %v6827_v26 }
  0xfe   : > { %3409 = vmatprep.mubr.bf16.mxu1 %v6829_v30 }
 0x104   : > { %3057 = vmatmul.mubr.bf16.gmra.mxu0 %v6831_v33 }
 0x105   : > { %3410 = vmatmul.mubr.bf16.gmra.mxu1 %v6832_v36  ;;  %3066 = vmatprep.mubr.bf16.mxu0 %v6833_v37 }
 0x106   : > { %3419 = vmatprep.mubr.bf16.mxu1 %v6835_v41  ;;  %v6861_v41 = vld [vmem:[%s10395_s1 + $0x578] ss:$28 sps:$4 sm:$0xff]  }
 0x10c   : > { %3067 = vmatmul.mubr.bf16.gmra.mxu0 %v6837_v44  ;;  %v6862_v44 = vld [vmem:[%s10395_s1 + $0x580] ss:$28 sps:$4 sm:$0xff]  }
 0x10d   : > { %3420 = vmatmul.mubr.bf16.gmra.mxu1 %v6838_v45  ;;  %3076 = vmatprep.mubr.bf16.mxu0 %v6842_v48 }
 0x10e   : > { %3429 = vmatprep.mubr.bf16.mxu1 %v6844_v49  ;;  %v6866_v49 = vld [vmem:[%s10395_s1 + $0x5b4] ss:$28 sps:$4 sm:$0xff]  }
 0x114   : > { %3077 = vmatmul.mubr.bf16.gmra.mxu0 %v6846_v54  ;;  %v8082_v54 = vpop.permute.xlu1 %874 }
 0x115   : > { %3430 = vmatmul.mubr.bf16.gmra.mxu1 %v6847_v55  ;;  %3086 = vmatprep.mubr.bf16.mxu0 %v6848_v56 }
 0x116   : > { %3439 = vmatprep.mubr.bf16.mxu1 %v6850_v60 }
 0x11c   : > { %v2848_v17 = vpop.f32.mrf.mxu0  ;;  %3087 = vmatmul.mubr.bf16.gmra.mxu0 %v6852_v3 }
 0x11d   : > { %v3201_v18 = vpop.f32.mrf.mxu1  ;;  %3440 = vmatmul.mubr.bf16.gmra.mxu1 %v6853_v6  ;;  %v2849_v19 = vadd.f32 %v2848_v17, %v740_v31  ;;  %3096 = vmatprep.mubr.bf16.mxu0 %v6857_v7  ;;  %v8087_v6 = vpop.permute.xlu0 %1029 }
 0x11e   : > { %3449 = vmatprep.mubr.bf16.mxu1 %v6859_v8  ;;  %v2850_v25 = vpop.f32.mrf.mxu0 }
 0x11f   : > { %v3203_v26 = vpop.f32.mrf.mxu1  ;;  %v8065_v30 = vadd.f32 %v3201_v18, %v2849_v19  ;;  %v2851_v33 = vadd.f32 %v2850_v25, %v740_v31  ;;  %v6868_v31 = vld [vmem:[%s10395_s1 + $0x5bc] ss:$28 sps:$4 sm:$0xff]  }
 0x120   : > { %v2852_v36 = vpop.f32.mrf.mxu0 }
 0x121   : > { %10422 = vst [vmem:[#allocation7_spill] sm:$0xff] %v8065_v30  ;;  %v3205_v37 = vpop.f32.mrf.mxu1  ;;  %v8073_v45 = vadd.f32 %v3203_v26, %v2851_v33  ;;  %v2853_v48 = vadd.f32 %v2852_v36, %v7993_v32  ;;  %v8095_v36 = vpop.permute.xlu1 %1034 }
 0x122   : > { %v2854_v55 = vpop.f32.mrf.mxu0 }
 0x123   : > { %10423 = vst [vmem:[#allocation8_spill] sm:$0xff] %v8073_v45  ;;  %v3207_v56 = vpop.f32.mrf.mxu1  ;;  %v8084_v60 = vadd.f32 %v3205_v37, %v2853_v48  ;;  %v2855_v3 = vadd.f32 %v2854_v55, %v7993_v32  ;;  %v8112_v55 = vpop.permute.xlu0 %859 }
 0x124   : > { %v2858_v7 = vpop.f32.mrf.mxu0  ;;  %3097 = vmatmul.mubr.bf16.gmra.mxu0 %v6861_v41  ;;  %v6870_v41 = vld [vmem:[%s10395_s1 + $0x5b0] ss:$28 sps:$4 sm:$0xff]  }
 0x125   : > { %10424 = vst [vmem:[#allocation9_spill] sm:$0xff] %v8084_v60  ;;  %v3211_v8 = vpop.f32.mrf.mxu1  ;;  %3450 = vmatmul.mubr.bf16.gmra.mxu1 %v6862_v44  ;;  %v8089_v17 = vadd.f32 %v3207_v56, %v2855_v3  ;;  %v2859_v18 = vadd.f32 %v2858_v7, %v7964_v14  ;;  %3106 = vmatprep.mubr.bf16.mxu0 %v6866_v49  ;;  %v6871_v44 = vld [vmem:[%s10395_s1 + $0x5b8] ss:$28 sps:$4 sm:$0xff]  }
 0x126   : > { %3459 = vmatprep.mubr.bf16.mxu1 %v6868_v31  ;;  %v2860_v19 = vpop.f32.mrf.mxu0  ;;  %v6880_v31 = vld [vmem:[%s10395_s1 + $0x5f4] ss:$28 sps:$4 sm:$0xff]  }
 0x127   : > { %10425 = vst [vmem:[#allocation10_spill] sm:$0xff] %v8089_v17  ;;  %v3213_v25 = vpop.f32.mrf.mxu1  ;;  %v8092_v26 = vadd.f32 %v3211_v8, %v2859_v18  ;;  %v2861_v33 = vadd.f32 %v2860_v19, %v7964_v14  ;;  %v6878_v14 = vld [vmem:[%s10395_s1 + $0x5ec] ss:$28 sps:$4 sm:$0xff]  }
 0x128   : > { %v2862_v32 = vpop.f32.mrf.mxu0 }
 0x129   : > { %10426 = vst [vmem:[#allocation11_spill] sm:$0xff] %v8092_v26  ;;  %v3215_v37 = vpop.f32.mrf.mxu1  ;;  %v8103_v48 = vadd.f32 %v3213_v25, %v2861_v33  ;;  %v2863_v49 = vadd.f32 %v2862_v32, %v7975_v20  ;;  %v8120_v32 = vpop.permute.xlu1 %864 }
 0x12a   : > { %v2864_v56 = vpop.f32.mrf.mxu0 }
 0x12b   : > { %10427 = vst [vmem:[#allocation12_spill] sm:$0xff] %v8103_v48  ;;  %v3217_v3 = vpop.f32.mrf.mxu1  ;;  %v8114_v7 = vadd.f32 %v3215_v37, %v2863_v49  ;;  %v2865_v8 = vadd.f32 %v2864_v56, %v7975_v20  ;;  %v8125_v49 = vpop.permute.xlu0 %1019 }
 0x12c   : > { %v2868_v18 = vpop.f32.mrf.mxu0  ;;  %3107 = vmatmul.mubr.bf16.gmra.mxu0 %v6870_v41 }
 0x12d   : > { %10428 = vst [vmem:[#allocation13_spill] sm:$0xff] %v8114_v7  ;;  %v3221_v19 = vpop.f32.mrf.mxu1  ;;  %3460 = vmatmul.mubr.bf16.gmra.mxu1 %v6871_v44  ;;  %v8117_v25 = vadd.f32 %v3217_v3, %v2865_v8  ;;  %v2869_v33 = vadd.f32 %v2868_v18, %v7944_v5  ;;  %3116 = vmatprep.mubr.bf16.mxu0 %v6878_v14  ;;  %v6882_v44 = vld [vmem:[%s10395_s1 + $0x5e8] ss:$28 sps:$4 sm:$0xff]   ;;  %v6883_v14 = vld [vmem:[%s10395_s1 + $0x5f0] ss:$28 sps:$4 sm:$0xff]  }
 0x12e   : > { %3469 = vmatprep.mubr.bf16.mxu1 %v6880_v31  ;;  %v2870_v1 = vpop.f32.mrf.mxu0 }
 0x12f   : > { %10429 = vst [vmem:[#allocation14_spill] sm:$0xff] %v8117_v25  ;;  %v3223_v17 = vpop.f32.mrf.mxu1  ;;  %v8122_v48 = vadd.f32 %v3221_v19, %v2869_v33  ;;  %v2871_v37 = vadd.f32 %v2870_v1, %v7944_v5  ;;  %v6892_v1 = vld [vmem:[%s10395_s1 + $0x624] ss:$28 sps:$4 sm:$0xff]   ;;  %v6895_v5 = vld [vmem:[%s10395_s1 + $0x62c] ss:$28 sps:$4 sm:$0xff]   ;;  %v8145_v33 = vpop.permute.xlu1 %1024 }
 0x130   : > { %v2872_v20 = vpop.f32.mrf.mxu0  ;;  %v8150_v25 = vpop.permute.xlu0 %849 }
 0x131   : > { %10430 = vst [vmem:[#allocation15_spill] sm:$0xff] %v8122_v48  ;;  %v3225_v41 = vpop.f32.mrf.mxu1  ;;  %v8133_v31 = vadd.f32 %v3223_v17, %v2871_v37  ;;  %v2873_v56 = vadd.f32 %v2872_v20, %v7955_v10 }
 0x132   : > { %v2874_v3 = vpop.f32.mrf.mxu0 }
 0x133   : > { %10431 = vst [vmem:[#allocation16_spill] sm:$0xff] %v8133_v31  ;;  %v3227_v8 = vpop.f32.mrf.mxu1  ;;  %v8142_v18 = vadd.f32 %v3225_v41, %v2873_v56  ;;  %v2875_v19 = vadd.f32 %v2874_v3, %v7955_v10 }
 0x134   : > { %v2878_v17 = vpop.f32.mrf.mxu0  ;;  %3117 = vmatmul.mubr.bf16.gmra.mxu0 %v6882_v44  ;;  %v6890_v44 = vld [vmem:[%s10395_s1 + $0x620] ss:$28 sps:$4 sm:$0xff]  }
 0x135   : > { %10432 = vst [vmem:[#allocation17_spill] sm:$0xff] %v8142_v18  ;;  %v3231_v37 = vpop.f32.mrf.mxu1  ;;  %3470 = vmatmul.mubr.bf16.gmra.mxu1 %v6883_v14  ;;  %v8147_v20 = vadd.f32 %v3227_v8, %v2875_v19  ;;  %v2879_v31 = vadd.f32 %v2878_v17, %v7920_v58  ;;  %3126 = vmatprep.mubr.bf16.mxu0 %v6892_v1  ;;  %v6893_v14 = vld [vmem:[%s10395_s1 + $0x628] ss:$28 sps:$4 sm:$0xff]  }
 0x136   : > { %3479 = vmatprep.mubr.bf16.mxu1 %v6895_v5  ;;  %v2880_v48 = vpop.f32.mrf.mxu0 }
 0x137   : > { %10433 = vst [vmem:[#allocation18_spill] sm:$0xff] %v8147_v20  ;;  %v3233_v7 = vpop.f32.mrf.mxu1  ;;  %v8152_v41 = vadd.f32 %v3231_v37, %v2879_v31  ;;  %v2881_v10 = vadd.f32 %v2880_v48, %v7920_v58  ;;  %v6904_v31 = vld [vmem:[%s10395_s1 + $0x65c] ss:$28 sps:$4 sm:$0xff]   ;;  %v6907_v58 = vld [vmem:[%s10395_s1 + $0x664] ss:$28 sps:$4 sm:$0xff]   ;;  %v8170_v48 = vpop.permute.xlu1 %854 }
 0x138   : > { %v2882_v56 = vpop.f32.mrf.mxu0 }
 0x139   : > { %10434 = vst [vmem:[#allocation19_spill] sm:$0xff] %v8152_v41  ;;  %v3235_v3 = vpop.f32.mrf.mxu1  ;;  %v8161_v1 = vadd.f32 %v3233_v7, %v2881_v10  ;;  %v2883_v5 = vadd.f32 %v2882_v56, %v7931_v62  ;;  %v8175_v7 = vpop.permute.xlu0 %1009 }
 0x13a   : > { %v2884_v8 = vpop.f32.mrf.mxu0 }
 0x13b   : > { %10435 = vst [vmem:[#allocation20_spill] sm:$0xff] %v8161_v1  ;;  %v3237_v19 = vpop.f32.mrf.mxu1  ;;  %v8172_v17 = vadd.f32 %v3235_v3, %v2883_v5  ;;  %v2885_v37 = vadd.f32 %v2884_v8, %v7931_v62  ;;  %v8183_v5 = vpop.permute.xlu1 %1014 }
 0x13c   : > { %v2888_v10 = vpop.f32.mrf.mxu0  ;;  %3127 = vmatmul.mubr.bf16.gmra.mxu0 %v6890_v44  ;;  %v6902_v44 = vld [vmem:[%s10395_s1 + $0x658] ss:$28 sps:$4 sm:$0xff]  }
 0x13d   : > { %10436 = vst [vmem:[#allocation21_spill] sm:$0xff] %v8172_v17  ;;  %v3241_v56 = vpop.f32.mrf.mxu1  ;;  %3480 = vmatmul.mubr.bf16.gmra.mxu1 %v6893_v14  ;;  %v8177_v1 = vadd.f32 %v3237_v19, %v2885_v37  ;;  %v2889_v41 = vadd.f32 %v2888_v10, %v7897_v47  ;;  %3136 = vmatprep.mubr.bf16.mxu0 %v6904_v31  ;;  %v6905_v14 = vld [vmem:[%s10395_s1 + $0x660] ss:$28 sps:$4 sm:$0xff]  }
 0x13e   : > { %3489 = vmatprep.mubr.bf16.mxu1 %v6907_v58  ;;  %v2890_v20 = vpop.f32.mrf.mxu0 }
 0x13f   : > { %10437 = vst [vmem:[#allocation22_spill] sm:$0xff] %v8177_v1  ;;  %v3243_v18 = vpop.f32.mrf.mxu1  ;;  %v8180_v26 = vadd.f32 %v3241_v56, %v2889_v41  ;;  %v2891_v3 = vadd.f32 %v2890_v20, %v7897_v47  ;;  %v6916_v47 = vld [vmem:[%s10395_s1 + $0x694] ss:$28 sps:$4 sm:$0xff]   ;;  %v6919_v20 = vld [vmem:[%s10395_s1 + $0x69c] ss:$28 sps:$4 sm:$0xff]   ;;  %v8200_v41 = vpop.permute.xlu0 %839 }
 0x140   : > { %v2892_v62 = vpop.f32.mrf.mxu0 }
 0x141   : > { %10438 = vst [vmem:[#allocation23_spill] sm:$0xff] %v8180_v26  ;;  %v3245_v8 = vpop.f32.mrf.mxu1  ;;  %v8191_v31 = vadd.f32 %v3243_v18, %v2891_v3  ;;  %v2893_v58 = vadd.f32 %v2892_v62, %v7906_v51  ;;  %v8208_v26 = vpop.permute.xlu1 %844 }
 0x142   : > { %v2894_v19 = vpop.f32.mrf.mxu0 }
 0x143   : > { %10439 = vst [vmem:[#allocation24_spill] sm:$0xff] %v8191_v31  ;;  %v3247_v37 = vpop.f32.mrf.mxu1  ;;  %v8202_v10 = vadd.f32 %v3245_v8, %v2893_v58  ;;  %v2895_v56 = vadd.f32 %v2894_v19, %v7906_v51  ;;  %v8213_v58 = vpop.permute.xlu0 %999 }
 0x144   : > { %v2898_v18 = vpop.f32.mrf.mxu0  ;;  %3137 = vmatmul.mubr.bf16.gmra.mxu0 %v6902_v44 }
 0x145   : > { %10440 = vst [vmem:[#allocation25_spill] sm:$0xff] %v8202_v10  ;;  %v3251_v3 = vpop.f32.mrf.mxu1  ;;  %3490 = vmatmul.mubr.bf16.gmra.mxu1 %v6905_v14  ;;  %v8205_v62 = vadd.f32 %v3247_v37, %v2895_v56  ;;  %v2899_v31 = vadd.f32 %v2898_v18, %v7873_v35  ;;  %3146 = vmatprep.mubr.bf16.mxu0 %v6916_v47  ;;  %v6914_v14 = vld [vmem:[%s10395_s1 + $0x690] ss:$28 sps:$4 sm:$0xff]   ;;  %v6917_v47 = vld [vmem:[%s10395_s1 + $0x698] ss:$28 sps:$4 sm:$0xff]  }
 0x146   : > { %3499 = vmatprep.mubr.bf16.mxu1 %v6919_v20  ;;  %v2900_v1 = vpop.f32.mrf.mxu0 }
 0x147   : > { %10441 = vst [vmem:[#allocation26_spill] sm:$0xff] %v8205_v62  ;;  %v3253_v17 = vpop.f32.mrf.mxu1  ;;  %v8210_v60 = vadd.f32 %v3251_v3, %v2899_v31  ;;  %v2901_v8 = vadd.f32 %v2900_v1, %v7873_v35  ;;  %v6928_v35 = vld [vmem:[%s10395_s1 + $0x6cc] ss:$28 sps:$4 sm:$0xff]   ;;  %v6931_v1 = vld [vmem:[%s10395_s1 + $0x6d4] ss:$28 sps:$4 sm:$0xff]   ;;  %v8233_v3 = vpop.permute.xlu1 %1004 }
 0x148   : > { %v2902_v51 = vpop.f32.mrf.mxu0 }
 0x149   : > { %10442 = vst [vmem:[#allocation27_spill] sm:$0xff] %v8210_v60  ;;  %v3255_v44 = vpop.f32.mrf.mxu1  ;;  %v8221_v20 = vadd.f32 %v3253_v17, %v2901_v8  ;;  %v2903_v19 = vadd.f32 %v2902_v51, %v7882_v39  ;;  %v8238_v60 = vpop.permute.xlu0 %829 }
 0x14a   : > { %v2904_v31 = vpop.f32.mrf.mxu0 }
 0x14b   : > { %10443 = vst [vmem:[#allocation28_spill] sm:$0xff] %v8221_v20  ;;  %v3257_v37 = vpop.f32.mrf.mxu1  ;;  %v8230_v56 = vadd.f32 %v3255_v44, %v2903_v19  ;;  %v2905_v18 = vadd.f32 %v2904_v31, %v7882_v39 }
 0x14c   : > { %v2908_v17 = vpop.f32.mrf.mxu0  ;;  %3147 = vmatmul.mubr.bf16.gmra.mxu0 %v6914_v14  ;;  %v6926_v14 = vld [vmem:[%s10395_s1 + $0x6c8] ss:$28 sps:$4 sm:$0xff]  }
 0x14d   : > { %10444 = vst [vmem:[#allocation29_spill] sm:$0xff] %v8230_v56  ;;  %v3261_v8 = vpop.f32.mrf.mxu1  ;;  %3500 = vmatmul.mubr.bf16.gmra.mxu1 %v6917_v47  ;;  %v8235_v51 = vadd.f32 %v3257_v37, %v2905_v18  ;;  %v2909_v20 = vadd.f32 %v2908_v17, %v7849_v23  ;;  %3156 = vmatprep.mubr.bf16.mxu0 %v6928_v35  ;;  %v6929_v47 = vld [vmem:[%s10395_s1 + $0x6d0] ss:$28 sps:$4 sm:$0xff]   ;;  %v8252_v37 = vpop.permute.xlu1 %834 }
 0x14e   : > { %3509 = vmatprep.mubr.bf16.mxu1 %v6931_v1  ;;  %v2910_v62 = vpop.f32.mrf.mxu0 }
 0x14f   : > { %10445 = vst [vmem:[#allocation30_spill] sm:$0xff] %v8235_v51  ;;  %v3263_v10 = vpop.f32.mrf.mxu1  ;;  %v8240_v44 = vadd.f32 %v3261_v8, %v2909_v20  ;;  %v2911_v39 = vadd.f32 %v2910_v62, %v7849_v23  ;;  %v6940_v23 = vld [vmem:[%s10395_s1 + $0x14] ss:$28 sps:$4 sm:$0xff]  }
 0x150   : > { %v2912_v19 = vpop.f32.mrf.mxu0  ;;  %v6943_v62 = vld [vmem:[%s10395_s1 + $0x634] ss:$28 sps:$4 sm:$0xff]  }
 0x151   : > { %10446 = vst [vmem:[#allocation31_spill] sm:$0xff] %v8240_v44  ;;  %v3265_v31 = vpop.f32.mrf.mxu1  ;;  %v8249_v35 = vadd.f32 %v3263_v10, %v2911_v39  ;;  %v2913_v1 = vadd.f32 %v2912_v19, %v7858_v27  ;;  %v8263_v10 = vpop.permute.xlu0 %989 }
 0x152   : > { %v2914_v20 = vpop.f32.mrf.mxu0 }
 0x153   : > { %10447 = vst [vmem:[#allocation32_spill] sm:$0xff] %v8249_v35  ;;  %v3267_v18 = vpop.f32.mrf.mxu1  ;;  %v8260_v17 = vadd.f32 %v3265_v31, %v2913_v1  ;;  %v2915_v8 = vadd.f32 %v2914_v20, %v7858_v27  ;;  %v8271_v27 = vpop.permute.xlu1 %994 }
 0x154   : > { %v2918_v39 = vpop.f32.mrf.mxu0  ;;  %3157 = vmatmul.mubr.bf16.gmra.mxu0 %v6926_v14 }
 0x155   : > { %10448 = vst [vmem:[#allocation33_spill] sm:$0xff] %v8260_v17  ;;  %v3271_v19 = vpop.f32.mrf.mxu1  ;;  %3510 = vmatmul.mubr.bf16.gmra.mxu1 %v6929_v47  ;;  %v8265_v35 = vadd.f32 %v3267_v18, %v2915_v8  ;;  %v2919_v44 = vadd.f32 %v2918_v39, %v7819_v9  ;;  %3552 = vmatprep.mubr.bf16.mxu0 %v6940_v23  ;;  %v6938_v47 = vld [vmem:[%s10395_s1 + $0x10] ss:$28 sps:$4 sm:$0xff]   ;;  %v820_v20 = vpop.permute.xlu0 %819 }
 0x156   : > { %3832 = vmatprep.mubr.bf16.mxu1 %v6943_v62  ;;  %v2920_v51 = vpop.f32.mrf.mxu0  ;;  %v6941_v23 = vld [vmem:[%s10395_s1 + $0x630] ss:$28 sps:$4 sm:$0xff]  }
 0x157   : > { %10449 = vst [vmem:[#allocation34_spill] sm:$0xff] %v8265_v35  ;;  %v3273_v56 = vpop.f32.mrf.mxu1  ;;  %v8268_v45 = vadd.f32 %v3271_v19, %v2919_v44  ;;  %v2921_v31 = vadd.f32 %v2920_v51, %v7819_v9  ;;  %v6946_v9 = vld [vmem:[%s10395_s1 + $0x4c] ss:$28 sps:$4 sm:$0xff]   ;;  %v6950_v39 = vld [vmem:[%s7397_s8 + $0x350] ss:$8 sps:$4 sm:$0xff]   ;;  %v825_v17 = vpop.permute.xlu1 %824 }
 0x158   : > { %v2922_v1 = vpop.f32.mrf.mxu0  ;;  %v6949_v51 = vld [vmem:[%s10395_s1 + $0x66c] ss:$28 sps:$4 sm:$0xff]  }
 0x159   : > { %10450 = vst [vmem:[#allocation35_spill] sm:$0xff] %v8268_v45  ;;  %v3275_v14 = vpop.f32.mrf.mxu1  ;;  %v8279_v62 = vadd.f32 %v3273_v56, %v2921_v31  ;;  %v2923_v44 = vadd.f32 %v2922_v1, %v7836_v16  ;;  %v6955_v31 = vld [vmem:[%s7397_s8 + $0x344] ss:$8 sps:$4 sm:$0xff]  }
 0x15a   : > { %v2924_v18 = vpop.f32.mrf.mxu0 }
 0x15b   : > { %10451 = vst [vmem:[#allocation36_spill] sm:$0xff] %v8279_v62  ;;  %v3277_v8 = vpop.f32.mrf.mxu1  ;;  %v8289_v19 = vadd.f32 %v3275_v14, %v2923_v44  ;;  %v2925_v56 = vadd.f32 %v2924_v18, %v7836_v16  ;;  %v6964_v44 = vld [vmem:[%s7397_s8 + $0x334] ss:$8 sps:$4 sm:$0xff]  }
 0x15c   : > { %v2928_v62 = vpop.f32.mrf.mxu0  ;;  %3553 = vmatmul.mubr.bf16.vlgmr.msra.gmra.mxu0 %v6938_v47 }
 0x15d   : > { %10452 = vst [vmem:[#allocation37_spill] sm:$0xff] %v8289_v19  ;;  %v3281_v1 = vpop.f32.mrf.mxu1  ;;  %3833 = vmatmul.mubr.bf16.vlgmr.msra.gmra.mxu1 %v6941_v23  ;;  %v8293_v45 = vadd.f32 %v3277_v8, %v2925_v56  ;;  %v2929_v35 = vadd.f32 %v2928_v62, %v820_v20  ;;  %3562 = vmatprep.mubr.bf16.mxu0 %v6946_v9  ;;  %v6944_v23 = vld [vmem:[%s10395_s1 + $0x48] ss:$28 sps:$4 sm:$0xff]  }
 0x15e   : > { %3842 = vmatprep.mubr.bf16.mxu1 %v6949_v51  ;;  %v2930_v30 = vpop.f32.mrf.mxu0  ;;  %3878 = vmatpush1.bf16.msra.mxu1 %v6950_v39  ;;  %v6947_v62 = vld [vmem:[%s10395_s1 + $0x668] ss:$28 sps:$4 sm:$0xff]   ;;  %v6962_v39 = vld [vmem:[%s7397_s8 + $0x330] ss:$8 sps:$4 sm:$0xff]  }
 0x15f   : > { %10453 = vst [vmem:[#allocation38_spill] sm:$0xff] %v8293_v45  ;;  %v3283_v59 = vpop.f32.mrf.mxu1  ;;  %v8296_v14 = vadd.f32 %v3281_v1, %v2929_v35  ;;  %v2931_v16 = vadd.f32 %v2930_v30, %v820_v20  ;;  %3879 = vmatprep.subr.bf16.mxu1 %v6955_v31  ;;  %v6958_v30 = vld [vmem:[%s10395_s1 + $0x84] ss:$28 sps:$4 sm:$0xff]  }
 0x160   : > { %v2932_v18 = vpop.f32.mrf.mxu0  ;;  %v6961_v35 = vld [vmem:[%s10395_s1 + $0x6a4] ss:$28 sps:$4 sm:$0xff]  }
 0x161   : > { %v3285_v47 = vpop.f32.mrf.mxu1  ;;  %v8305_v9 = vadd.f32 %v3283_v59, %v2931_v16  ;;  %v2933_v51 = vadd.f32 %v2932_v18, %v825_v17  ;;  %v6967_v59 = vld [vmem:[%s7397_s8 + $0x324] ss:$8 sps:$4 sm:$0xff]  }
 0x162   : > { %v2934_v20 = vpop.f32.mrf.mxu0  ;;  %3880 = vmatpush1.bf16.msra.mxu1 %v6953_v53 }
 0x163   : > { %10454 = vst [vmem:[#allocation39_spill] sm:$0xff] %v8305_v9  ;;  %v3287_v8 = vpop.f32.mrf.mxu1  ;;  %v8314_v56 = vadd.f32 %v3285_v47, %v2933_v51  ;;  %v2935_v31 = vadd.f32 %v2934_v20, %v825_v17  ;;  %3881 = vmatprep.subr.bf16.mxu1 %v6964_v44  ;;  %v6965_v9 = vld [vmem:[%s7397_s8 + $0x320] ss:$8 sps:$4 sm:$0xff]   ;;  %v6976_v44 = vld [vmem:[%s7397_s8 + $0x314] ss:$8 sps:$4 sm:$0xff]  }
 0x164   : > { %v2938_v1 = vpop.f32.mrf.mxu0  ;;  %3563 = vmatmul.mubr.bf16.gmra.mxu0 %v6944_v23  ;;  %v6956_v51 = vld [vmem:[%s10395_s1 + $0x80] ss:$28 sps:$4 sm:$0xff]  }
 0x165   : > { %v3291_v16 = vpop.f32.mrf.mxu1  ;;  %3843 = vmatmul.mubr.bf16.gmra.mxu1 %v6947_v62  ;;  %v8317_v18 = vadd.f32 %v3287_v8, %v2935_v31  ;;  %v2939_v45 = vadd.f32 %v2938_v1, %v8238_v60  ;;  %3572 = vmatprep.mubr.bf16.mxu0 %v6958_v30  ;;  %v6959_v30 = vld [vmem:[%s10395_s1 + $0x6a0] ss:$28 sps:$4 sm:$0xff]   ;;  %v6979_v1 = vld [vmem:[%s7397_s8 + $0x304] ss:$8 sps:$4 sm:$0xff]  }
 0x166   : > { %3852 = vmatprep.mubr.bf16.mxu1 %v6961_v35  ;;  %v2940_v19 = vpop.f32.mrf.mxu0  ;;  %3882 = vmatpush1.bf16.msra.mxu1 %v6962_v39  ;;  %v6974_v39 = vld [vmem:[%s7397_s8 + $0x310] ss:$8 sps:$4 sm:$0xff]  }
 0x167   : > { %10455 = vst [vmem:[#allocation40_spill] sm:$0xff] %v8317_v18  ;;  %v3293_v53 = vpop.f32.mrf.mxu1  ;;  %v8321_v47 = vadd.f32 %v3291_v16, %v2939_v45  ;;  %v2941_v17 = vadd.f32 %v2940_v19, %v8238_v60  ;;  %3883 = vmatprep.subr.bf16.mxu1 %v6967_v59  ;;  %v6970_v60 = vld [vmem:[%s10395_s1 + $0xbc] ss:$28 sps:$4 sm:$0xff]  }
 0x168   : > { %v2942_v23 = vpop.f32.mrf.mxu0  ;;  %v6973_v19 = vld [vmem:[%s10395_s1 + $0x6dc] ss:$28 sps:$4 sm:$0xff]  }
 0x169   : > { %v3295_v62 = vpop.f32.mrf.mxu1  ;;  %v8331_v35 = vadd.f32 %v3293_v53, %v2941_v17  ;;  %v2943_v45 = vadd.f32 %v2942_v23, %v8252_v37 }
 0x16a   : > { %v2944_v20 = vpop.f32.mrf.mxu0  ;;  %3884 = vmatpush1.bf16.msra.mxu1 %v6965_v9 }
 0x16b   : > { %10456 = vst [vmem:[#allocation41_spill] sm:$0xff] %v8331_v35  ;;  %v3297_v8 = vpop.f32.mrf.mxu1  ;;  %v8341_v31 = vadd.f32 %v3295_v62, %v2943_v45  ;;  %v2945_v59 = vadd.f32 %v2944_v20, %v8252_v37  ;;  %3885 = vmatprep.subr.bf16.mxu1 %v6976_v44  ;;  %v6977_v35 = vld [vmem:[%s7397_s8 + $0x300] ss:$8 sps:$4 sm:$0xff]   ;;  %v6982_v20 = vld [vmem:[%s10395_s1 + $0xf4] ss:$28 sps:$4 sm:$0xff]   ;;  %s294_s8 = sand.u32 1, %s7264_s25  }
 0x16c   : > { %v2948_v16 = vpop.f32.mrf.mxu0  ;;  %3573 = vmatmul.mubr.bf16.gmra.mxu0 %v6956_v51  ;;  %v6968_v51 = vld [vmem:[%s10395_s1 + $0xb8] ss:$28 sps:$4 sm:$0xff]   ;;  %s6025_s15 = sshll.u32 %s294_s8, 7  ;;  %s10349_s22 = scalar_lea.sflag [#allocation3], %s294_s8 }
 0x16d   : > { %v3301_v53 = vpop.f32.mrf.mxu1  ;;  %3853 = vmatmul.mubr.bf16.gmra.mxu1 %v6959_v30  ;;  %v8345_v17 = vadd.f32 %v3297_v8, %v2945_v59  ;;  %v2949_v23 = vadd.f32 %v2948_v16, %v8200_v41  ;;  %3582 = vmatprep.mubr.bf16.mxu0 %v6970_v60  ;;  %v6971_v30 = vld [vmem:[%s10395_s1 + $0x6d8] ss:$28 sps:$4 sm:$0xff]   ;;  %s10320_s16 = scalar_lea.vmem [#allocation2], %s6025_s15 }
 0x16e   : > { %3862 = vmatprep.mubr.bf16.mxu1 %v6973_v19  ;;  %v2950_v18 = vpop.f32.mrf.mxu0  ;;  %3886 = vmatpush1.bf16.msra.mxu1 %v6974_v39  ;;  %s5941_s18 = sshll.u32 %s10320_s16, 4  ;;  %s10344_s18 = int_to_ptr.vmem [resolvable:$true] %s5941_s18 }
 0x16f   : > { %v3303_v9 = vpop.f32.mrf.mxu1  ;;  %v8349_v62 = vadd.f32 %v3301_v53, %v2949_v23  ;;  %v2951_v37 = vadd.f32 %v2950_v18, %v8200_v41  ;;  %3887 = vmatprep.subr.bf16.mxu1 %v6979_v1  ;;  %v10457_v23 = vmov 0   ;;  %s7204_s27 = scalar_lea.vmem %s10344_s18, 2048  ;;  %p7211_p1 = scmp.lt.s32.totalorder %s10344_s18, %s7209_s30 }
 0x170   : > { %v2952_v44 = vpop.f32.mrf.mxu0  ;;  %p7205_p12 = scmp.ne.s32.totalorder %s10344_s18, %s7204_s27  ;;  %p7212_p2 = scmp.lt.s32.totalorder %s7210_s10, %s7204_s27 }
 0x171   : > { %v3305_v45 = vpop.f32.mrf.mxu1  ;;  %v8358_v60 = vadd.f32 %v3303_v9, %v2951_v37  ;;  %v2953_v19 = vadd.f32 %v2952_v44, %v8208_v26 }
 0x172   : > { %v2954_v41 = vpop.f32.mrf.mxu0  ;;  %3888 = vmatpush1.bf16.msra.mxu1 %v6977_v35  ;;  %p7206_p13 = pnand %p7205_p12, %p7366_p4  ;;  %p7213_p3 = por %p7212_p2, %p7211_p1 }
 0x173   : > { %v3307_v18 = vpop.f32.mrf.mxu1  ;;  %v8364_v8 = vadd.f32 %v3305_v45, %v2953_v19  ;;  %v2955_v39 = vadd.f32 %v2954_v41, %v8208_v26  ;;  %v6980_v26 = vld [vmem:[%s10395_s1 + $0xf0] ss:$28 sps:$4 sm:$0xff]  }
 0x174   : > { %v2958_v59 = vpop.f32.mrf.mxu0  ;;  %3583 = vmatmul.mubr.bf16.gmra.mxu0 %v6968_v51  ;;  %v6983_v51 = vld [vmem:[%s10395_s1 + $0x18] ss:$28 sps:$4 sm:$0xff]   ;;  %v6986_v41 = vld [vmem:[%s10395_s1 + $0x12c] ss:$28 sps:$4 sm:$0xff]   ;;  %p7207_p0 = pneg %p7206_p13 }
 0x175   : > { %v3311_v1 = vpop.f32.mrf.mxu1  ;;  %3863 = vmatmul.mubr.bf16.gmra.mxu1 %v6971_v30  ;;  %v8367_v16 = vadd.f32 %v3307_v18, %v2955_v39  ;;  %v2959_v53 = vadd.f32 %v2958_v59, %v8150_v25  ;;  %3592 = vmatprep.mubr.bf16.mxu0 %v6982_v20 }
 0x176   : > { %3905 = vmatprep.mubr.bf16.mxu1 %v10457_v23  ;;  %v2960_v9 = vpop.f32.mrf.mxu0  ;;  %p7214_p5 = pnand %p7213_p3, %p7207_p0 }
 0x177   : > { %v3313_v37 = vpop.f32.mrf.mxu1  ;;  %v8371_v44 = vadd.f32 %v3311_v1, %v2959_v53  ;;  %v2961_v35 = vadd.f32 %v2960_v9, %v8150_v25  ;;  %v4497_v9 = vld [vmem:[%s10398_s4 + $0x78] sm:$0xff] }
 0x178   : > { %v2962_v45 = vpop.f32.mrf.mxu0  ;;  %4591 = vperm.xlu1 %6601, %v4497_v9   ;;  %v6990_v9 = vld [vmem:[%s10395_s1 + $0x164] ss:$28 sps:$4 sm:$0xff]  }
 0x179   : > { %v3315_v19 = vpop.f32.mrf.mxu1  ;;  %v8380_v30 = vadd.f32 %v3313_v37, %v2961_v35  ;;  %v2963_v20 = vadd.f32 %v2962_v45, %v8170_v48  ;;  %v4496_v37 = vld [vmem:[%s10398_s4 + $0x70] sm:$0xff] }
 0x17a   : > { %v2964_v25 = vpop.f32.mrf.mxu0  ;;  %4586 = vperm.xlu0 %6600, %v4496_v37  }
 0x17b   : > { %v3317_v18 = vpop.f32.mrf.mxu1  ;;  %v8386_v39 = vadd.f32 %v3315_v19, %v2963_v20  ;;  %v2965_v59 = vadd.f32 %v2964_v25, %v8170_v48  ;;  %v6984_v20 = vld [vmem:[%s10395_s1 + $0x128] ss:$28 sps:$4 sm:$0xff]  }
 0x17c   : > { %v2968_v1 = vpop.f32.mrf.mxu0  ;;  %3593 = vmatmul.mubr.bf16.gmra.mxu0 %v6980_v26 }
 0x17d   : > { %10458 = vst [vmem:[#allocation42_spill] sm:$0xff] %v8386_v39  ;;  %v3321_v53 = vpop.f32.mrf.mxu1  ;;  %6359 = vmatmul.mubr.msk.bf16.vlgmr.msra.gmra.mxu1 %vm2717_vm0, %v6983_v51  ;;  %v8396_v35 = vadd.f32 %v3317_v18, %v2965_v59  ;;  %v2969_v45 = vadd.f32 %v2968_v1, %v8112_v55  ;;  %3602 = vmatprep.mubr.bf16.mxu0 %v6986_v41  ;;  %v6987_v41 = vld [vmem:[%s10395_s1 + $0x50] ss:$28 sps:$4 sm:$0xff]   ;;  %v4494_v1 = vld [vmem:[%s10398_s4 + $0x60] sm:$0xff] }
 0x17e   : > { %3915 = vmatprep.mubr.bf16.mxu1 %v10457_v23  ;;  %v2970_v48 = vpop.f32.mrf.mxu0  ;;  %v4495_v59 = vld [vmem:[%s10398_s4 + $0x68] sm:$0xff]  ;;  %4576 = vperm.xlu0 %6600, %v4494_v1   ;;  %v6988_v1 = vld [vmem:[%s10395_s1 + $0x160] ss:$28 sps:$4 sm:$0xff]  }
 0x17f   : > { %10459 = vst [vmem:[#allocation43_spill] sm:$0xff] %v8396_v35  ;;  %v3323_v19 = vpop.f32.mrf.mxu1  ;;  %v8400_v26 = vadd.f32 %v3321_v53, %v2969_v45  ;;  %v2971_v51 = vadd.f32 %v2970_v48, %v8112_v55  ;;  %4581 = vperm.xlu1 %6601, %v4495_v59  }
 0x180   : > { %v2972_v25 = vpop.f32.mrf.mxu0 }
 0x181   : > { %10460 = vst [vmem:[#allocation44_spill] sm:$0xff] %v8400_v26  ;;  %v3325_v18 = vpop.f32.mrf.mxu1  ;;  %v8415_v53 = vadd.f32 %v3323_v19, %v2971_v51  ;;  %v2973_v55 = vadd.f32 %v2972_v25, %v8120_v32  ;;  %v4493_v19 = vld [vmem:[%s10398_s4 + $0x58] sm:$0xff]  ;;  %v4492_v51 = vld [vmem:[%s10398_s4 + $0x50] sm:$0xff] }
 0x182   : > { %v2974_v37 = vpop.f32.mrf.mxu0  ;;  %4566 = vperm.xlu0 %6600, %v4492_v51  }
 0x183   : > { %v3327_v45 = vpop.f32.mrf.mxu1  ;;  %v8421_v48 = vadd.f32 %v3325_v18, %v2973_v55  ;;  %v2975_v26 = vadd.f32 %v2974_v37, %v8120_v32  ;;  %4571 = vperm.xlu1 %6601, %v4493_v19  }
 0x184   : > { %v2978_v35 = vpop.f32.mrf.mxu0  ;;  %3603 = vmatmul.mubr.bf16.gmra.mxu0 %v6984_v20 }
 0x185   : > { %v3331_v39 = vpop.f32.mrf.mxu1  ;;  %6360 = vmatmul.mubr.msk.bf16.gmra.mxu1 %vm2717_vm0, %v6987_v41  ;;  %v8431_v25 = vadd.f32 %v3327_v45, %v2975_v26  ;;  %v2979_v18 = vadd.f32 %v2978_v35, %v8063_v24  ;;  %3612 = vmatprep.mubr.bf16.mxu0 %v6990_v9  ;;  %v6991_v35 = vld [vmem:[%s10395_s1 + $0x88] ss:$28 sps:$4 sm:$0xff]   ;;  %v6994_v45 = vld [vmem:[%s10395_s1 + $0x19c] ss:$28 sps:$4 sm:$0xff]  }
 0x186   : > { %3925 = vmatprep.mubr.bf16.mxu1 %v10457_v23  ;;  %v2980_v32 = vpop.f32.mrf.mxu0  ;;  %v4491_v9 = vld [vmem:[%s10398_s4 + $0x48] sm:$0xff] }
 0x187   : > { %10461 = vst [vmem:[#allocation45_spill] sm:$0xff] %v8431_v25  ;;  %v3333_v59 = vpop.f32.mrf.mxu1  ;;  %v8435_v20 = vadd.f32 %v3331_v39, %v2979_v18  ;;  %v2981_v41 = vadd.f32 %v2980_v32, %v8063_v24  ;;  %v4490_v39 = vld [vmem:[%s10398_s4 + $0x40] sm:$0xff]  ;;  %4561 = vperm.xlu1 %6601, %v4491_v9  }
 0x188   : > { %v2982_v55 = vpop.f32.mrf.mxu0  ;;  %4556 = vperm.xlu0 %6600, %v4490_v39   ;;  %v6992_v39 = vld [vmem:[%s10395_s1 + $0x198] ss:$28 sps:$4 sm:$0xff]  }
 0x189   : > { %10462 = vst [vmem:[#allocation46_spill] sm:$0xff] %v8435_v20  ;;  %v3335_v26 = vpop.f32.mrf.mxu1  ;;  %v8450_v37 = vadd.f32 %v3333_v59, %v2981_v41  ;;  %v2983_v24 = vadd.f32 %v2982_v55, %v8082_v54  ;;  %v4489_v59 = vld [vmem:[%s10398_s4 + $0x38] sm:$0xff]  ;;  %v4488_v41 = vld [vmem:[%s10398_s4 + $0x30] sm:$0xff] }
 0x18a   : > { %v2984_v19 = vpop.f32.mrf.mxu0 }
 0x18b   : > { %10463 = vst [vmem:[#allocation47_spill] sm:$0xff] %v8450_v37  ;;  %v3337_v51 = vpop.f32.mrf.mxu1  ;;  %v8456_v18 = vadd.f32 %v3335_v26, %v2983_v24  ;;  %v2985_v32 = vadd.f32 %v2984_v19, %v8082_v54  ;;  %4551 = vperm.xlu1 %6601, %v4489_v59  }
 0x18c   : > { %v2988_v20 = vpop.f32.mrf.mxu0  ;;  %3613 = vmatmul.mubr.bf16.gmra.mxu0 %v6988_v1  ;;  %4546 = vperm.xlu0 %6600, %v4488_v41  }
 0x18d   : > { %10464 = vst [vmem:[#allocation48_spill] sm:$0xff] %v8456_v18  ;;  %v3341_v25 = vpop.f32.mrf.mxu1  ;;  %6361 = vmatmul.mubr.msk.bf16.gmra.mxu1 %vm2717_vm0, %v6991_v35  ;;  %v8466_v55 = vadd.f32 %v3337_v51, %v2985_v32  ;;  %v2989_v26 = vadd.f32 %v2988_v20, %v8043_v61  ;;  %3622 = vmatprep.mubr.bf16.mxu0 %v6994_v45  ;;  %v6995_v20 = vld [vmem:[%s10395_s1 + $0xc0] ss:$28 sps:$4 sm:$0xff]   ;;  %v4487_v45 = vld [vmem:[%s10398_s4 + $0x28] sm:$0xff]  ;;  %v6998_v32 = vld [vmem:[%s10395_s1 + $0x1d4] ss:$28 sps:$4 sm:$0xff]  }
 0x18e   : > { %3935 = vmatprep.mubr.bf16.mxu1 %v10457_v23  ;;  %v2990_v54 = vpop.f32.mrf.mxu0 }
 0x18f   : > { %10465 = vst [vmem:[#allocation49_spill] sm:$0xff] %v8466_v55  ;;  %v3343_v9 = vpop.f32.mrf.mxu1  ;;  %v8470_v1 = vadd.f32 %v3341_v25, %v2989_v26  ;;  %v2991_v35 = vadd.f32 %v2990_v54, %v8043_v61  ;;  %v4486_v25 = vld [vmem:[%s10398_s4 + $0x20] sm:$0xff]  ;;  %4541 = vperm.xlu1 %6601, %v4487_v45  }
 0x190   : > { %v2992_v24 = vpop.f32.mrf.mxu0  ;;  %4536 = vperm.xlu0 %6600, %v4486_v25   ;;  %v6996_v25 = vld [vmem:[%s10395_s1 + $0x1d0] ss:$28 sps:$4 sm:$0xff]  }
 0x191   : > { %10466 = vst [vmem:[#allocation50_spill] sm:$0xff] %v8470_v1  ;;  %v3345_v19 = vpop.f32.mrf.mxu1  ;;  %v8485_v51 = vadd.f32 %v3343_v9, %v2991_v35  ;;  %v2993_v61 = vadd.f32 %v2992_v24, %v8045_v0  ;;  %v4485_v9 = vld [vmem:[%s10398_s4 + $0x18] sm:$0xff]  ;;  %v4484_v35 = vld [vmem:[%s10398_s4 + $0x10] sm:$0xff] }
 0x192   : > { %v2994_v59 = vpop.f32.mrf.mxu0 }
 0x193   : > { %10467 = vst [vmem:[#allocation51_spill] sm:$0xff] %v8485_v51  ;;  %v3347_v41 = vpop.f32.mrf.mxu1  ;;  %v8491_v26 = vadd.f32 %v3345_v19, %v2993_v61  ;;  %v2995_v54 = vadd.f32 %v2994_v59, %v8045_v0  ;;  %4531 = vperm.xlu1 %6601, %v4485_v9  }
 0x194   : > { %v2998_v1 = vpop.f32.mrf.mxu0  ;;  %3623 = vmatmul.mubr.bf16.gmra.mxu0 %v6992_v39  ;;  %4526 = vperm.xlu0 %6600, %v4484_v35  }
 0x195   : > { %10468 = vst [vmem:[#allocation52_spill] sm:$0xff] %v8491_v26  ;;  %v3351_v55 = vpop.f32.mrf.mxu1  ;;  %6362 = vmatmul.mubr.msk.bf16.gmra.mxu1 %vm2717_vm0, %v6995_v20  ;;  %v8501_v24 = vadd.f32 %v3347_v41, %v2995_v54  ;;  %v2999_v19 = vadd.f32 %v2998_v1, %v8011_v43  ;;  %3632 = vmatprep.mubr.bf16.mxu0 %v6998_v32  ;;  %v6999_v1 = vld [vmem:[%s10395_s1 + $0xf8] ss:$28 sps:$4 sm:$0xff]   ;;  %v4483_v32 = vld [vmem:[%s10398_s4 + $0x8] sm:$0xff] }
 0x196   : > { %3945 = vmatprep.mubr.bf16.mxu1 %v10457_v23  ;;  %v3000_v0 = vpop.f32.mrf.mxu0  ;;  %v7002_v54 = vld [vmem:[%s10395_s1 + $0x20c] ss:$28 sps:$4 sm:$0xff]  }
 0x197   : > { %10469 = vst [vmem:[#allocation53_spill] sm:$0xff] %v8501_v24  ;;  %v3353_v45 = vpop.f32.mrf.mxu1  ;;  %v8505_v39 = vadd.f32 %v3351_v55, %v2999_v19  ;;  %v3001_v20 = vadd.f32 %v3000_v0, %v8011_v43  ;;  %v4482_v55 = vld [vmem:[%s10398_s4] sm:$0xff]  ;;  %4521 = vperm.xlu1 %6601, %v4483_v32  }
 0x198   : > { %v3002_v61 = vpop.f32.mrf.mxu0  ;;  %4516 = vperm.xlu0 %6600, %v4482_v55   ;;  %v7000_v55 = vld [vmem:[%s10395_s1 + $0x208] ss:$28 sps:$4 sm:$0xff]  }
 0x199   : > { %10470 = vst [vmem:[#allocation54_spill] sm:$0xff] %v8505_v39  ;;  %v3355_v59 = vpop.f32.mrf.mxu1  ;;  %v8520_v41 = vadd.f32 %v3353_v45, %v3001_v20  ;;  %v3003_v43 = vadd.f32 %v3002_v61, %v8025_v50  ;;  %v4513_v45 = vld [vmem:[%s10398_s4 + $0xf8] sm:$0xff]  ;;  %v4512_v20 = vld [vmem:[%s10398_s4 + $0xf0] sm:$0xff] }
 0x19a   : > { %v3004_v9 = vpop.f32.mrf.mxu0 }
 0x19b   : > { %10471 = vst [vmem:[#allocation55_spill] sm:$0xff] %v8520_v41  ;;  %v3357_v35 = vpop.f32.mrf.mxu1  ;;  %v8526_v19 = vadd.f32 %v3355_v59, %v3003_v43  ;;  %v3005_v0 = vadd.f32 %v3004_v9, %v8025_v50  ;;  %4671 = vperm.xlu1 %6601, %v4513_v45  }
 0x19c   : > { %v3008_v39 = vpop.f32.mrf.mxu0  ;;  %3633 = vmatmul.mubr.bf16.gmra.mxu0 %v6996_v25  ;;  %4666 = vperm.xlu0 %6600, %v4512_v20  }
 0x19d   : > { %10472 = vst [vmem:[#allocation56_spill] sm:$0xff] %v8526_v19  ;;  %v3361_v24 = vpop.f32.mrf.mxu1  ;;  %6363 = vmatmul.mubr.msk.bf16.gmra.mxu1 %vm2717_vm0, %v6999_v1  ;;  %v8536_v61 = vadd.f32 %v3357_v35, %v3005_v0  ;;  %v3009_v59 = vadd.f32 %v3008_v39, %v8004_v38  ;;  %3642 = vmatprep.mubr.bf16.mxu0 %v7002_v54  ;;  %v7003_v39 = vld [vmem:[%s10395_s1 + $0x130] ss:$28 sps:$4 sm:$0xff]   ;;  %v7006_v0 = vld [vmem:[%s10395_s1 + $0x244] ss:$28 sps:$4 sm:$0xff]  }
 0x19e   : > { %3955 = vmatprep.mubr.bf16.mxu1 %v10457_v23  ;;  %v3010_v50 = vpop.f32.mrf.mxu0  ;;  %v4511_v54 = vld [vmem:[%s10398_s4 + $0xe8] sm:$0xff] }
 0x19f   : > { %10473 = vst [vmem:[#allocation57_spill] sm:$0xff] %v8536_v61  ;;  %v3363_v32 = vpop.f32.mrf.mxu1  ;;  %v8540_v25 = vadd.f32 %v3361_v24, %v3009_v59  ;;  %v3011_v1 = vadd.f32 %v3010_v50, %v8004_v38  ;;  %v4510_v24 = vld [vmem:[%s10398_s4 + $0xe0] sm:$0xff]  ;;  %4661 = vperm.xlu1 %6601, %v4511_v54  }
 0x1a0   : > { %v3012_v43 = vpop.f32.mrf.mxu0  ;;  %4656 = vperm.xlu0 %6600, %v4510_v24   ;;  %v7004_v24 = vld [vmem:[%s10395_s1 + $0x240] ss:$28 sps:$4 sm:$0xff]  }
 0x1a1   : > { %v3365_v9 = vpop.f32.mrf.mxu1  ;;  %v8555_v35 = vadd.f32 %v3363_v32, %v3011_v1  ;;  %v3013_v38 = vadd.f32 %v3012_v43, %v8009_v42  ;;  %v4509_v32 = vld [vmem:[%s10398_s4 + $0xd8] sm:$0xff]  ;;  %v4508_v1 = vld [vmem:[%s10398_s4 + $0xd0] sm:$0xff] }
 0x1a2   : > { %v3014_v45 = vpop.f32.mrf.mxu0 }
 0x1a3   : > { %v3367_v20 = vpop.f32.mrf.mxu1  ;;  %v8561_v59 = vadd.f32 %v3365_v9, %v3013_v38  ;;  %v3015_v50 = vadd.f32 %v3014_v45, %v8009_v42  ;;  %4651 = vperm.xlu1 %6601, %v4509_v32  }
 0x1a4   : > { %v3018_v61 = vpop.f32.mrf.mxu0  ;;  %3643 = vmatmul.mubr.bf16.gmra.mxu0 %v7000_v55  ;;  %4646 = vperm.xlu0 %6600, %v4508_v1  }
 0x1a5   : > { %v3371_v19 = vpop.f32.mrf.mxu1  ;;  %6364 = vmatmul.mubr.msk.bf16.gmra.mxu1 %vm2717_vm0, %v7003_v39  ;;  %v8571_v43 = vadd.f32 %v3367_v20, %v3015_v50  ;;  %v3019_v9 = vadd.f32 %v3018_v61, %v7977_v21  ;;  %3652 = vmatprep.mubr.bf16.mxu0 %v7006_v0  ;;  %v7007_v61 = vld [vmem:[%s10395_s1 + $0x168] ss:$28 sps:$4 sm:$0xff]   ;;  %v7010_v50 = vld [vmem:[%s10395_s1 + $0x27c] ss:$28 sps:$4 sm:$0xff]  }
 0x1a6   : > { %3965 = vmatprep.mubr.bf16.mxu1 %v10457_v23  ;;  %v3020_v42 = vpop.f32.mrf.mxu0  ;;  %v4507_v0 = vld [vmem:[%s10398_s4 + $0xc8] sm:$0xff] }
 0x1a7   : > { %10474 = vst [vmem:[#allocation58_spill] sm:$0xff] %v8571_v43  ;;  %v3373_v54 = vpop.f32.mrf.mxu1  ;;  %v8575_v55 = vadd.f32 %v3371_v19, %v3019_v9  ;;  %v3021_v39 = vadd.f32 %v3020_v42, %v7977_v21  ;;  %v4506_v19 = vld [vmem:[%s10398_s4 + $0xc0] sm:$0xff]  ;;  %4641 = vperm.xlu1 %6601, %v4507_v0  }
 0x1a8   : > { %v3022_v38 = vpop.f32.mrf.mxu0  ;;  %4636 = vperm.xlu0 %6600, %v4506_v19   ;;  %v7008_v19 = vld [vmem:[%s10395_s1 + $0x278] ss:$28 sps:$4 sm:$0xff]  }
 0x1a9   : > { %v3375_v45 = vpop.f32.mrf.mxu1  ;;  %v8590_v20 = vadd.f32 %v3373_v54, %v3021_v39  ;;  %v3023_v21 = vadd.f32 %v3022_v38, %v7988_v29  ;;  %v4505_v54 = vld [vmem:[%s10398_s4 + $0xb8] sm:$0xff]  ;;  %v4504_v39 = vld [vmem:[%s10398_s4 + $0xb0] sm:$0xff] }
 0x1aa   : > { %v3024_v32 = vpop.f32.mrf.mxu0 }
 0x1ab   : > { %10475 = vst [vmem:[#allocation59_spill] sm:$0xff] %v8590_v20  ;;  %v3377_v1 = vpop.f32.mrf.mxu1  ;;  %v8596_v9 = vadd.f32 %v3375_v45, %v3023_v21  ;;  %v3025_v42 = vadd.f32 %v3024_v32, %v7988_v29  ;;  %4631 = vperm.xlu1 %6601, %v4505_v54  }
 0x1ac   : > { %v3028_v43 = vpop.f32.mrf.mxu0  ;;  %3653 = vmatmul.mubr.bf16.gmra.mxu0 %v7004_v24  ;;  %4626 = vperm.xlu0 %6600, %v4504_v39  }
 0x1ad   : > { %10476 = vst [vmem:[#allocation60_spill] sm:$0xff] %v8596_v9  ;;  %v3381_v41 = vpop.f32.mrf.mxu1  ;;  %6365 = vmatmul.mubr.msk.bf16.gmra.mxu1 %vm2717_vm0, %v7007_v61  ;;  %v8606_v38 = vadd.f32 %v3377_v1, %v3025_v42  ;;  %v3029_v45 = vadd.f32 %v3028_v43, %v7957_v11  ;;  %3662 = vmatprep.mubr.bf16.mxu0 %v7010_v50  ;;  %v7011_v43 = vld [vmem:[%s10395_s1 + $0x1a0] ss:$28 sps:$4 sm:$0xff]   ;;  %v4503_v50 = vld [vmem:[%s10398_s4 + $0xa8] sm:$0xff]  ;;  %v7014_v42 = vld [vmem:[%s10395_s1 + $0x2b4] ss:$28 sps:$4 sm:$0xff]  }
 0x1ae   : > { %3975 = vmatprep.mubr.bf16.mxu1 %v10457_v23  ;;  %v3030_v29 = vpop.f32.mrf.mxu0 }
 0x1af   : > { %10477 = vst [vmem:[#allocation61_spill] sm:$0xff] %v8606_v38  ;;  %v3383_v0 = vpop.f32.mrf.mxu1  ;;  %v8610_v24 = vadd.f32 %v3381_v41, %v3029_v45  ;;  %v3031_v61 = vadd.f32 %v3030_v29, %v7957_v11  ;;  %v4502_v41 = vld [vmem:[%s10398_s4 + $0xa0] sm:$0xff]  ;;  %4621 = vperm.xlu1 %6601, %v4503_v50  }
 0x1b0   : > { %v3032_v21 = vpop.f32.mrf.mxu0  ;;  %4616 = vperm.xlu0 %6600, %v4502_v41   ;;  %v7012_v41 = vld [vmem:[%s10395_s1 + $0x2b0] ss:$28 sps:$4 sm:$0xff]  }
 0x1b1   : > { %10478 = vst [vmem:[#allocation62_spill] sm:$0xff] %v8610_v24  ;;  %v3385_v32 = vpop.f32.mrf.mxu1  ;;  %v8625_v1 = vadd.f32 %v3383_v0, %v3031_v61  ;;  %v3033_v11 = vadd.f32 %v3032_v21, %v7962_v13  ;;  %v4501_v0 = vld [vmem:[%s10398_s4 + $0x98] sm:$0xff]  ;;  %v4500_v61 = vld [vmem:[%s10398_s4 + $0x90] sm:$0xff] }
 0x1b2   : > { %v3034_v54 = vpop.f32.mrf.mxu0 }
 0x1b3   : > { %10479 = vst [vmem:[#allocation63_spill] sm:$0xff] %v8625_v1  ;;  %v3387_v39 = vpop.f32.mrf.mxu1  ;;  %v8631_v45 = vadd.f32 %v3385_v32, %v3033_v11  ;;  %v3035_v29 = vadd.f32 %v3034_v54, %v7962_v13  ;;  %4611 = vperm.xlu1 %6601, %v4501_v0  }
 0x1b4   : > { %v3038_v38 = vpop.f32.mrf.mxu0  ;;  %3663 = vmatmul.mubr.bf16.gmra.mxu0 %v7008_v19  ;;  %4606 = vperm.xlu0 %6600, %v4500_v61  }
 0x1b5   : > { %10480 = vst [vmem:[#allocation64_spill] sm:$0xff] %v8631_v45  ;;  %v3391_v26 = vpop.f32.mrf.mxu1  ;;  %6366 = vmatmul.mubr.msk.bf16.gmra.mxu1 %vm2717_vm0, %v7011_v43  ;;  %v8641_v21 = vadd.f32 %v3387_v39, %v3035_v29  ;;  %v3039_v32 = vadd.f32 %v3038_v38, %v7933_v63  ;;  %3672 = vmatprep.mubr.bf16.mxu0 %v7014_v42  ;;  %v7015_v38 = vld [vmem:[%s10395_s1 + $0x1d8] ss:$28 sps:$4 sm:$0xff]   ;;  %v4499_v42 = vld [vmem:[%s10398_s4 + $0x88] sm:$0xff] }
 0x1b6   : > { %3985 = vmatprep.mubr.bf16.mxu1 %v10457_v23  ;;  %v3040_v13 = vpop.f32.mrf.mxu0  ;;  %v7018_v29 = vld [vmem:[%s10395_s1 + $0x2ec] ss:$28 sps:$4 sm:$0xff]  }
 0x1b7   : > { %10481 = vst [vmem:[#allocation65_spill] sm:$0xff] %v8641_v21  ;;  %v3393_v50 = vpop.f32.mrf.mxu1  ;;  %v8645_v19 = vadd.f32 %v3391_v26, %v3039_v32  ;;  %v3041_v43 = vadd.f32 %v3040_v13, %v7933_v63  ;;  %v4498_v26 = vld [vmem:[%s10398_s4 + $0x80] sm:$0xff]  ;;  %4601 = vperm.xlu1 %6601, %v4499_v42  }
 0x1b8   : > { %v3042_v11 = vpop.f32.mrf.mxu0  ;;  %4596 = vperm.xlu0 %6600, %v4498_v26   ;;  %v7016_v26 = vld [vmem:[%s10395_s1 + $0x2e8] ss:$28 sps:$4 sm:$0xff]  }
 0x1b9   : > { %10482 = vst [vmem:[#allocation66_spill] sm:$0xff] %v8645_v19  ;;  %v3395_v54 = vpop.f32.mrf.mxu1  ;;  %v8660_v39 = vadd.f32 %v3393_v50, %v3041_v43  ;;  %v3043_v63 = vadd.f32 %v3042_v11, %v7942_v4  ;;  %v5493_v50 = vld [vmem:[%s10400_s6 + $0x8] sm:$0xff]  ;;  %v5492_v43 = vld [vmem:[%s10400_s6] sm:$0xff] }
 0x1ba   : > { %v3044_v0 = vpop.f32.mrf.mxu0 }
 0x1bb   : > { %10483 = vst [vmem:[#allocation67_spill] sm:$0xff] %v8660_v39  ;;  %v3397_v61 = vpop.f32.mrf.mxu1  ;;  %v8666_v32 = vadd.f32 %v3395_v54, %v3043_v63  ;;  %v3045_v13 = vadd.f32 %v3044_v0, %v7942_v4  ;;  %5515 = vperm.xlu1 %6601, %v5493_v50  }
 0x1bc   : > { %v3048_v19 = vpop.f32.mrf.mxu0  ;;  %3673 = vmatmul.mubr.bf16.gmra.mxu0 %v7012_v41  ;;  %5510 = vperm.xlu0 %6600, %v5492_v43  }
 0x1bd   : > { %10484 = vst [vmem:[#allocation68_spill] sm:$0xff] %v8666_v32  ;;  %v3401_v21 = vpop.f32.mrf.mxu1  ;;  %6367 = vmatmul.mubr.msk.bf16.gmra.mxu1 %vm2717_vm0, %v7015_v38  ;;  %v8676_v11 = vadd.f32 %v3397_v61, %v3045_v13  ;;  %v3049_v54 = vadd.f32 %v3048_v19, %v7908_v52  ;;  %3682 = vmatprep.mubr.bf16.mxu0 %v7018_v29  ;;  %v7019_v19 = vld [vmem:[%s10395_s1 + $0x210] ss:$28 sps:$4 sm:$0xff]   ;;  %v5495_v29 = vld [vmem:[%s10400_s6 + $0x18] sm:$0xff]  ;;  %v7022_v13 = vld [vmem:[%s10395_s1 + $0x324] ss:$28 sps:$4 sm:$0xff]  }
 0x1be   : > { %3995 = vmatprep.mubr.bf16.mxu1 %v10457_v23  ;;  %v3050_v4 = vpop.f32.mrf.mxu0 }
 0x1bf   : > { %10485 = vst [vmem:[#allocation69_spill] sm:$0xff] %v8676_v11  ;;  %v3403_v42 = vpop.f32.mrf.mxu1  ;;  %v8680_v41 = vadd.f32 %v3401_v21, %v3049_v54  ;;  %v3051_v38 = vadd.f32 %v3050_v4, %v7908_v52  ;;  %v5494_v21 = vld [vmem:[%s10400_s6 + $0x10] sm:$0xff]  ;;  %5525 = vperm.xlu1 %6601, %v5495_v29  }
 0x1c0   : > { %v3052_v63 = vpop.f32.mrf.mxu0  ;;  %5520 = vperm.xlu0 %6600, %v5494_v21   ;;  %v7020_v21 = vld [vmem:[%s10395_s1 + $0x320] ss:$28 sps:$4 sm:$0xff]  }
 0x1c1   : > { %10486 = vst [vmem:[#allocation70_spill] sm:$0xff] %v8680_v41  ;;  %v3405_v0 = vpop.f32.mrf.mxu1  ;;  %v8695_v61 = vadd.f32 %v3403_v42, %v3051_v38  ;;  %v3053_v52 = vadd.f32 %v3052_v63, %v7918_v57  ;;  %v5497_v42 = vld [vmem:[%s10400_s6 + $0x28] sm:$0xff]  ;;  %v5496_v38 = vld [vmem:[%s10400_s6 + $0x20] sm:$0xff] }
 0x1c2   : > { %v3054_v50 = vpop.f32.mrf.mxu0 }
 0x1c3   : > { %10487 = vst [vmem:[#allocation71_spill] sm:$0xff] %v8695_v61  ;;  %v3407_v43 = vpop.f32.mrf.mxu1  ;;  %v8701_v54 = vadd.f32 %v3405_v0, %v3053_v52  ;;  %v3055_v4 = vadd.f32 %v3054_v50, %v7918_v57  ;;  %5535 = vperm.xlu1 %6601, %v5497_v42  }
 0x1c4   : > { %v3058_v41 = vpop.f32.mrf.mxu0  ;;  %3683 = vmatmul.mubr.bf16.gmra.mxu0 %v7016_v26  ;;  %5530 = vperm.xlu0 %6600, %v5496_v38  }
 0x1c5   : > { %10488 = vst [vmem:[#allocation72_spill] sm:$0xff] %v8701_v54  ;;  %v3411_v11 = vpop.f32.mrf.mxu1  ;;  %6368 = vmatmul.mubr.msk.bf16.gmra.mxu1 %vm2717_vm0, %v7019_v19  ;;  %v8711_v63 = vadd.f32 %v3407_v43, %v3055_v4  ;;  %v3059_v0 = vadd.f32 %v3058_v41, %v7884_v40  ;;  %3692 = vmatprep.mubr.bf16.mxu0 %v7022_v13  ;;  %v7023_v41 = vld [vmem:[%s10395_s1 + $0x248] ss:$28 sps:$4 sm:$0xff]   ;;  %v5499_v13 = vld [vmem:[%s10400_s6 + $0x38] sm:$0xff] }
 0x1c6   : > { %4005 = vmatprep.mubr.bf16.mxu1 %v10457_v23  ;;  %v3060_v57 = vpop.f32.mrf.mxu0  ;;  %v7026_v4 = vld [vmem:[%s10395_s1 + $0x35c] ss:$28 sps:$4 sm:$0xff]  }
 0x1c7   : > { %10489 = vst [vmem:[#allocation73_spill] sm:$0xff] %v8711_v63  ;;  %v3413_v29 = vpop.f32.mrf.mxu1  ;;  %v8715_v26 = vadd.f32 %v3411_v11, %v3059_v0  ;;  %v3061_v19 = vadd.f32 %v3060_v57, %v7884_v40  ;;  %v5498_v11 = vld [vmem:[%s10400_s6 + $0x30] sm:$0xff]  ;;  %5545 = vperm.xlu1 %6601, %v5499_v13  }
 0x1c8   : > { %v3062_v52 = vpop.f32.mrf.mxu0  ;;  %5540 = vperm.xlu0 %6600, %v5498_v11   ;;  %v7024_v11 = vld [vmem:[%s10395_s1 + $0x358] ss:$28 sps:$4 sm:$0xff]  }
 0x1c9   : > { %10490 = vst [vmem:[#allocation74_spill] sm:$0xff] %v8715_v26  ;;  %v3415_v50 = vpop.f32.mrf.mxu1  ;;  %v8730_v43 = vadd.f32 %v3413_v29, %v3061_v19  ;;  %v3063_v40 = vadd.f32 %v3062_v52, %v7895_v46  ;;  %v5501_v29 = vld [vmem:[%s10400_s6 + $0x48] sm:$0xff]  ;;  %v5500_v19 = vld [vmem:[%s10400_s6 + $0x40] sm:$0xff] }
 0x1ca   : > { %v3064_v42 = vpop.f32.mrf.mxu0 }
 0x1cb   : > { %10491 = vst [vmem:[#allocation75_spill] sm:$0xff] %v8730_v43  ;;  %v3417_v38 = vpop.f32.mrf.mxu1  ;;  %v8736_v0 = vadd.f32 %v3415_v50, %v3063_v40  ;;  %v3065_v57 = vadd.f32 %v3064_v42, %v7895_v46  ;;  %5555 = vperm.xlu1 %6601, %v5501_v29  }
 0x1cc   : > { %v3068_v26 = vpop.f32.mrf.mxu0  ;;  %3693 = vmatmul.mubr.bf16.gmra.mxu0 %v7020_v21  ;;  %5550 = vperm.xlu0 %6600, %v5500_v19  }
 0x1cd   : > { %10492 = vst [vmem:[#allocation76_spill] sm:$0xff] %v8736_v0  ;;  %v3421_v63 = vpop.f32.mrf.mxu1  ;;  %6369 = vmatmul.mubr.msk.bf16.gmra.mxu1 %vm2717_vm0, %v7023_v41  ;;  %v8746_v52 = vadd.f32 %v3417_v38, %v3065_v57  ;;  %v3069_v50 = vadd.f32 %v3068_v26, %v7860_v28  ;;  %3702 = vmatprep.mubr.bf16.mxu0 %v7026_v4  ;;  %v7027_v26 = vld [vmem:[%s10395_s1 + $0x280] ss:$28 sps:$4 sm:$0xff]   ;;  %v7030_v57 = vld [vmem:[%s10395_s1 + $0x394] ss:$28 sps:$4 sm:$0xff]  }
 0x1ce   : > { %4015 = vmatprep.mubr.bf16.mxu1 %v10457_v23  ;;  %v3070_v46 = vpop.f32.mrf.mxu0  ;;  %v5503_v4 = vld [vmem:[%s10400_s6 + $0x58] sm:$0xff] }
 0x1cf   : > { %10493 = vst [vmem:[#allocation77_spill] sm:$0xff] %v8746_v52  ;;  %v3423_v13 = vpop.f32.mrf.mxu1  ;;  %v8750_v21 = vadd.f32 %v3421_v63, %v3069_v50  ;;  %v3071_v41 = vadd.f32 %v3070_v46, %v7860_v28  ;;  %v5502_v63 = vld [vmem:[%s10400_s6 + $0x50] sm:$0xff]  ;;  %5565 = vperm.xlu1 %6601, %v5503_v4  }
 0x1d0   : > { %v3072_v40 = vpop.f32.mrf.mxu0  ;;  %5560 = vperm.xlu0 %6600, %v5502_v63   ;;  %v7028_v63 = vld [vmem:[%s10395_s1 + $0x390] ss:$28 sps:$4 sm:$0xff]  }
 0x1d1   : > { %10494 = vst [vmem:[#allocation78_spill] sm:$0xff] %v8750_v21  ;;  %v3425_v42 = vpop.f32.mrf.mxu1  ;;  %v8765_v38 = vadd.f32 %v3423_v13, %v3071_v41  ;;  %v3073_v28 = vadd.f32 %v3072_v40, %v7871_v34  ;;  %v5505_v13 = vld [vmem:[%s10400_s6 + $0x68] sm:$0xff]  ;;  %v5504_v41 = vld [vmem:[%s10400_s6 + $0x60] sm:$0xff] }
 0x1d2   : > { %v3074_v29 = vpop.f32.mrf.mxu0 }
 0x1d3   : > { %10495 = vst [vmem:[#allocation79_spill] sm:$0xff] %v8765_v38  ;;  %v3427_v19 = vpop.f32.mrf.mxu1  ;;  %v8771_v50 = vadd.f32 %v3425_v42, %v3073_v28  ;;  %v3075_v46 = vadd.f32 %v3074_v29, %v7871_v34  ;;  %5575 = vperm.xlu1 %6601, %v5505_v13   ;;  %v7034_v13 = vld [vmem:[%s10395_s1 + $0x3cc] ss:$28 sps:$4 sm:$0xff]  }
 0x1d4   : > { %v3078_v21 = vpop.f32.mrf.mxu0  ;;  %3703 = vmatmul.mubr.bf16.gmra.mxu0 %v7024_v11  ;;  %5570 = vperm.xlu0 %6600, %v5504_v41  }
 0x1d5   : > { %10496 = vst [vmem:[#allocation80_spill] sm:$0xff] %v8771_v50  ;;  %v3431_v52 = vpop.f32.mrf.mxu1  ;;  %6370 = vmatmul.mubr.msk.bf16.gmra.mxu1 %vm2717_vm0, %v7027_v26  ;;  %v8781_v40 = vadd.f32 %v3427_v19, %v3075_v46  ;;  %v3079_v42 = vadd.f32 %v3078_v21, %v7834_v15  ;;  %3712 = vmatprep.mubr.bf16.mxu0 %v7030_v57  ;;  %v7031_v21 = vld [vmem:[%s10395_s1 + $0x2b8] ss:$28 sps:$4 sm:$0xff]   ;;  %v980_v46 = vpop.permute.xlu0 %979 }
 0x1d6   : > { %4025 = vmatprep.mubr.bf16.mxu1 %v10457_v23  ;;  %v3080_v34 = vpop.f32.mrf.mxu0  ;;  %v5507_v57 = vld [vmem:[%s10400_s6 + $0x78] sm:$0xff] }
 0x1d7   : > { %10497 = vst [vmem:[#allocation81_spill] sm:$0xff] %v8781_v40  ;;  %v3433_v4 = vpop.f32.mrf.mxu1  ;;  %v8785_v11 = vadd.f32 %v3431_v52, %v3079_v42  ;;  %v3081_v26 = vadd.f32 %v3080_v34, %v7834_v15  ;;  %v5506_v52 = vld [vmem:[%s10400_s6 + $0x70] sm:$0xff]  ;;  %5585 = vperm.xlu1 %6601, %v5507_v57  }
 0x1d8   : > { %v3082_v28 = vpop.f32.mrf.mxu0  ;;  %5580 = vperm.xlu0 %6600, %v5506_v52  }
 0x1d9   : > { %10498 = vst [vmem:[#allocation82_spill] sm:$0xff] %v8785_v11  ;;  %v3435_v29 = vpop.f32.mrf.mxu1  ;;  %v8800_v19 = vadd.f32 %v3433_v4, %v3081_v26  ;;  %v3083_v15 = vadd.f32 %v3082_v28, %v7847_v22  ;;  %v985_v28 = vpop.permute.xlu1 %984 }
 0x1da   : > { %v3084_v41 = vpop.f32.mrf.mxu0 }
 0x1db   : > { %10499 = vst [vmem:[#allocation83_spill] sm:$0xff] %v8800_v19  ;;  %v3437_v42 = vpop.f32.mrf.mxu1  ;;  %v8806_v34 = vadd.f32 %v3435_v29, %v3083_v15  ;;  %v3085_v11 = vadd.f32 %v3084_v41, %v7847_v22  ;;  %v7032_v22 = vld [vmem:[%s10395_s1 + $0x3c8] ss:$28 sps:$4 sm:$0xff]  }
 0x1dc   : > { %v3088_v40 = vpop.f32.mrf.mxu0  ;;  %3713 = vmatmul.mubr.bf16.gmra.mxu0 %v7028_v63 }
 0x1dd   : > { %10500 = vst [vmem:[#allocation84_spill] sm:$0xff] %v8806_v34  ;;  %v3441_v50 = vpop.f32.mrf.mxu1  ;;  %6371 = vmatmul.mubr.msk.bf16.gmra.mxu1 %vm2717_vm0, %v7031_v21  ;;  %v8810_v4 = vadd.f32 %v3437_v42, %v3085_v11  ;;  %v3089_v26 = vadd.f32 %v3088_v40, %v980_v46  ;;  %3722 = vmatprep.mubr.bf16.mxu0 %v7034_v13  ;;  %v7035_v11 = vld [vmem:[%s10395_s1 + $0x2f0] ss:$28 sps:$4 sm:$0xff]   ;;  %v7038_v21 = vld [vmem:[%s10395_s1 + $0x404] ss:$28 sps:$4 sm:$0xff]  }
 0x1de   : > { %4035 = vmatprep.mubr.bf16.mxu1 %v10457_v23  ;;  %v3090_v19 = vpop.f32.mrf.mxu0 }
 0x1df   : > { %10501 = vst [vmem:[#allocation85_spill] sm:$0xff] %v8810_v4  ;;  %v3443_v38 = vpop.f32.mrf.mxu1  ;;  %v8813_v57 = vadd.f32 %v3441_v50, %v3089_v26  ;;  %v3091_v29 = vadd.f32 %v3090_v19, %v980_v46  ;;  %v10522_v4 = vld [vmem:[#allocation8_spill] sm:$0xff] }
 0x1e0   : > { %v3092_v52 = vpop.f32.mrf.mxu0 }
 0x1e1   : > { %10502 = vst [vmem:[#allocation86_spill] sm:$0xff] %v8813_v57  ;;  %v3445_v15 = vpop.f32.mrf.mxu1  ;;  %v8821_v40 = vadd.f32 %v3443_v38, %v3091_v29  ;;  %v3093_v63 = vadd.f32 %v3092_v52, %v985_v28 }
 0x1e2   : > { %v3094_v50 = vpop.f32.mrf.mxu0 }
 0x1e3   : > { %10503 = vst [vmem:[#allocation87_spill] sm:$0xff] %v8821_v40  ;;  %v3447_v13 = vpop.f32.mrf.mxu1  ;;  %v8826_v19 = vadd.f32 %v3445_v15, %v3093_v63  ;;  %v3095_v46 = vadd.f32 %v3094_v50, %v985_v28 }
 0x1e4   : > { %v3098_v41 = vpop.f32.mrf.mxu0  ;;  %3723 = vmatmul.mubr.bf16.gmra.mxu0 %v7032_v22  ;;  %v7036_v22 = vld [vmem:[%s10395_s1 + $0x400] ss:$28 sps:$4 sm:$0xff]  }
 0x1e5   : > { %10504 = vst [vmem:[#allocation88_spill] sm:$0xff] %v8826_v19  ;;  %v3451_v42 = vpop.f32.mrf.mxu1  ;;  %6372 = vmatmul.mubr.msk.bf16.gmra.mxu1 %vm2717_vm0, %v7035_v11  ;;  %v8829_v26 = vadd.f32 %v3447_v13, %v3095_v46  ;;  %v3099_v38 = vadd.f32 %v3098_v41, %v8263_v10  ;;  %3732 = vmatprep.mubr.bf16.mxu0 %v7038_v21  ;;  %v7039_v11 = vld [vmem:[%s10395_s1 + $0x328] ss:$28 sps:$4 sm:$0xff]   ;;  %v7042_v13 = vld [vmem:[%s10395_s1 + $0x43c] ss:$28 sps:$4 sm:$0xff]  }
 0x1e6   : > { %4045 = vmatprep.mubr.bf16.mxu1 %v10457_v23  ;;  %v3100_v29 = vpop.f32.mrf.mxu0 }
 0x1e7   : > { %10505 = vst [vmem:[#allocation89_spill] sm:$0xff] %v8829_v26  ;;  %v3453_v52 = vpop.f32.mrf.mxu1  ;;  %v8833_v40 = vadd.f32 %v3451_v42, %v3099_v38  ;;  %v3101_v15 = vadd.f32 %v3100_v29, %v8263_v10 }
 0x1e8   : > { %v3102_v63 = vpop.f32.mrf.mxu0 }
 0x1e9   : > { %10506 = vst [vmem:[#allocation90_spill] sm:$0xff] %v8833_v40  ;;  %v3455_v28 = vpop.f32.mrf.mxu1  ;;  %v8842_v50 = vadd.f32 %v3453_v52, %v3101_v15  ;;  %v3103_v21 = vadd.f32 %v3102_v63, %v8271_v27 }
 0x1ea   : > { %v3104_v46 = vpop.f32.mrf.mxu0 }
 0x1eb   : > { %10507 = vst [vmem:[#allocation91_spill] sm:$0xff] %v8842_v50  ;;  %v3457_v10 = vpop.f32.mrf.mxu1  ;;  %v8848_v41 = vadd.f32 %v3455_v28, %v3103_v21  ;;  %v3105_v42 = vadd.f32 %v3104_v46, %v8271_v27 }
 0x1ec   : > { %v3108_v38 = vpop.f32.mrf.mxu0  ;;  %3733 = vmatmul.mubr.bf16.gmra.mxu0 %v7036_v22  ;;  %v7040_v22 = vld [vmem:[%s10395_s1 + $0x438] ss:$28 sps:$4 sm:$0xff]  }
 0x1ed   : > { %10508 = vst [vmem:[#allocation92_spill] sm:$0xff] %v8848_v41  ;;  %v3461_v29 = vpop.f32.mrf.mxu1  ;;  %6373 = vmatmul.mubr.msk.bf16.gmra.mxu1 %vm2717_vm0, %v7039_v11  ;;  %v8852_v40 = vadd.f32 %v3457_v10, %v3105_v42  ;;  %v3109_v52 = vadd.f32 %v3108_v38, %v8213_v58  ;;  %3742 = vmatprep.mubr.bf16.mxu0 %v7042_v13  ;;  %v7043_v11 = vld [vmem:[%s10395_s1 + $0x360] ss:$28 sps:$4 sm:$0xff]   ;;  %v7046_v10 = vld [vmem:[%s10395_s1 + $0x474] ss:$28 sps:$4 sm:$0xff]  }
 0x1ee   : > { %4055 = vmatprep.mubr.bf16.mxu1 %v10457_v23  ;;  %v3110_v15 = vpop.f32.mrf.mxu0 }
 0x1ef   : > { %10509 = vst [vmem:[#allocation93_spill] sm:$0xff] %v8852_v40  ;;  %v3463_v63 = vpop.f32.mrf.mxu1  ;;  %v8856_v50 = vadd.f32 %v3461_v29, %v3109_v52  ;;  %v3111_v28 = vadd.f32 %v3110_v15, %v8213_v58 }
 0x1f0   : > { %v3112_v21 = vpop.f32.mrf.mxu0 }
 0x1f1   : > { %10510 = vst [vmem:[#allocation94_spill] sm:$0xff] %v8856_v50  ;;  %v3465_v27 = vpop.f32.mrf.mxu1  ;;  %v8865_v46 = vadd.f32 %v3463_v63, %v3111_v28  ;;  %v3113_v13 = vadd.f32 %v3112_v21, %v8233_v3 }
 0x1f2   : > { %v3114_v42 = vpop.f32.mrf.mxu0 }
 0x1f3   : > { %10511 = vst [vmem:[#allocation95_spill] sm:$0xff] %v8865_v46  ;;  %v3467_v58 = vpop.f32.mrf.mxu1  ;;  %v8871_v38 = vadd.f32 %v3465_v27, %v3113_v13  ;;  %v3115_v29 = vadd.f32 %v3114_v42, %v8233_v3 }
 0x1f4   : > { %v3118_v52 = vpop.f32.mrf.mxu0  ;;  %3743 = vmatmul.mubr.bf16.gmra.mxu0 %v7040_v22  ;;  %v7044_v22 = vld [vmem:[%s10395_s1 + $0x470] ss:$28 sps:$4 sm:$0xff]  }
 0x1f5   : > { %10512 = vst [vmem:[#allocation96_spill] sm:$0xff] %v8871_v38  ;;  %v3471_v15 = vpop.f32.mrf.mxu1  ;;  %6374 = vmatmul.mubr.msk.bf16.gmra.mxu1 %vm2717_vm0, %v7043_v11  ;;  %v8875_v50 = vadd.f32 %v3467_v58, %v3115_v29  ;;  %v3119_v63 = vadd.f32 %v3118_v52, %v8175_v7  ;;  %3752 = vmatprep.mubr.bf16.mxu0 %v7046_v10  ;;  %v7047_v11 = vld [vmem:[%s10395_s1 + $0x398] ss:$28 sps:$4 sm:$0xff]   ;;  %v7050_v58 = vld [vmem:[%s10395_s1 + $0x4ac] ss:$28 sps:$4 sm:$0xff]  }
 0x1f6   : > { %4065 = vmatprep.mubr.bf16.mxu1 %v10457_v23  ;;  %v3120_v28 = vpop.f32.mrf.mxu0 }
 0x1f7   : > { %10513 = vst [vmem:[#allocation97_spill] sm:$0xff] %v8875_v50  ;;  %v3473_v21 = vpop.f32.mrf.mxu1  ;;  %v8879_v46 = vadd.f32 %v3471_v15, %v3119_v63  ;;  %v3121_v27 = vadd.f32 %v3120_v28, %v8175_v7 }
 0x1f8   : > { %v3122_v13 = vpop.f32.mrf.mxu0 }
 0x1f9   : > { %10514 = vst [vmem:[#allocation98_spill] sm:$0xff] %v8879_v46  ;;  %v3475_v3 = vpop.f32.mrf.mxu1  ;;  %v8888_v42 = vadd.f32 %v3473_v21, %v3121_v27  ;;  %v3123_v10 = vadd.f32 %v3122_v13, %v8183_v5 }
 0x1fa   : > { %v3124_v29 = vpop.f32.mrf.mxu0 }
 0x1fb   : > { %10515 = vst [vmem:[#allocation99_spill] sm:$0xff] %v8888_v42  ;;  %v3477_v7 = vpop.f32.mrf.mxu1  ;;  %v8894_v52 = vadd.f32 %v3475_v3, %v3123_v10  ;;  %v3125_v15 = vadd.f32 %v3124_v29, %v8183_v5 }
 0x1fc   : > { %v3128_v63 = vpop.f32.mrf.mxu0  ;;  %3753 = vmatmul.mubr.bf16.gmra.mxu0 %v7044_v22  ;;  %v7048_v22 = vld [vmem:[%s10395_s1 + $0x4a8] ss:$28 sps:$4 sm:$0xff]  }
 0x1fd   : > { %10516 = vst [vmem:[#allocation100_spill] sm:$0xff] %v8894_v52  ;;  %v3481_v28 = vpop.f32.mrf.mxu1  ;;  %6375 = vmatmul.mubr.msk.bf16.gmra.mxu1 %vm2717_vm0, %v7047_v11  ;;  %v8898_v46 = vadd.f32 %v3477_v7, %v3125_v15  ;;  %v3129_v21 = vadd.f32 %v3128_v63, %v8125_v49  ;;  %3762 = vmatprep.mubr.bf16.mxu0 %v7050_v58  ;;  %v7051_v11 = vld [vmem:[%s10395_s1 + $0x3d0] ss:$28 sps:$4 sm:$0xff]   ;;  %v7054_v7 = vld [vmem:[%s10395_s1 + $0x4e4] ss:$28 sps:$4 sm:$0xff]  }
 0x1fe   : > { %4075 = vmatprep.mubr.bf16.mxu1 %v10457_v23  ;;  %v3130_v27 = vpop.f32.mrf.mxu0 }
 0x1ff   : > { %10517 = vst [vmem:[#allocation101_spill] sm:$0xff] %v8898_v46  ;;  %v3483_v13 = vpop.f32.mrf.mxu1  ;;  %v8902_v42 = vadd.f32 %v3481_v28, %v3129_v21  ;;  %v3131_v3 = vadd.f32 %v3130_v27, %v8125_v49 }
 0x200   : > { %v3132_v10 = vpop.f32.mrf.mxu0 }
 0x201   : > { %v3485_v5 = vpop.f32.mrf.mxu1  ;;  %v8911_v29 = vadd.f32 %v3483_v13, %v3131_v3  ;;  %v3133_v58 = vadd.f32 %v3132_v10, %v8145_v33 }
 0x202   : > { %v3134_v15 = vpop.f32.mrf.mxu0 }
 0x203   : > { %v3487_v49 = vpop.f32.mrf.mxu1  ;;  %v8917_v63 = vadd.f32 %v3485_v5, %v3133_v58  ;;  %v3135_v28 = vadd.f32 %v3134_v15, %v8145_v33 }
 0x204   : > { %v3138_v21 = vpop.f32.mrf.mxu0  ;;  %3763 = vmatmul.mubr.bf16.gmra.mxu0 %v7048_v22  ;;  %v7052_v22 = vld [vmem:[%s10395_s1 + $0x4e0] ss:$28 sps:$4 sm:$0xff]  }
 0x205   : > { %v3491_v27 = vpop.f32.mrf.mxu1  ;;  %6376 = vmatmul.mubr.msk.bf16.gmra.mxu1 %vm2717_vm0, %v7051_v11  ;;  %v8921_v46 = vadd.f32 %v3487_v49, %v3135_v28  ;;  %v3139_v13 = vadd.f32 %v3138_v21, %v8087_v6  ;;  %3772 = vmatprep.mubr.bf16.mxu0 %v7054_v7  ;;  %v7055_v11 = vld [vmem:[%s10395_s1 + $0x408] ss:$28 sps:$4 sm:$0xff]   ;;  %v7058_v49 = vld [vmem:[%s10395_s1 + $0x51c] ss:$28 sps:$4 sm:$0xff]  }
 0x206   : > { %4085 = vmatprep.mubr.bf16.mxu1 %v10457_v23  ;;  %v3140_v3 = vpop.f32.mrf.mxu0 }
 0x207   : > { %v3493_v10 = vpop.f32.mrf.mxu1  ;;  %v8925_v52 = vadd.f32 %v3491_v27, %v3139_v13  ;;  %v3141_v5 = vadd.f32 %v3140_v3, %v8087_v6 }
 0x208   : > { %v3142_v58 = vpop.f32.mrf.mxu0 }
 0x209   : > { %v3495_v33 = vpop.f32.mrf.mxu1  ;;  %v8934_v15 = vadd.f32 %v3493_v10, %v3141_v5  ;;  %v3143_v7 = vadd.f32 %v3142_v58, %v8095_v36 }
 0x20a   : > { %v3144_v28 = vpop.f32.mrf.mxu0 }
 0x20b   : > { %v3497_v6 = vpop.f32.mrf.mxu1  ;;  %v8940_v21 = vadd.f32 %v3495_v33, %v3143_v7  ;;  %v3145_v27 = vadd.f32 %v3144_v28, %v8095_v36 }
 0x20c   : > { %v3148_v13 = vpop.f32.mrf.mxu0  ;;  %3773 = vmatmul.mubr.bf16.gmra.mxu0 %v7052_v22  ;;  %v7056_v22 = vld [vmem:[%s10395_s1 + $0x518] ss:$28 sps:$4 sm:$0xff]  }
 0x20d   : > { %v3501_v3 = vpop.f32.mrf.mxu1  ;;  %6377 = vmatmul.mubr.msk.bf16.gmra.mxu1 %vm2717_vm0, %v7055_v11  ;;  %v8944_v50 = vadd.f32 %v3497_v6, %v3145_v27  ;;  %v3149_v10 = vadd.f32 %v3148_v13, %v8047_v2  ;;  %3782 = vmatprep.mubr.bf16.mxu0 %v7058_v49  ;;  %v7059_v11 = vld [vmem:[%s10395_s1 + $0x440] ss:$28 sps:$4 sm:$0xff]   ;;  %v7062_v6 = vld [vmem:[%s10395_s1 + $0x554] ss:$28 sps:$4 sm:$0xff]  }
 0x20e   : > { %4095 = vmatprep.mubr.bf16.mxu1 %v10457_v23  ;;  %v3150_v5 = vpop.f32.mrf.mxu0 }
 0x20f   : > { %v3503_v58 = vpop.f32.mrf.mxu1  ;;  %v8948_v38 = vadd.f32 %v3501_v3, %v3149_v10  ;;  %v3151_v33 = vadd.f32 %v3150_v5, %v8047_v2 }
 0x210   : > { %v3152_v7 = vpop.f32.mrf.mxu0 }
 0x211   : > { %v3505_v36 = vpop.f32.mrf.mxu1  ;;  %v8957_v28 = vadd.f32 %v3503_v58, %v3151_v33  ;;  %v3153_v49 = vadd.f32 %v3152_v7, %v8061_v12  ;;  %v10518_v58 = vld [vmem:[#allocation5_spill] sm:$0xff] }
 0x212   : > { %v3154_v27 = vpop.f32.mrf.mxu0 }
 0x213   : > { %v3507_v2 = vpop.f32.mrf.mxu1  ;;  %v8963_v13 = vadd.f32 %v3505_v36, %v3153_v49  ;;  %v3155_v3 = vadd.f32 %v3154_v27, %v8061_v12 }
 0x214   : > { %v3158_v10 = vpop.f32.mrf.mxu0  ;;  %3783 = vmatmul.mubr.bf16.gmra.mxu0 %v7056_v22  ;;  %v7060_v22 = vld [vmem:[%s10395_s1 + $0x550] ss:$28 sps:$4 sm:$0xff]  }
 0x215   : > { %v3511_v5 = vpop.f32.mrf.mxu1  ;;  %6378 = vmatmul.mubr.msk.bf16.gmra.mxu1 %vm2717_vm0, %v7059_v11  ;;  %v8967_v40 = vadd.f32 %v3507_v2, %v3155_v3  ;;  %v3159_v33 = vadd.f32 %v3158_v10, %v10518_v58  ;;  %3792 = vmatprep.mubr.bf16.mxu0 %v7062_v6  ;;  %v7063_v11 = vld [vmem:[%s10395_s1 + $0x478] ss:$28 sps:$4 sm:$0xff]   ;;  %v10519_v6 = vld [vmem:[#allocation6_spill] sm:$0xff] }
 0x216   : > { %4105 = vmatprep.mubr.bf16.mxu1 %v10457_v23  ;;  %v3160_v7 = vpop.f32.mrf.mxu0  ;;  %v7066_v3 = vld [vmem:[%s10395_s1 + $0x58c] ss:$28 sps:$4 sm:$0xff]  }
 0x217   : > { %v3513_v41 = vpop.f32.mrf.mxu1  ;;  %v8971_v26 = vadd.f32 %v3511_v5, %v3159_v33  ;;  %v3161_v36 = vadd.f32 %v3160_v7, %v10518_v58 }
 0x218   : > { %v3162_v49 = vpop.f32.mrf.mxu0 }
 0x219   : > { %v3515_v12 = vpop.f32.mrf.mxu1  ;;  %v8980_v27 = vadd.f32 %v3513_v41, %v3161_v36  ;;  %v3163_v2 = vadd.f32 %v3162_v49, %v10519_v6  ;;  %v10520_v41 = vld [vmem:[#allocation7_spill] sm:$0xff] }
 0x21a   : > { %v3164_v10 = vpop.f32.mrf.mxu0 }
 0x21b   : > { %v3517_v5 = vpop.f32.mrf.mxu1  ;;  %v8986_v58 = vadd.f32 %v3515_v12, %v3163_v2  ;;  %v3165_v33 = vadd.f32 %v3164_v10, %v10519_v6 }
 0x21c   : > { %v3554_v7 = vpop.f32.mrf.mxu0  ;;  %3793 = vmatmul.mubr.bf16.gmra.mxu0 %v7060_v22 }
 0x21d   : > { %v3834_v19 = vpop.f32.mrf.mxu1  ;;  %6379 = vmatmul.mubr.msk.bf16.gmra.mxu1 %vm2717_vm0, %v7063_v11  ;;  %v8990_v57 = vadd.f32 %v3517_v5, %v3165_v33  ;;  %v8993_v36 = vadd.f32 %v3554_v7, %v10520_v41  ;;  %3802 = vmatprep.mubr.bf16.mxu0 %v7066_v3  ;;  %v7064_v5 = vld [vmem:[%s10395_s1 + $0x588] ss:$28 sps:$4 sm:$0xff]  }
 0x21e   : > { %v8996_v49 = vadd.f32 %v3834_v19, %v8902_v42  ;;  %4115 = vmatprep.mubr.bf16.mxu1 %v10457_v23  ;;  %v3556_v12 = vpop.f32.mrf.mxu0  ;;  %v7067_v19 = vld [vmem:[%s10395_s1 + $0x4b0] ss:$28 sps:$4 sm:$0xff]   ;;  %v10524_v42 = vld [vmem:[#allocation9_spill] sm:$0xff] }
 0x21f   : > { %v3836_v2 = vpop.f32.mrf.mxu1  ;;  %v9000_v6 = vadd.f32 %v3556_v12, %v10522_v4  ;;  %v7070_v4 = vld [vmem:[%s10395_s1 + $0x5c4] ss:$28 sps:$4 sm:$0xff]  }
 0x220   : > { %10521 = vst [vmem:[#allocation5_spill] sm:$0xff] %v8996_v49  ;;  %v9003_v22 = vadd.f32 %v3836_v2, %v8911_v29  ;;  %v3558_v11 = vpop.f32.mrf.mxu0 }
 0x221   : > { %v3838_v10 = vpop.f32.mrf.mxu1  ;;  %v9012_v3 = vadd.f32 %v3558_v11, %v10524_v42  ;;  %v10527_v11 = vld [vmem:[#allocation11_spill] sm:$0xff] }
 0x222   : > { %10523 = vst [vmem:[#allocation6_spill] sm:$0xff] %v9003_v22  ;;  %v9015_v33 = vadd.f32 %v3838_v10, %v8917_v63  ;;  %v9020_v29 = vpop.f32.mrf.mxu0  ;;  %v10529_v22 = vld [vmem:[#allocation12_spill] sm:$0xff] }
 0x223   : > { %v3840_v7 = vpop.f32.mrf.mxu1 }
 0x224   : > { %10525 = vst [vmem:[#allocation7_spill] sm:$0xff] %v9015_v33  ;;  %v9023_v41 = vadd.f32 %v3840_v7, %v8921_v46  ;;  %v3564_v12 = vpop.f32.mrf.mxu0  ;;  %3803 = vmatmul.mubr.bf16.gmra.mxu0 %v7064_v5 }
 0x225   : > { %v3844_v2 = vpop.f32.mrf.mxu1  ;;  %6380 = vmatmul.mubr.msk.bf16.gmra.mxu1 %vm2717_vm0, %v7067_v19  ;;  %v9027_v42 = vadd.f32 %v3564_v12, %v10527_v11  ;;  %3812 = vmatprep.mubr.bf16.mxu0 %v7070_v4  ;;  %v7068_v19 = vld [vmem:[%s10395_s1 + $0x5c0] ss:$28 sps:$4 sm:$0xff]  }
 0x226   : > { %10526 = vst [vmem:[#allocation8_spill] sm:$0xff] %v9023_v41  ;;  %v9030_v63 = vadd.f32 %v3844_v2, %v8925_v52  ;;  %4125 = vmatprep.mubr.bf16.mxu1 %v10457_v23  ;;  %v3566_v10 = vpop.f32.mrf.mxu0  ;;  %v7071_v52 = vld [vmem:[%s10395_s1 + $0x4e8] ss:$28 sps:$4 sm:$0xff]  }
 0x227   : > { %v3846_v33 = vpop.f32.mrf.mxu1  ;;  %v9034_v49 = vadd.f32 %v3566_v10, %v10529_v22  ;;  %v10531_v4 = vld [vmem:[#allocation13_spill] sm:$0xff] }
 0x228   : > { %10528 = vst [vmem:[#allocation9_spill] sm:$0xff] %v9030_v63  ;;  %v9037_v46 = vadd.f32 %v3846_v33, %v8934_v15  ;;  %v3568_v5 = vpop.f32.mrf.mxu0  ;;  %v7074_v15 = vld [vmem:[%s10395_s1 + $0x5fc] ss:$28 sps:$4 sm:$0xff]  }
 0x229   : > { %v3848_v7 = vpop.f32.mrf.mxu1  ;;  %v9046_v12 = vadd.f32 %v3568_v5, %v10531_v4  ;;  %v10534_v5 = vld [vmem:[#allocation15_spill] sm:$0xff] }
 0x22a   : > { %10530 = vst [vmem:[#allocation11_spill] sm:$0xff] %v9037_v46  ;;  %v9049_v2 = vadd.f32 %v3848_v7, %v8940_v21  ;;  %v9054_v22 = vpop.f32.mrf.mxu0 }
 0x22b   : > { %v3850_v33 = vpop.f32.mrf.mxu1 }
 0x22c   : > { %10532 = vst [vmem:[#allocation12_spill] sm:$0xff] %v9049_v2  ;;  %v9057_v11 = vadd.f32 %v3850_v33, %v8944_v50  ;;  %v3574_v10 = vpop.f32.mrf.mxu0  ;;  %3813 = vmatmul.mubr.bf16.gmra.mxu0 %v7068_v19 }
 0x22d   : > { %v3854_v46 = vpop.f32.mrf.mxu1  ;;  %6381 = vmatmul.mubr.msk.bf16.gmra.mxu1 %vm2717_vm0, %v7071_v52  ;;  %v9061_v4 = vadd.f32 %v3574_v10, %v10534_v5  ;;  %3822 = vmatprep.mubr.bf16.mxu0 %v7074_v15  ;;  %v7072_v52 = vld [vmem:[%s10395_s1 + $0x5f8] ss:$28 sps:$4 sm:$0xff]  }
 0x22e   : > { %10533 = vst [vmem:[#allocation13_spill] sm:$0xff] %v9057_v11  ;;  %v9064_v21 = vadd.f32 %v3854_v46, %v8948_v38  ;;  %4135 = vmatprep.mubr.bf16.mxu1 %v10457_v23  ;;  %v9067_v7 = vpop.f32.mrf.mxu0  ;;  %v7075_v38 = vld [vmem:[%s10395_s1 + $0x520] ss:$28 sps:$4 sm:$0xff]  }
 0x22f   : > { %v3856_v2 = vpop.f32.mrf.mxu1 }
 0x230   : > { %10535 = vst [vmem:[#allocation15_spill] sm:$0xff] %v9064_v21  ;;  %v9070_v50 = vadd.f32 %v3856_v2, %v8957_v28  ;;  %v9072_v33 = vpop.f32.mrf.mxu0 }
 0x231   : > { %v3858_v19 = vpop.f32.mrf.mxu1 }
 0x232   : > { %10536 = vst [vmem:[#allocation102_spill] sm:$0xff] %v9070_v50  ;;  %v9081_v46 = vadd.f32 %v3858_v19, %v8963_v13  ;;  %v9083_v15 = vpop.f32.mrf.mxu0 }
 0x233   : > { %v3860_v10 = vpop.f32.mrf.mxu1 }
 0x234   : > { %10537 = vst [vmem:[#allocation103_spill] sm:$0xff] %v9081_v46  ;;  %v9086_v28 = vadd.f32 %v3860_v10, %v8967_v40  ;;  %v9088_v2 = vpop.f32.mrf.mxu0  ;;  %3823 = vmatmul.mubr.bf16.gmra.mxu0 %v7072_v52  ;;  %v7076_v52 = vld [vmem:[%s10395_s1 + $0x558] ss:$28 sps:$4 sm:$0xff]  }
 0x235   : > { %v3864_v5 = vpop.f32.mrf.mxu1  ;;  %6382 = vmatmul.mubr.msk.bf16.gmra.mxu1 %vm2717_vm0, %v7075_v38 }
 0x236   : > { %10538 = vst [vmem:[#allocation104_spill] sm:$0xff] %v9086_v28  ;;  %v9092_v50 = vadd.f32 %v3864_v5, %v8971_v26  ;;  %4145 = vmatprep.mubr.bf16.mxu1 %v10457_v23  ;;  %v9095_v21 = vpop.f32.mrf.mxu0 }
 0x237   : > { %v3866_v13 = vpop.f32.mrf.mxu1 }
 0x238   : > { %10539 = vst [vmem:[#allocation105_spill] sm:$0xff] %v9092_v50  ;;  %v9098_v19 = vadd.f32 %v3866_v13, %v8980_v27  ;;  %v9100_v46 = vpop.f32.mrf.mxu0 }
 0x239   : > { %v3868_v40 = vpop.f32.mrf.mxu1 }
 0x23a   : > { %10540 = vst [vmem:[#allocation106_spill] sm:$0xff] %v9098_v19  ;;  %v9106_v38 = vadd.f32 %v3868_v40, %v8986_v58  ;;  %v9108_v26 = vpop.f32.mrf.mxu0 }
 0x23b   : > { %v3870_v10 = vpop.f32.mrf.mxu1 }
 0x23c   : > { %10541 = vst [vmem:[#allocation107_spill] sm:$0xff] %v9106_v38  ;;  %v9111_v5 = vadd.f32 %v3870_v10, %v8990_v57  ;;  %v9113_v50 = vpop.f32.mrf.mxu0  ;;  %v7077_v57 = vld [vmem:[%s10395_s1 + $0x590] ss:$28 sps:$4 sm:$0xff]  }
 0x23d   : > { %v3907_v27 = vpop.f32.mrf.mxu1  ;;  %6383 = vmatmul.mubr.msk.bf16.gmra.mxu1 %vm2717_vm0, %v7076_v52  ;;  %v10543_v10 = vld [vmem:[#allocation10_spill] sm:$0xff] }
 0x23e   : > { %10542 = vst [vmem:[#allocation108_spill] sm:$0xff] %v9111_v5  ;;  %v3908_v13 = vadd.f32 %v3907_v27, %v8993_v36  ;;  %4155 = vmatprep.mubr.bf16.mxu1 %v10457_v23  ;;  %v9118_v19 = vpop.f32.mrf.mxu0  ;;  %v3561_v5 = vadd.f32 %v9020_v29, %v10543_v10 }
 0x23f   : > { %v3909_v28 = vpop.f32.mrf.mxu1 }
 0x240   : > { %v3910_v58 = vadd.f32 %v3909_v28, %v9000_v6  ;;  %v9121_v40 = vpop.f32.mrf.mxu0  ;;  %v4226_v11 = vmax.f32 %v3908_v13, 0.0 }
 0x241   : > { %v3911_v38 = vpop.f32.mrf.mxu1 }
 0x242   : > { %v3912_v52 = vadd.f32 %v3911_v38, %v9012_v3  ;;  %v9129_v36 = vpop.f32.mrf.mxu0  ;;  %v4227_v28 = vmax.f32 %v3910_v58, 0.0 }
 0x243   : > { %v3913_v27 = vpop.f32.mrf.mxu1 }
 0x244   : > { %v4228_v63 = vmax.f32 %v3912_v52, 0.0  ;;  %v3914_v41 = vadd.f32 %v3913_v27, %v3561_v5  ;;  %v9131_v34 = vpop.f32.mrf.mxu0 }
 0x245   : > { %v3917_v6 = vpop.f32.mrf.mxu1  ;;  %6384 = vmatmul.mubr.msk.bf16.gmra.mxu1 %vm2717_vm0, %v7077_v57 }
 0x246   : > { %v9134_v0 = vpack.c.bf16 %v4228_v63, %v4226_v11  ;;  %v4229_v43 = vmax.f32 %v3914_v41, 0.0  ;;  %v3918_v54 = vadd.f32 %v3917_v6, %v9027_v42  ;;  %4165 = vmatprep.mubr.bf16.mxu1 %v10457_v23  ;;  %v9138_v3 = vpop.f32.mrf.mxu0  ;;  %v7078_v63 = vld [vmem:[%s10395_s1 + $0x5c8] ss:$28 sps:$4 sm:$0xff]  }
 0x247   : > { %v3919_v29 = vpop.f32.mrf.mxu1  ;;  %v10544_v11 = vld [vmem:[#allocation14_spill] sm:$0xff] }
 0x248   : > { %v3920_v38 = vadd.f32 %v3919_v29, %v9034_v49  ;;  %v9141_v13 = vpack.c.bf16 %v4229_v43, %v4227_v28  ;;  %v9143_v5 = vpop.f32.mrf.mxu0  ;;  %v3571_v41 = vadd.f32 %v9054_v22, %v10544_v11  ;;  %v4230_v52 = vmax.f32 %v3918_v54, 0.0  ;;  %v10546_v11 = vld [vmem:[#allocation17_spill] sm:$0xff] }
 0x249   : > { %v3921_v10 = vpop.f32.mrf.mxu1 }
 0x24a   : > { %v3922_v42 = vadd.f32 %v3921_v10, %v9046_v12  ;;  %v9151_v58 = vpop.f32.mrf.mxu0  ;;  %v4231_v28 = vmax.f32 %v3920_v38, 0.0  ;;  %v10545_v10 = vld [vmem:[#allocation16_spill] sm:$0xff] }
 0x24b   : > { %v3923_v57 = vpop.f32.mrf.mxu1  ;;  %v3577_v54 = vadd.f32 %v9067_v7, %v10545_v10 }
 0x24c   : > { %v4232_v27 = vmax.f32 %v3922_v42, 0.0  ;;  %v3924_v49 = vadd.f32 %v3923_v57, %v3571_v41  ;;  %v9153_v43 = vpop.f32.mrf.mxu0  ;;  %v3579_v41 = vadd.f32 %v9072_v33, %v10546_v11  ;;  %v10547_v57 = vld [vmem:[#allocation18_spill] sm:$0xff]  ;;  %v10548_v11 = vld [vmem:[#allocation19_spill] sm:$0xff] }
 0x24d   : > { %v3927_v6 = vpop.f32.mrf.mxu1  ;;  %6385 = vmatmul.mubr.msk.bf16.gmra.mxu1 %vm2717_vm0, %v7078_v63  ;;  %v3585_v45 = vadd.f32 %v9088_v2, %v10548_v11 }
 0x24e   : > { %v9156_v29 = vpack.c.bf16 %v4232_v27, %v4230_v52  ;;  %v4233_v61 = vmax.f32 %v3924_v49, 0.0  ;;  %v3928_v32 = vadd.f32 %v3927_v6, %v9061_v4  ;;  %4175 = vmatprep.mubr.bf16.mxu1 %v10457_v23  ;;  %v9160_v12 = vpop.f32.mrf.mxu0  ;;  %v7079_v4 = vld [vmem:[%s10395_s1 + $0x600] ss:$28 sps:$4 sm:$0xff]   ;;  %v3581_v52 = vadd.f32 %v9083_v15, %v10547_v57 }
 0x24f   : > { %v3929_v22 = vpop.f32.mrf.mxu1 }
 0x250   : > { %v9166_v42 = vpack.c.bf16 %v4233_v61, %v4231_v28  ;;  %v9168_v63 = vpop.f32.mrf.mxu0  ;;  %v3930_v27 = vadd.f32 %v3929_v22, %v3577_v54  ;;  %v4234_v10 = vmax.f32 %v3928_v32, 0.0  ;;  %v10549_v32 = vld [vmem:[#allocation20_spill] sm:$0xff] }
 0x251   : > { %v3931_v38 = vpop.f32.mrf.mxu1 }
 0x252   : > { %v3932_v49 = vadd.f32 %v3931_v38, %v3579_v41  ;;  %v9175_v6 = vpop.f32.mrf.mxu0  ;;  %v4235_v1 = vmax.f32 %v3930_v27, 0.0  ;;  %v3587_v41 = vadd.f32 %v9095_v21, %v10549_v32  ;;  %v10550_v38 = vld [vmem:[#allocation21_spill] sm:$0xff]  ;;  %v10551_v27 = vld [vmem:[#allocation22_spill] sm:$0xff] }
 0x253   : > { %v3933_v7 = vpop.f32.mrf.mxu1  ;;  %v3589_v57 = vadd.f32 %v9100_v46, %v10550_v38 }
 0x254   : > { %v4236_v39 = vmax.f32 %v3932_v49, 0.0  ;;  %v3934_v33 = vadd.f32 %v3933_v7, %v3581_v52  ;;  %v9177_v61 = vpop.f32.mrf.mxu0  ;;  %v3591_v7 = vadd.f32 %v9108_v26, %v10551_v27 }
 0x255   : > { %v3937_v28 = vpop.f32.mrf.mxu1  ;;  %6386 = vmatmul.mubr.msk.bf16.gmra.mxu1 %vm2717_vm0, %v7079_v4 }
 0x256   : > { %v9182_v51 = vpack.c.bf16 %v4236_v39, %v4234_v10  ;;  %v4237_v15 = vmax.f32 %v3934_v33, 0.0  ;;  %4185 = vmatprep.mubr.bf16.mxu1 %v10457_v23  ;;  %v9185_v22 = vpop.f32.mrf.mxu0  ;;  %v3938_v52 = vadd.f32 %v3937_v28, %v3585_v45  ;;  %v7080_v39 = vld [vmem:[%s10395_s1 + $0x638] ss:$28 sps:$4 sm:$0xff]  }
 0x257   : > { %v3939_v54 = vpop.f32.mrf.mxu1 }
 0x258   : > { %v9191_v4 = vpack.c.bf16 %v4237_v15, %v4235_v1  ;;  %v9193_v49 = vpop.f32.mrf.mxu0  ;;  %v3940_v10 = vadd.f32 %v3939_v54, %v3587_v41  ;;  %v4238_v32 = vmax.f32 %v3938_v52, 0.0  ;;  %v10552_v1 = vld [vmem:[#allocation23_spill] sm:$0xff]  ;;  %v10553_v54 = vld [vmem:[#allocation24_spill] sm:$0xff] }
 0x259   : > { %v3941_v2 = vpop.f32.mrf.mxu1  ;;  %v3595_v28 = vadd.f32 %v9113_v50, %v10552_v1  ;;  %v3597_v41 = vadd.f32 %v9118_v19, %v10553_v54  ;;  %v7086_v50 = vld [vmem:[%s10397_s3 + $0x4] ss:$16 sps:$4 sm:$0xff]   ;;  %v7081_v19 = vld [vmem:[%s10395_s1 + $0x670] ss:$28 sps:$4 sm:$0xff]  }
 0x25a   : > { %v3942_v33 = vadd.f32 %v3941_v2, %v3589_v57  ;;  %v9200_v11 = vpop.f32.mrf.mxu0  ;;  %v4239_v24 = vmax.f32 %v3940_v10, 0.0  ;;  %v10554_v2 = vld [vmem:[#allocation25_spill] sm:$0xff]  ;;  %5026 = vmatprep.mubr.bf16.mxu0 %v7086_v50  ;;  %v10557_v54 = vld [vmem:[#allocation27_spill] sm:$0xff] }
 0x25b   : > { %v3943_v21 = vpop.f32.mrf.mxu1 }
 0x25c   : > { %v4240_v46 = vmax.f32 %v3942_v33, 0.0  ;;  %v3944_v45 = vadd.f32 %v3943_v21, %v3591_v7  ;;  %v3634_v15 = vpop.f32.mrf.mxu0  ;;  %v10555_v7 = vld [vmem:[#allocation39_spill] sm:$0xff] }
 0x25d   : > { %v3947_v38 = vpop.f32.mrf.mxu1  ;;  %6387 = vmatmul.mubr.msk.bf16.gmra.mxu1 %vm2717_vm0, %v7080_v39  ;;  %v9208_v26 = vadd.f32 %v3634_v15, %v8296_v14  ;;  %v3599_v39 = vadd.f32 %v9121_v40, %v10554_v2 }
 0x25e   : > { %v9205_v9 = vpack.c.bf16 %v4240_v46, %v4238_v32  ;;  %v4241_v20 = vmax.f32 %v3944_v45, 0.0  ;;  %4195 = vmatprep.mubr.bf16.mxu1 %v10457_v23  ;;  %v3636_v57 = vpop.f32.mrf.mxu0  ;;  %v3948_v27 = vadd.f32 %v3947_v38, %v3595_v28  ;;  %v10556_v32 = vld [vmem:[#allocation26_spill] sm:$0xff] }
 0x25f   : > { %v3949_v52 = vpop.f32.mrf.mxu1  ;;  %v9219_v10 = vadd.f32 %v3636_v57, %v10555_v7  ;;  %v3601_v46 = vadd.f32 %v9129_v36, %v10556_v32  ;;  %v3605_v57 = vadd.f32 %v9131_v34, %v10557_v54 }
 0x260   : > { %v9221_v14 = vpack.c.bf16 %v4241_v20, %v4239_v24  ;;  %v3638_v33 = vpop.f32.mrf.mxu0  ;;  %v3950_v45 = vadd.f32 %v3949_v52, %v3597_v41  ;;  %v4242_v20 = vmax.f32 %v3948_v27, 0.0  ;;  %v10558_v52 = vld [vmem:[#allocation28_spill] sm:$0xff] }
 0x261   : > { %v3951_v21 = vpop.f32.mrf.mxu1  ;;  %v9229_v1 = vadd.f32 %v3638_v33, %v8314_v56 }
 0x262   : > { %v3952_v40 = vadd.f32 %v3951_v21, %v3599_v39  ;;  %v9231_v28 = vpop.f32.mrf.mxu0  ;;  %v4243_v50 = vmax.f32 %v3950_v45, 0.0  ;;  %v3607_v39 = vadd.f32 %v9138_v3, %v10558_v52  ;;  %v10559_v21 = vld [vmem:[#allocation29_spill] sm:$0xff] }
 0x263   : > { %v3953_v15 = vpop.f32.mrf.mxu1  ;;  %v3609_v34 = vadd.f32 %v9143_v5, %v10559_v21 }
 0x264   : > { %v4244_v24 = vmax.f32 %v3952_v40, 0.0  ;;  %v3954_v38 = vadd.f32 %v3953_v15, %v3601_v46  ;;  %v3644_v2 = vpop.f32.mrf.mxu0  ;;  %v10560_v46 = vld [vmem:[#allocation41_spill] sm:$0xff] }
 0x265   : > { %v3957_v7 = vpop.f32.mrf.mxu1  ;;  %6388 = vmatmul.mubr.msk.bf16.gmra.mxu1 %vm2717_vm0, %v7081_v19  ;;  %v9239_v56 = vadd.f32 %v3644_v2, %v8321_v47  ;;  %v7082_v47 = vld [vmem:[%s10395_s1 + $0x6a8] ss:$28 sps:$4 sm:$0xff]  }
 0x266   : > { %v9236_v36 = vpack.c.bf16 %v4244_v24, %v4242_v20  ;;  %v4245_v41 = vmax.f32 %v3954_v38, 0.0  ;;  %4205 = vmatprep.mubr.bf16.mxu1 %v10457_v23  ;;  %v3646_v27 = vpop.f32.mrf.mxu0  ;;  %v3958_v32 = vadd.f32 %v3957_v7, %v3605_v57  ;;  %v10561_v20 = vld [vmem:[#allocation30_spill] sm:$0xff] }
 0x267   : > { %v3959_v33 = vpop.f32.mrf.mxu1  ;;  %v9247_v19 = vadd.f32 %v3646_v27, %v10560_v46  ;;  %v3611_v3 = vadd.f32 %v9151_v58, %v10561_v20 }
 0x268   : > { %v9249_v45 = vpack.c.bf16 %v4245_v41, %v4243_v50  ;;  %v3648_v40 = vpop.f32.mrf.mxu0  ;;  %v3960_v24 = vadd.f32 %v3959_v33, %v3607_v39  ;;  %v4246_v2 = vmax.f32 %v3958_v32, 0.0  ;;  %v10562_v41 = vld [vmem:[#allocation31_spill] sm:$0xff]  ;;  %v10563_v32 = vld [vmem:[#allocation32_spill] sm:$0xff] }
 0x269   : > { %v3961_v15 = vpop.f32.mrf.mxu1  ;;  %v9257_v38 = vadd.f32 %v3648_v40, %v8341_v31  ;;  %v3615_v52 = vadd.f32 %v9153_v43, %v10562_v41  ;;  %v3617_v40 = vadd.f32 %v9160_v12, %v10563_v32  ;;  %v10564_v43 = vld [vmem:[#allocation33_spill] sm:$0xff] }
 0x26a   : > { %v3962_v5 = vadd.f32 %v3961_v15, %v3609_v34  ;;  %v9259_v54 = vpop.f32.mrf.mxu0  ;;  %v4247_v46 = vmax.f32 %v3960_v24, 0.0  ;;  %v3619_v15 = vadd.f32 %v9168_v63, %v10564_v43 }
 0x26b   : > { %v3963_v57 = vpop.f32.mrf.mxu1 }
 0x26c   : > { %v4248_v7 = vmax.f32 %v3962_v5, 0.0  ;;  %v3964_v50 = vadd.f32 %v3963_v57, %v3611_v3  ;;  %v3654_v27 = vpop.f32.mrf.mxu0 }
 0x26d   : > { %v3967_v21 = vpop.f32.mrf.mxu1  ;;  %6389 = vmatmul.mubr.msk.bf16.gmra.mxu1 %vm2717_vm0, %v7082_v47  ;;  %v9267_v31 = vadd.f32 %v3654_v27, %v8349_v62  ;;  %v7083_v62 = vld [vmem:[%s10395_s1 + $0x6e0] ss:$28 sps:$4 sm:$0xff]  }
 0x26e   : > { %v9264_v58 = vpack.c.bf16 %v4248_v7, %v4246_v2  ;;  %v4249_v39 = vmax.f32 %v3964_v50, 0.0  ;;  %4215 = vmatprep.mubr.bf16.mxu1 %v10457_v23  ;;  %v9270_v33 = vpop.f32.mrf.mxu0  ;;  %v3968_v20 = vadd.f32 %v3967_v21, %v3615_v52  ;;  %v10565_v23 = vld [vmem:[#allocation34_spill] sm:$0xff]  ;;  %v10566_v21 = vld [vmem:[#allocation35_spill] sm:$0xff] }
 0x26f   : > { %v3969_v34 = vpop.f32.mrf.mxu1  ;;  %v3621_v5 = vadd.f32 %v9175_v6, %v10565_v23 }
 0x270   : > { %v9276_v47 = vpack.c.bf16 %v4249_v39, %v4247_v46  ;;  %v9278_v3 = vpop.f32.mrf.mxu0  ;;  %v3970_v57 = vadd.f32 %v3969_v34, %v3617_v40  ;;  %v4250_v50 = vmax.f32 %v3968_v20, 0.0  ;;  %v3625_v46 = vadd.f32 %v9177_v61, %v10566_v21  ;;  %v10567_v40 = vld [vmem:[#allocation36_spill] sm:$0xff]  ;;  %v10568_v20 = vld [vmem:[#allocation37_spill] sm:$0xff] }
 0x271   : > { %v3971_v24 = vpop.f32.mrf.mxu1 }
 0x272   : > { %v3972_v2 = vadd.f32 %v3971_v24, %v3619_v15  ;;  %v9285_v7 = vpop.f32.mrf.mxu0  ;;  %v4251_v39 = vmax.f32 %v3970_v57, 0.0  ;;  %v3627_v15 = vadd.f32 %v9185_v22, %v10567_v40  ;;  %v3629_v24 = vadd.f32 %v9193_v49, %v10568_v20 }
 0x273   : > { %v3973_v12 = vpop.f32.mrf.mxu1 }
 0x274   : > { %v4252_v63 = vmax.f32 %v3972_v2, 0.0  ;;  %v3974_v41 = vadd.f32 %v3973_v12, %v3621_v5  ;;  %v9287_v52 = vpop.f32.mrf.mxu0  ;;  %v10569_v12 = vld [vmem:[#allocation38_spill] sm:$0xff] }
 0x275   : > { %v3977_v27 = vpop.f32.mrf.mxu1  ;;  %6390 = vmatmul.mubr.msk.bf16.gmra.mxu1 %vm2717_vm0, %v7083_v62  ;;  %v3631_v61 = vadd.f32 %v9200_v11, %v10569_v12 }
 0x276   : > { %v4366_v32 = vpack.c.bf16 %v4252_v63, %v4250_v50  ;;  %v4253_v43 = vmax.f32 %v3974_v41, 0.0  ;;  %v9292_v6 = vpop.f32.mrf.mxu0  ;;  %v3978_v23 = vadd.f32 %v3977_v27, %v3625_v46 }
 0x277   : > { %v3979_v34 = vpop.f32.mrf.mxu1 }
 0x278   : > { %v4367_v5 = vpack.c.bf16 %v4253_v43, %v4251_v39  ;;  %v9298_v2 = vpop.f32.mrf.mxu0  ;;  %v3980_v57 = vadd.f32 %v3979_v34, %v3627_v15  ;;  %v4254_v21 = vmax.f32 %v3978_v23, 0.0  ;;  %v10570_v23 = vld [vmem:[#allocation40_spill] sm:$0xff] }
 0x279   : > { %v3981_v62 = vpop.f32.mrf.mxu1 }
 0x27a   : > { %v3982_v50 = vadd.f32 %v3981_v62, %v3629_v24  ;;  %v9302_v63 = vpop.f32.mrf.mxu0  ;;  %v4255_v49 = vmax.f32 %v3980_v57, 0.0  ;;  %v3641_v62 = vadd.f32 %v9231_v28, %v10570_v23 }
 0x27b   : > { %v3983_v41 = vpop.f32.mrf.mxu1 }
 0x27c   : > { %v4256_v18 = vmax.f32 %v3982_v50, 0.0  ;;  %v3984_v37 = vadd.f32 %v3983_v41, %v3631_v61  ;;  %v9304_v22 = vpop.f32.mrf.mxu0 }
 0x27d   : > { %v3987_v40 = vpop.f32.mrf.mxu1 }
 0x27e   : > { %v4368_v27 = vpack.c.bf16 %v4256_v18, %v4254_v21  ;;  %v4257_v46 = vmax.f32 %v3984_v37, 0.0  ;;  %v3988_v39 = vadd.f32 %v3987_v40, %v9208_v26  ;;  %v9307_v43 = vpop.f32.mrf.mxu0 }
 0x27f   : > { %v3989_v20 = vpop.f32.mrf.mxu1 }
 0x280   : > { %v3990_v11 = vadd.f32 %v3989_v20, %v9219_v10  ;;  %v4369_v34 = vpack.c.bf16 %v4257_v46, %v4255_v49  ;;  %v9310_v15 = vpop.f32.mrf.mxu0  ;;  %v4258_v18 = vmax.f32 %v3988_v39, 0.0  ;;  %v3651_v20 = vadd.f32 %v9259_v54, %v8345_v17 }
 0x281   : > { %v3991_v24 = vpop.f32.mrf.mxu1 }
 0x282   : > { %v3992_v12 = vadd.f32 %v3991_v24, %v9229_v1  ;;  %4994 = vmatprep.subr.bf16.mxu0 %v4369_v34  ;;  %v9315_v61 = vpop.f32.mrf.mxu0  ;;  %v4259_v41 = vmax.f32 %v3990_v11, 0.0 }
 0x283   : > { %v3993_v37 = vpop.f32.mrf.mxu1  ;;  %4995 = vmatpush1.bf16.msra.mxu0 %v4368_v27 }
 0x284   : > { %v4260_v26 = vmax.f32 %v3992_v12, 0.0  ;;  %v3994_v57 = vadd.f32 %v3993_v37, %v3641_v62  ;;  %4996 = vmatprep.subr.bf16.mxu0 %v4367_v5  ;;  %v9317_v50 = vpop.f32.mrf.mxu0 }
 0x285   : > { %v3997_v10 = vpop.f32.mrf.mxu1 }
 0x286   : > { %v9319_v21 = vpack.c.bf16 %v4260_v26, %v4258_v18  ;;  %v4261_v40 = vmax.f32 %v3994_v57, 0.0  ;;  %v3998_v28 = vadd.f32 %v3997_v10, %v9239_v56  ;;  %v9322_v49 = vpop.f32.mrf.mxu0 }
 0x287   : > { %v3999_v1 = vpop.f32.mrf.mxu1  ;;  %4997 = vmatpush1.bf16.msra.mxu0 %v4366_v32 }
 0x288   : > { %v4000_v46 = vadd.f32 %v3999_v1, %v9247_v19  ;;  %4998 = vmatprep.subr.bf16.mxu0 %v9276_v47  ;;  %v9326_v27 = vpack.c.bf16 %v4261_v40, %v4259_v41  ;;  %v9328_v5 = vpop.f32.mrf.mxu0  ;;  %v4262_v32 = vmax.f32 %v3998_v28, 0.0  ;;  %v3665_v28 = vadd.f32 %v9287_v52, %v8371_v44 }
 0x289   : > { %v4001_v39 = vpop.f32.mrf.mxu1 }
 0x28a   : > { %v4002_v11 = vadd.f32 %v4001_v39, %v9257_v38  ;;  %v9333_v34 = vpop.f32.mrf.mxu0  ;;  %v4263_v62 = vmax.f32 %v4000_v46, 0.0 }
 0x28b   : > { %v4003_v56 = vpop.f32.mrf.mxu1  ;;  %4999 = vmatpush1.bf16.msra.mxu0 %v9264_v58  ;;  %v3657_v58 = vadd.f32 %v9270_v33, %v8358_v60 }
 0x28c   : > { %v4264_v24 = vmax.f32 %v4002_v11, 0.0  ;;  %v4004_v19 = vadd.f32 %v4003_v56, %v3651_v20  ;;  %5000 = vmatprep.subr.bf16.mxu0 %v9249_v45  ;;  %v9337_v47 = vpop.f32.mrf.mxu0  ;;  %v3659_v45 = vadd.f32 %v9278_v3, %v8364_v8  ;;  %v10571_v20 = vld [vmem:[#allocation42_spill] sm:$0xff] }
 0x28d   : > { %v4007_v23 = vpop.f32.mrf.mxu1 }
 0x28e   : > { %v9339_v12 = vpack.c.bf16 %v4264_v24, %v4262_v32  ;;  %v4265_v37 = vmax.f32 %v4004_v19, 0.0  ;;  %v4008_v17 = vadd.f32 %v4007_v23, %v9267_v31  ;;  %v9342_v38 = vpop.f32.mrf.mxu0  ;;  %v3661_v31 = vadd.f32 %v9285_v7, %v8367_v16  ;;  %v10572_v32 = vld [vmem:[#allocation43_spill] sm:$0xff] }
 0x28f   : > { %v4009_v54 = vpop.f32.mrf.mxu1  ;;  %5001 = vmatpush1.bf16.msra.mxu0 %v9236_v36  ;;  %v3671_v24 = vadd.f32 %v9302_v63, %v10572_v32 }
 0x290   : > { %5002 = vmatprep.subr.bf16.mxu0 %v9221_v14  ;;  %v9350_v18 = vpack.c.bf16 %v4265_v37, %v4263_v62  ;;  %v9352_v26 = vpop.f32.mrf.mxu0  ;;  %v4010_v10 = vadd.f32 %v4009_v54, %v3657_v58  ;;  %v4266_v60 = vmax.f32 %v4008_v17, 0.0 }
 0x291   : > { %v4011_v57 = vpop.f32.mrf.mxu1 }
 0x292   : > { %v4012_v41 = vadd.f32 %v4011_v57, %v3659_v45  ;;  %v9356_v40 = vpop.f32.mrf.mxu0  ;;  %v4267_v1 = vmax.f32 %v4010_v10, 0.0 }
 0x293   : > { %v4013_v36 = vpop.f32.mrf.mxu1  ;;  %5003 = vmatpush1.bf16.msra.mxu0 %v9205_v9  ;;  %v3667_v9 = vadd.f32 %v9292_v6, %v8380_v30 }
 0x294   : > { %v4268_v33 = vmax.f32 %v4012_v41, 0.0  ;;  %v4014_v8 = vadd.f32 %v4013_v36, %v3661_v31  ;;  %5004 = vmatprep.subr.bf16.mxu0 %v9191_v4  ;;  %v9360_v14 = vpop.f32.mrf.mxu0  ;;  %v3669_v4 = vadd.f32 %v9298_v2, %v10571_v20 }
 0x295   : > { %v4017_v3 = vpop.f32.mrf.mxu1 }
 0x296   : > { %v9364_v16 = vpack.c.bf16 %v4268_v33, %v4266_v60  ;;  %v4269_v7 = vmax.f32 %v4014_v8, 0.0  ;;  %v9366_v46 = vpop.f32.mrf.mxu0  ;;  %v4018_v11 = vadd.f32 %v4017_v3, %v3665_v28 }
 0x297   : > { %v4019_v39 = vpop.f32.mrf.mxu1  ;;  %5005 = vmatpush1.bf16.msra.mxu0 %v9182_v51 }
 0x298   : > { %5006 = vmatprep.subr.bf16.mxu0 %v9166_v42  ;;  %v9374_v56 = vpack.c.bf16 %v4269_v7, %v4267_v1  ;;  %v9376_v44 = vpop.f32.mrf.mxu0  ;;  %v4020_v19 = vadd.f32 %v4019_v39, %v3667_v9  ;;  %v4270_v30 = vmax.f32 %v4018_v11, 0.0  ;;  %v10573_v42 = vld [vmem:[#allocation44_spill] sm:$0xff] }
 0x299   : > { %v4021_v52 = vpop.f32.mrf.mxu1  ;;  %v3675_v37 = vadd.f32 %v9304_v22, %v10573_v42 }
 0x29a   : > { %v4022_v23 = vadd.f32 %v4021_v52, %v3669_v4  ;;  %v9380_v51 = vpop.f32.mrf.mxu0  ;;  %v4271_v58 = vmax.f32 %v4020_v19, 0.0  ;;  %v10577_v19 = vld [vmem:[#allocation48_spill] sm:$0xff] }
 0x29b   : > { %v4023_v62 = vpop.f32.mrf.mxu1  ;;  %5007 = vmatpush1.bf16.msra.mxu0 %v9156_v29  ;;  %v3677_v29 = vadd.f32 %v9307_v43, %v8415_v53 }
 0x29c   : > { %v4272_v6 = vmax.f32 %v4022_v23, 0.0  ;;  %v4024_v2 = vadd.f32 %v4023_v62, %v3671_v24  ;;  %5008 = vmatprep.subr.bf16.mxu0 %v9141_v13  ;;  %v3714_v17 = vpop.f32.mrf.mxu0  ;;  %v3679_v13 = vadd.f32 %v9310_v15, %v8421_v48  ;;  %v3689_v23 = vadd.f32 %v9328_v5, %v10577_v19 }
 0x29d   : > { %v4027_v54 = vpop.f32.mrf.mxu1  ;;  %v9389_v57 = vadd.f32 %v3714_v17, %v8540_v25  ;;  %v10574_v25 = vld [vmem:[#allocation45_spill] sm:$0xff] }
 0x29e   : > { %v9386_v45 = vpack.c.bf16 %v4272_v6, %v4270_v30  ;;  %v4273_v63 = vmax.f32 %v4024_v2, 0.0  ;;  %v3716_v31 = vpop.f32.mrf.mxu0  ;;  %v4028_v22 = vadd.f32 %v4027_v54, %v3675_v37  ;;  %v3681_v8 = vadd.f32 %v9315_v61, %v10574_v25  ;;  %v10578_v30 = vld [vmem:[#allocation59_spill] sm:$0xff]  ;;  %v10579_v37 = vld [vmem:[#allocation49_spill] sm:$0xff]  ;;  %v10580_v54 = vld [vmem:[#allocation60_spill] sm:$0xff] }
 0x29f   : > { %v4029_v10 = vpop.f32.mrf.mxu1  ;;  %5009 = vmatpush1.bf16.msra.mxu0 %v9134_v0  ;;  %v9397_v41 = vadd.f32 %v3716_v31, %v8555_v35  ;;  %v10575_v35 = vld [vmem:[#allocation46_spill] sm:$0xff] }
 0x2a0   : > { %v9399_v36 = vpack.c.bf16 %v4273_v63, %v4271_v58  ;;  %v3718_v60 = vpop.f32.mrf.mxu0  ;;  %v4030_v3 = vadd.f32 %v4029_v10, %v3677_v29  ;;  %v4274_v48 = vmax.f32 %v4028_v22, 0.0  ;;  %v3685_v7 = vadd.f32 %v9317_v50, %v10575_v35  ;;  %v10584_v35 = vld [vmem:[#allocation52_spill] sm:$0xff] }
 0x2a1   : > { %v4031_v33 = vpop.f32.mrf.mxu1  ;;  %v9404_v53 = vadd.f32 %v3718_v60, %v8561_v59  ;;  %v10576_v59 = vld [vmem:[#allocation47_spill] sm:$0xff] }
 0x2a2   : > { %v4032_v43 = vadd.f32 %v4031_v33, %v3679_v13  ;;  %v9406_v0 = vpop.f32.mrf.mxu0  ;;  %v4275_v20 = vmax.f32 %v4030_v3, 0.0  ;;  %v3687_v52 = vadd.f32 %v9322_v49, %v10576_v59  ;;  %v10581_v13 = vld [vmem:[#allocation50_spill] sm:$0xff] }
 0x2a3   : > { %v4033_v28 = vpop.f32.mrf.mxu1  ;;  %v3695_v22 = vadd.f32 %v9337_v47, %v10581_v13  ;;  %v10582_v3 = vld [vmem:[#allocation62_spill] sm:$0xff] }
 0x2a4   : > { %v4276_v15 = vmax.f32 %v4032_v43, 0.0  ;;  %v4034_v1 = vadd.f32 %v4033_v28, %v3681_v8  ;;  %v3724_v39 = vpop.f32.mrf.mxu0 }
 0x2a5   : > { %v4037_v9 = vpop.f32.mrf.mxu1  ;;  %v9413_v11 = vadd.f32 %v3724_v39, %v8575_v55  ;;  %v3691_v55 = vadd.f32 %v9333_v34, %v10579_v37 }
 0x2a6   : > { %v9410_v4 = vpack.c.bf16 %v4276_v15, %v4274_v48  ;;  %v4277_v61 = vmax.f32 %v4034_v1, 0.0  ;;  %v3726_v32 = vpop.f32.mrf.mxu0  ;;  %v4038_v62 = vadd.f32 %v4037_v9, %v3685_v7  ;;  %v10583_v15 = vld [vmem:[#allocation51_spill] sm:$0xff]  ;;  %v3699_v7 = vadd.f32 %v9352_v26, %v10584_v35 }
 0x2a7   : > { %v4039_v24 = vpop.f32.mrf.mxu1  ;;  %v9420_v50 = vadd.f32 %v3726_v32, %v10578_v30  ;;  %v3697_v1 = vadd.f32 %v9342_v38, %v10583_v15 }
 0x2a8   : > { %v9422_v6 = vpack.c.bf16 %v4277_v61, %v4275_v20  ;;  %v3728_v2 = vpop.f32.mrf.mxu0  ;;  %v4040_v17 = vadd.f32 %v4039_v24, %v3687_v52  ;;  %v4278_v5 = vmax.f32 %v4038_v62, 0.0  ;;  %v10585_v61 = vld [vmem:[#allocation53_spill] sm:$0xff] }
 0x2a9   : > { %v4041_v42 = vpop.f32.mrf.mxu1  ;;  %v9427_v58 = vadd.f32 %v3728_v2, %v10580_v54  ;;  %v3701_v59 = vadd.f32 %v9356_v40, %v10585_v61  ;;  %v10586_v2 = vld [vmem:[#allocation54_spill] sm:$0xff] }
 0x2aa   : > { %v4042_v49 = vadd.f32 %v4041_v42, %v3689_v23  ;;  %v9429_v63 = vpop.f32.mrf.mxu0  ;;  %v4279_v25 = vmax.f32 %v4040_v17, 0.0  ;;  %v3705_v42 = vadd.f32 %v9360_v14, %v10586_v2 }
 0x2ab   : > { %v4043_v29 = vpop.f32.mrf.mxu1 }
 0x2ac   : > { %v4280_v31 = vmax.f32 %v4042_v49, 0.0  ;;  %v4044_v10 = vadd.f32 %v4043_v29, %v3691_v55  ;;  %v3734_v60 = vpop.f32.mrf.mxu0  ;;  %v10587_v49 = vld [vmem:[#allocation55_spill] sm:$0xff] }
 0x2ad   : > { %v4047_v33 = vpop.f32.mrf.mxu1  ;;  %v9436_v43 = vadd.f32 %v3734_v60, %v10582_v3  ;;  %v3707_v29 = vadd.f32 %v9366_v46, %v10587_v49 }
 0x2ae   : > { %v9433_v8 = vpack.c.bf16 %v4280_v31, %v4278_v5  ;;  %v4281_v34 = vmax.f32 %v4044_v10, 0.0  ;;  %v9438_v28 = vpop.f32.mrf.mxu0  ;;  %v4048_v39 = vadd.f32 %v4047_v33, %v3695_v22  ;;  %v10588_v5 = vld [vmem:[#allocation56_spill] sm:$0xff]  ;;  %v10589_v33 = vld [vmem:[#allocation57_spill] sm:$0xff] }
 0x2af   : > { %v4049_v48 = vpop.f32.mrf.mxu1  ;;  %v3709_v31 = vadd.f32 %v9376_v44, %v10588_v5  ;;  %v3711_v14 = vadd.f32 %v9380_v51, %v10589_v33 }
 0x2b0   : > { %v9444_v47 = vpack.c.bf16 %v4281_v34, %v4279_v25  ;;  %v9446_v9 = vpop.f32.mrf.mxu0  ;;  %v4050_v52 = vadd.f32 %v4049_v48, %v3697_v1  ;;  %v4282_v23 = vmax.f32 %v4048_v39, 0.0 }
 0x2b1   : > { %v4051_v20 = vpop.f32.mrf.mxu1 }
 0x2b2   : > { %v4052_v32 = vadd.f32 %v4051_v20, %v3699_v7  ;;  %v9450_v24 = vpop.f32.mrf.mxu0  ;;  %v4283_v37 = vmax.f32 %v4050_v52, 0.0 }
 0x2b3   : > { %v4053_v19 = vpop.f32.mrf.mxu1 }
 0x2b4   : > { %v4284_v62 = vmax.f32 %v4052_v32, 0.0  ;;  %v4054_v38 = vadd.f32 %v4053_v19, %v3701_v59  ;;  %v9452_v30 = vpop.f32.mrf.mxu0 }
 0x2b5   : > { %v4057_v26 = vpop.f32.mrf.mxu1 }
 0x2b6   : > { %v4382_v55 = vpack.c.bf16 %v4284_v62, %v4282_v23  ;;  %v4285_v17 = vmax.f32 %v4054_v38, 0.0  ;;  %v9456_v54 = vpop.f32.mrf.mxu0  ;;  %v4058_v10 = vadd.f32 %v4057_v26, %v3705_v42  ;;  %v10590_v62 = vld [vmem:[#allocation58_spill] sm:$0xff] }
 0x2b7   : > { %v4059_v40 = vpop.f32.mrf.mxu1  ;;  %v3721_v38 = vadd.f32 %v9406_v0, %v10590_v62 }
 0x2b8   : > { %v4383_v13 = vpack.c.bf16 %v4285_v17, %v4283_v37  ;;  %v9462_v22 = vpop.f32.mrf.mxu0  ;;  %v4060_v25 = vadd.f32 %v4059_v40, %v3707_v29  ;;  %v4286_v15 = vmax.f32 %v4058_v10, 0.0 }
 0x2b9   : > { %v4061_v60 = vpop.f32.mrf.mxu1 }
 0x2ba   : > { %v4062_v34 = vadd.f32 %v4061_v60, %v3709_v31  ;;  %v9466_v3 = vpop.f32.mrf.mxu0  ;;  %v4287_v44 = vmax.f32 %v4060_v25, 0.0 }
 0x2bb   : > { %v4063_v48 = vpop.f32.mrf.mxu1 }
 0x2bc   : > { %v4288_v1 = vmax.f32 %v4062_v34, 0.0  ;;  %v4064_v35 = vadd.f32 %v4063_v48, %v3711_v14  ;;  %v9468_v46 = vpop.f32.mrf.mxu0  ;;  %v10591_v14 = vld [vmem:[#allocation61_spill] sm:$0xff] }
 0x2bd   : > { %v4067_v7 = vpop.f32.mrf.mxu1  ;;  %v3731_v25 = vadd.f32 %v9429_v63, %v10591_v14 }
 0x2be   : > { %v4384_v39 = vpack.c.bf16 %v4288_v1, %v4286_v15  ;;  %v4289_v20 = vmax.f32 %v4064_v35, 0.0  ;;  %v4068_v61 = vadd.f32 %v4067_v7, %v9389_v57  ;;  %v9471_v59 = vpop.f32.mrf.mxu0 }
 0x2bf   : > { %v4069_v52 = vpop.f32.mrf.mxu1 }
 0x2c0   : > { %v4070_v51 = vadd.f32 %v4069_v52, %v9397_v41  ;;  %v4385_v32 = vpack.c.bf16 %v4289_v20, %v4287_v44  ;;  %v9474_v19 = vpop.f32.mrf.mxu0  ;;  %v4290_v57 = vmax.f32 %v4068_v61, 0.0  ;;  %v10593_v61 = vld [vmem:[#allocation64_spill] sm:$0xff] }
 0x2c1   : > { %v4071_v23 = vpop.f32.mrf.mxu1 }
 0x2c2   : > { %v4072_v26 = vadd.f32 %v4071_v23, %v9404_v53  ;;  %5010 = vmatprep.subr.bf16.mxu0 %v4385_v32  ;;  %v9479_v2 = vpop.f32.mrf.mxu0  ;;  %v4291_v49 = vmax.f32 %v4070_v51, 0.0  ;;  %v10594_v23 = vld [vmem:[#allocation65_spill] sm:$0xff] }
 0x2c3   : > { %v4073_v42 = vpop.f32.mrf.mxu1  ;;  %5011 = vmatpush2.bf16.msra.mxu0 %v4384_v39 }
 0x2c4   : > { %v4292_v37 = vmax.f32 %v4072_v26, 0.0  ;;  %v4074_v17 = vadd.f32 %v4073_v42, %v3721_v38  ;;  %5012 = vmatprep.subr.bf16.mxu0 %v4383_v13  ;;  %v9481_v40 = vpop.f32.mrf.mxu0 }
 0x2c5   : > { %v4077_v41 = vpop.f32.mrf.mxu1 }
 0x2c6   : > { %v9483_v29 = vpack.c.bf16 %v4292_v37, %v4290_v57  ;;  %v4293_v5 = vmax.f32 %v4074_v17, 0.0  ;;  %v4078_v0 = vadd.f32 %v4077_v41, %v9413_v11  ;;  %v9486_v31 = vpop.f32.mrf.mxu0  ;;  %v10595_v37 = vld [vmem:[#allocation66_spill] sm:$0xff] }
 0x2c7   : > { %v4079_v53 = vpop.f32.mrf.mxu1  ;;  %5013 = vmatpush2.bf16.msra.mxu0 %v4382_v55  ;;  %v3745_v17 = vadd.f32 %v9452_v30, %v10595_v37 }
 0x2c8   : > { %v4080_v10 = vadd.f32 %v4079_v53, %v9420_v50  ;;  %5014 = vmatprep.subr.bf16.mxu0 %v9444_v47  ;;  %v9490_v60 = vpack.c.bf16 %v4293_v5, %v4291_v49  ;;  %v9492_v13 = vpop.f32.mrf.mxu0  ;;  %v4294_v55 = vmax.f32 %v4078_v0, 0.0 }
 0x2c9   : > { %v4081_v33 = vpop.f32.mrf.mxu1 }
 0x2ca   : > { %v4082_v34 = vadd.f32 %v4081_v33, %v9427_v58  ;;  %v9497_v48 = vpop.f32.mrf.mxu0  ;;  %v4295_v35 = vmax.f32 %v4080_v10, 0.0  ;;  %v10597_v10 = vld [vmem:[#allocation68_spill] sm:$0xff] }
 0x2cb   : > { %v4083_v11 = vpop.f32.mrf.mxu1  ;;  %5015 = vmatpush2.bf16.msra.mxu0 %v9433_v8  ;;  %v10592_v8 = vld [vmem:[#allocation63_spill] sm:$0xff] }
 0x2cc   : > { %v4296_v15 = vmax.f32 %v4082_v34, 0.0  ;;  %v4084_v50 = vadd.f32 %v4083_v11, %v3731_v25  ;;  %5016 = vmatprep.subr.bf16.mxu0 %v9422_v6  ;;  %v9501_v47 = vpop.f32.mrf.mxu0  ;;  %v3737_v20 = vadd.f32 %v9438_v28, %v10592_v8  ;;  %v3739_v6 = vadd.f32 %v9446_v9, %v10593_v61  ;;  %v10598_v34 = vld [vmem:[#allocation69_spill] sm:$0xff] }
 0x2cd   : > { %v4087_v1 = vpop.f32.mrf.mxu1  ;;  %v3751_v11 = vadd.f32 %v9466_v3, %v10598_v34  ;;  %v10604_v34 = vld [vmem:[#allocation75_spill] sm:$0xff] }
 0x2ce   : > { %v9503_v7 = vpack.c.bf16 %v4296_v15, %v4294_v55  ;;  %v4297_v44 = vmax.f32 %v4084_v50, 0.0  ;;  %v4088_v63 = vadd.f32 %v4087_v1, %v9436_v43  ;;  %v9506_v58 = vpop.f32.mrf.mxu0  ;;  %v3741_v43 = vadd.f32 %v9450_v24, %v10594_v23  ;;  %v10601_v23 = vld [vmem:[#allocation72_spill] sm:$0xff] }
 0x2cf   : > { %v4089_v39 = vpop.f32.mrf.mxu1  ;;  %5017 = vmatpush2.bf16.msra.mxu0 %v9410_v4 }
 0x2d0   : > { %5018 = vmatprep.subr.bf16.mxu0 %v9399_v36  ;;  %v9514_v52 = vpack.c.bf16 %v4297_v44, %v4295_v35  ;;  %v9516_v51 = vpop.f32.mrf.mxu0  ;;  %v4090_v62 = vadd.f32 %v4089_v39, %v3737_v20  ;;  %v4298_v28 = vmax.f32 %v4088_v63, 0.0  ;;  %v10599_v44 = vld [vmem:[#allocation70_spill] sm:$0xff]  ;;  %v7084_v20 = vld [vmem:[%s10397_s3] ss:$16 sps:$4 sm:$0xff]  }
 0x2d1   : > { %v4091_v32 = vpop.f32.mrf.mxu1  ;;  %v3755_v63 = vadd.f32 %v9468_v46, %v10599_v44  ;;  %v7134_v46 = vld [vmem:[%s10397_s3 + $0xc] ss:$16 sps:$4 sm:$0xff]  }
 0x2d2   : > { %v4092_v38 = vadd.f32 %v4091_v32, %v3739_v6  ;;  %v9520_v26 = vpop.f32.mrf.mxu0  ;;  %v4299_v41 = vmax.f32 %v4090_v62, 0.0  ;;  %v10600_v6 = vld [vmem:[#allocation71_spill] sm:$0xff]  ;;  %5219 = vmatprep.mubr.bf16.mxu1 %v7134_v46 }
 0x2d3   : > { %v4093_v4 = vpop.f32.mrf.mxu1  ;;  %5019 = vmatpush2.bf16.msra.mxu0 %v9386_v45  ;;  %v10596_v45 = vld [vmem:[#allocation67_spill] sm:$0xff]  ;;  %v3757_v32 = vadd.f32 %v9471_v59, %v10600_v6 }
 0x2d4   : > { %v4300_v42 = vmax.f32 %v4092_v38, 0.0  ;;  %v4094_v9 = vadd.f32 %v4093_v4, %v3741_v43  ;;  %5020 = vmatprep.subr.bf16.mxu0 %v9374_v56  ;;  %v9524_v36 = vpop.f32.mrf.mxu0  ;;  %v3747_v53 = vadd.f32 %v9456_v54, %v10596_v45  ;;  %v3749_v56 = vadd.f32 %v9462_v22, %v10597_v10 }
 0x2d5   : > { %v4097_v57 = vpop.f32.mrf.mxu1  ;;  %v3759_v43 = vadd.f32 %v9474_v19, %v10601_v23  ;;  %v10603_v19 = vld [vmem:[#allocation74_spill] sm:$0xff] }
 0x2d6   : > { %v9528_v24 = vpack.c.bf16 %v4300_v42, %v4298_v28  ;;  %v4301_v49 = vmax.f32 %v4094_v9, 0.0  ;;  %v9530_v5 = vpop.f32.mrf.mxu0  ;;  %v4098_v33 = vadd.f32 %v4097_v57, %v3745_v17 }
 0x2d7   : > { %v4099_v0 = vpop.f32.mrf.mxu1  ;;  %5021 = vmatpush2.bf16.msra.mxu0 %v9364_v16 }
 0x2d8   : > { %5022 = vmatprep.subr.bf16.mxu0 %v9350_v18  ;;  %v9538_v14 = vpack.c.bf16 %v4301_v49, %v4299_v41  ;;  %v9540_v30 = vpop.f32.mrf.mxu0  ;;  %v4100_v55 = vadd.f32 %v4099_v0, %v3747_v53  ;;  %v4302_v54 = vmax.f32 %v4098_v33, 0.0  ;;  %v3765_v0 = vadd.f32 %v9481_v40, %v10603_v19 }
 0x2d9   : > { %v4101_v25 = vpop.f32.mrf.mxu1 }
 0x2da   : > { %v4102_v15 = vadd.f32 %v4101_v25, %v3749_v56  ;;  %v9544_v16 = vpop.f32.mrf.mxu0  ;;  %v4303_v39 = vmax.f32 %v4100_v55, 0.0  ;;  %v7092_v25 = vld [vmem:[%s10397_s3 + $0x44] ss:$16 sps:$4 sm:$0xff]   ;;  %v10605_v55 = vld [vmem:[#allocation76_spill] sm:$0xff] }
 0x2db   : > { %v4103_v50 = vpop.f32.mrf.mxu1  ;;  %5023 = vmatpush2.bf16.msra.mxu0 %v9339_v12  ;;  %v3769_v40 = vadd.f32 %v9492_v13, %v10605_v55 }
 0x2dc   : > { %v4304_v22 = vmax.f32 %v4102_v15, 0.0  ;;  %v4104_v1 = vadd.f32 %v4103_v50, %v3751_v11  ;;  %5024 = vmatprep.subr.bf16.mxu0 %v9326_v27  ;;  %v9548_v18 = vpop.f32.mrf.mxu0  ;;  %v7089_v27 = vld [vmem:[%s10397_s3 + $0x24] ss:$16 sps:$4 sm:$0xff]   ;;  %v3767_v11 = vadd.f32 %v9486_v31, %v10604_v34 }
 0x2dd   : > { %v4107_v35 = vpop.f32.mrf.mxu1 }
 0x2de   : > { %v9552_v3 = vpack.c.bf16 %v4304_v22, %v4302_v54  ;;  %v4305_v8 = vmax.f32 %v4104_v1, 0.0  ;;  %v9557_v12 = vpop.f32.mrf.mxu0  ;;  %v4108_v62 = vadd.f32 %v4107_v35, %v3755_v63  ;;  %v10606_v22 = vld [vmem:[#allocation77_spill] sm:$0xff] }
 0x2df   : > { %v4109_v61 = vpop.f32.mrf.mxu1  ;;  %5025 = vmatpush2.bf16.msra.mxu0 %v9319_v21  ;;  %v10602_v21 = vld [vmem:[#allocation73_spill] sm:$0xff]  ;;  %v3771_v1 = vadd.f32 %v9497_v48, %v10606_v22 }
 0x2e0   : > { %v9570_v38 = vpack.c.bf16 %v4305_v8, %v4303_v39  ;;  %v3761_v28 = vadd.f32 %v9479_v2, %v10602_v21  ;;  %v4110_v42 = vadd.f32 %v4109_v61, %v3757_v32  ;;  %v9574_v57 = vpop.f32.mrf.mxu0  ;;  %v4306_v17 = vmax.f32 %v4108_v62, 0.0  ;;  %v7087_v2 = vld [vmem:[%s10397_s3 + $0x20] ss:$16 sps:$4 sm:$0xff]   ;;  %v7095_v62 = vld [vmem:[%s10397_s3 + $0x64] ss:$16 sps:$4 sm:$0xff]  }
 0x2e1   : > { %v4111_v4 = vpop.f32.mrf.mxu1  ;;  %v7090_v48 = vld [vmem:[%s10397_s3 + $0x40] ss:$16 sps:$4 sm:$0xff]  }
 0x2e2   : > { %v4112_v9 = vadd.f32 %v4111_v4, %v3759_v43  ;;  %5027 = vmatmul.mubr.bf16.vlgmr.msra.gmra.mxu0 %v7084_v20  ;;  %v4307_v45 = vmax.f32 %v4110_v42, 0.0  ;;  %v9583_v56 = vpop.f32.mrf.mxu0  ;;  %v10608_v4 = vld [vmem:[#allocation79_spill] sm:$0xff] }
 0x2e3   : > { %v4113_v37 = vpop.f32.mrf.mxu1  ;;  %5036 = vmatprep.mubr.bf16.mxu0 %v7089_v27  ;;  %v10607_v27 = vld [vmem:[#allocation78_spill] sm:$0xff]  ;;  %v3777_v21 = vadd.f32 %v9506_v58, %v10608_v4 }
 0x2e4   : > { %v4308_v59 = vmax.f32 %v4112_v9, 0.0  ;;  %v4114_v41 = vadd.f32 %v4113_v37, %v3761_v28  ;;  %v9596_v63 = vpop.f32.mrf.mxu0  ;;  %v3775_v13 = vadd.f32 %v9501_v47, %v10607_v27  ;;  %v10609_v28 = vld [vmem:[#allocation80_spill] sm:$0xff] }
 0x2e5   : > { %v4117_v49 = vpop.f32.mrf.mxu1  ;;  %v3779_v47 = vadd.f32 %v9516_v51, %v10609_v28 }
 0x2e6   : > { %v9578_v53 = vpack.c.bf16 %v4308_v59, %v4306_v17  ;;  %v4309_v10 = vmax.f32 %v4114_v41, 0.0  ;;  %v4118_v50 = vadd.f32 %v4117_v49, %v3765_v0  ;;  %v9605_v23 = vpop.f32.mrf.mxu0  ;;  %v10610_v17 = vld [vmem:[#allocation81_spill] sm:$0xff] }
 0x2e7   : > { %v4119_v33 = vpop.f32.mrf.mxu1  ;;  %v3781_v59 = vadd.f32 %v9520_v26, %v10610_v17  ;;  %v7093_v26 = vld [vmem:[%s10397_s3 + $0x60] ss:$16 sps:$4 sm:$0xff]  }
 0x2e8   : > { %v9592_v15 = vpack.c.bf16 %v4309_v10, %v4307_v45  ;;  %v4120_v35 = vadd.f32 %v4119_v33, %v3767_v11  ;;  %v4310_v8 = vmax.f32 %v4118_v50, 0.0  ;;  %v9618_v19 = vpop.f32.mrf.mxu0  ;;  %v10611_v33 = vld [vmem:[#allocation82_spill] sm:$0xff]  ;;  %v7098_v50 = vld [vmem:[%s10397_s3 + $0x84] ss:$16 sps:$4 sm:$0xff]  }
 0x2e9   : > { %v4121_v54 = vpop.f32.mrf.mxu1  ;;  %v3785_v51 = vadd.f32 %v9524_v36, %v10611_v33 }
 0x2ea   : > { %v4122_v44 = vadd.f32 %v4121_v54, %v3769_v40  ;;  %5037 = vmatmul.mubr.bf16.gmra.mxu0 %v7087_v2  ;;  %v4311_v46 = vmax.f32 %v4120_v35, 0.0  ;;  %v3810_v55 = vpop.f32.mrf.mxu0  ;;  %v10612_v54 = vld [vmem:[#allocation83_spill] sm:$0xff] }
 0x2eb   : > { %v4123_v39 = vpop.f32.mrf.mxu1  ;;  %5046 = vmatprep.mubr.bf16.mxu0 %v7092_v25  ;;  %v3787_v22 = vadd.f32 %v9530_v5, %v10612_v54 }
 0x2ec   : > { %v4312_v20 = vmax.f32 %v4122_v44, 0.0  ;;  %v4124_v31 = vadd.f32 %v4123_v39, %v3771_v1  ;;  %v10613_v1 = vld [vmem:[#allocation84_spill] sm:$0xff]  ;;  %v3814_v27 = vpop.f32.mrf.mxu0 }
 0x2ed   : > { %v4127_v61 = vpop.f32.mrf.mxu1  ;;  %v3789_v35 = vadd.f32 %v9540_v30, %v10613_v1 }
 0x2ee   : > { %v9600_v6 = vpack.c.bf16 %v4312_v20, %v4310_v8  ;;  %v4313_v32 = vmax.f32 %v4124_v31, 0.0  ;;  %v4128_v9 = vadd.f32 %v4127_v61, %v3775_v13  ;;  %v10614_v8 = vld [vmem:[#allocation85_spill] sm:$0xff] }
 0x2ef   : > { %v4129_v43 = vpop.f32.mrf.mxu1  ;;  %v3791_v20 = vadd.f32 %v9544_v16, %v10614_v8 }
 0x2f0   : > { %v9614_v42 = vpack.c.bf16 %v4313_v32, %v4311_v46  ;;  %v4130_v41 = vadd.f32 %v4129_v43, %v3777_v21  ;;  %v4314_v45 = vmax.f32 %v4128_v9, 0.0  ;;  %v10615_v46 = vld [vmem:[#allocation86_spill] sm:$0xff]  ;;  %v7096_v9 = vld [vmem:[%s10397_s3 + $0x80] ss:$16 sps:$4 sm:$0xff]  }
 0x2f1   : > { %v4131_v37 = vpop.f32.mrf.mxu1  ;;  %v3795_v32 = vadd.f32 %v9548_v18, %v10615_v46  ;;  %v7101_v18 = vld [vmem:[%s10397_s3 + $0xa4] ss:$16 sps:$4 sm:$0xff]  }
 0x2f2   : > { %v4132_v49 = vadd.f32 %v4131_v37, %v3779_v47  ;;  %5047 = vmatmul.mubr.bf16.gmra.mxu0 %v7090_v48  ;;  %v4315_v25 = vmax.f32 %v4130_v41, 0.0  ;;  %v3816_v37 = vpop.f32.mrf.mxu0 }
 0x2f3   : > { %v4133_v0 = vpop.f32.mrf.mxu1  ;;  %5056 = vmatprep.mubr.bf16.mxu0 %v7095_v62  ;;  %v10616_v62 = vld [vmem:[#allocation87_spill] sm:$0xff] }
 0x2f4   : > { %v4316_v10 = vmax.f32 %v4132_v49, 0.0  ;;  %v4134_v58 = vadd.f32 %v4133_v0, %v3781_v59  ;;  %v3797_v30 = vadd.f32 %v9557_v12, %v10616_v62  ;;  %v10617_v59 = vld [vmem:[#allocation88_spill] sm:$0xff] }
 0x2f5   : > { %v4137_v2 = vpop.f32.mrf.mxu1  ;;  %v3799_v41 = vadd.f32 %v9574_v57, %v10617_v59  ;;  %v10620_v57 = vld [vmem:[#allocation91_spill] sm:$0xff] }
 0x2f6   : > { %v4398_v34 = vpack.c.bf16 %v4316_v10, %v4314_v45  ;;  %v4317_v11 = vmax.f32 %v4134_v58, 0.0  ;;  %v4138_v44 = vadd.f32 %v4137_v2, %v3785_v51  ;;  %v10618_v45 = vld [vmem:[#allocation89_spill] sm:$0xff]  ;;  %v3818_v2 = vpop.f32.mrf.mxu0  ;;  %v10619_v51 = vld [vmem:[#allocation90_spill] sm:$0xff] }
 0x2f7   : > { %v4139_v40 = vpop.f32.mrf.mxu1  ;;  %v3801_v10 = vadd.f32 %v9583_v56, %v10618_v45 }
 0x2f8   : > { %v4399_v36 = vpack.c.bf16 %v4317_v11, %v4315_v25  ;;  %v4140_v31 = vadd.f32 %v4139_v40, %v3787_v22  ;;  %v4318_v48 = vmax.f32 %v4138_v44, 0.0  ;;  %v3805_v25 = vadd.f32 %v9596_v63, %v10619_v51  ;;  %v7099_v44 = vld [vmem:[%s10397_s3 + $0xa0] ss:$16 sps:$4 sm:$0xff]   ;;  %v7104_v63 = vld [vmem:[%s10397_s3 + $0xc4] ss:$16 sps:$4 sm:$0xff]   ;;  %v10627_v51 = vld [vmem:[#allocation98_spill] sm:$0xff] }
 0x2f9   : > { %v4141_v39 = vpop.f32.mrf.mxu1 }
 0x2fa   : > { %v4142_v61 = vadd.f32 %v4141_v39, %v3789_v35  ;;  %5057 = vmatmul.mubr.bf16.gmra.mxu0 %v7093_v26  ;;  %v4319_v21 = vmax.f32 %v4140_v31, 0.0  ;;  %v3820_v39 = vpop.f32.mrf.mxu0 }
 0x2fb   : > { %v4143_v13 = vpop.f32.mrf.mxu1  ;;  %5066 = vmatprep.mubr.bf16.mxu0 %v7098_v50  ;;  %v3807_v50 = vadd.f32 %v9605_v23, %v10620_v57 }
 0x2fc   : > { %v4320_v5 = vmax.f32 %v4142_v61, 0.0  ;;  %v4144_v43 = vadd.f32 %v4143_v13, %v3791_v20  ;;  %v10622_v13 = vld [vmem:[#allocation93_spill] sm:$0xff] }
 0x2fd   : > { %v4147_v4 = vpop.f32.mrf.mxu1  ;;  %v3811_v46 = vadd.f32 %v3810_v55, %v10622_v13 }
 0x2fe   : > { %v4400_v28 = vpack.c.bf16 %v4320_v5, %v4318_v48  ;;  %v4321_v47 = vmax.f32 %v4144_v43, 0.0  ;;  %v4148_v16 = vadd.f32 %v4147_v4, %v3795_v32  ;;  %v3824_v48 = vpop.f32.mrf.mxu0 }
 0x2ff   : > { %v4149_v17 = vpop.f32.mrf.mxu1 }
 0x300   : > { %v4401_v49 = vpack.c.bf16 %v4321_v47, %v4319_v21  ;;  %v4150_v12 = vadd.f32 %v4149_v17, %v3797_v30  ;;  %v4322_v11 = vmax.f32 %v4148_v16, 0.0  ;;  %v7102_v47 = vld [vmem:[%s10397_s3 + $0xc0] ss:$16 sps:$4 sm:$0xff]   ;;  %v3826_v16 = vpop.f32.mrf.mxu0  ;;  %v10625_v17 = vld [vmem:[#allocation96_spill] sm:$0xff] }
 0x301   : > { %v4151_v0 = vpop.f32.mrf.mxu1 }
 0x302   : > { %v4152_v58 = vadd.f32 %v4151_v0, %v3799_v41  ;;  %5067 = vmatmul.mubr.bf16.gmra.mxu0 %v7096_v9  ;;  %5187 = vmatprep.subr.bf16.mxu1 %v4401_v49  ;;  %v4323_v22 = vmax.f32 %v4150_v12, 0.0  ;;  %v10624_v9 = vld [vmem:[#allocation95_spill] sm:$0xff]  ;;  %v10626_v49 = vld [vmem:[#allocation97_spill] sm:$0xff] }
 0x303   : > { %v4153_v33 = vpop.f32.mrf.mxu1  ;;  %5188 = vmatpush1.bf16.msra.mxu1 %v4400_v28  ;;  %5076 = vmatprep.mubr.bf16.mxu0 %v7101_v18  ;;  %v3819_v18 = vadd.f32 %v3818_v2, %v10625_v17  ;;  %v3821_v12 = vadd.f32 %v3820_v39, %v10626_v49  ;;  %v7116_v49 = vld [vmem:[%s10397_s3 + $0x144] ss:$16 sps:$4 sm:$0xff]  }
 0x304   : > { %v4324_v26 = vmax.f32 %v4152_v58, 0.0  ;;  %v4154_v40 = vadd.f32 %v4153_v33, %v3801_v10  ;;  %5189 = vmatprep.subr.bf16.mxu1 %v4399_v36  ;;  %v10621_v36 = vld [vmem:[#allocation92_spill] sm:$0xff]  ;;  %v3828_v10 = vpop.f32.mrf.mxu0 }
 0x305   : > { %v4157_v54 = vpop.f32.mrf.mxu1  ;;  %v3809_v23 = vadd.f32 %v9618_v19, %v10621_v36 }
 0x306   : > { %v9652_v56 = vpack.c.bf16 %v4324_v26, %v4322_v11  ;;  %v4325_v1 = vmax.f32 %v4154_v40, 0.0  ;;  %v4158_v35 = vadd.f32 %v4157_v54, %v3805_v25  ;;  %v3825_v25 = vadd.f32 %v3824_v48, %v10627_v51  ;;  %v7105_v40 = vld [vmem:[%s10397_s3 + $0xe0] ss:$16 sps:$4 sm:$0xff]   ;;  %v3830_v57 = vpop.f32.mrf.mxu0 }
 0x307   : > { %v4159_v8 = vpop.f32.mrf.mxu1  ;;  %5190 = vmatpush1.bf16.msra.mxu1 %v4398_v34  ;;  %v10623_v34 = vld [vmem:[#allocation94_spill] sm:$0xff] }
 0x308   : > { %v9662_v20 = vpack.c.bf16 %v4325_v1, %v4323_v22  ;;  %v4160_v31 = vadd.f32 %v4159_v8, %v3807_v50  ;;  %5191 = vmatprep.subr.bf16.mxu1 %v9614_v42  ;;  %v3815_v43 = vadd.f32 %v3814_v27, %v10623_v34  ;;  %v4326_v62 = vmax.f32 %v4158_v35, 0.0  ;;  %v7107_v27 = vld [vmem:[%s10397_s3 + $0xe4] ss:$16 sps:$4 sm:$0xff]   ;;  %v10629_v22 = vld [vmem:[#allocation100_spill] sm:$0xff] }
 0x309   : > { %v4161_v61 = vpop.f32.mrf.mxu1  ;;  %v3829_v1 = vadd.f32 %v3828_v10, %v10629_v22  ;;  %v10630_v8 = vld [vmem:[#allocation101_spill] sm:$0xff] }
 0x30a   : > { %v4162_v32 = vadd.f32 %v4161_v61, %v3809_v23  ;;  %5077 = vmatmul.mubr.bf16.gmra.mxu0 %v7099_v44  ;;  %v4327_v21 = vmax.f32 %v4160_v31, 0.0  ;;  %v7119_v22 = vld [vmem:[%s10397_s3 + $0x164] ss:$16 sps:$4 sm:$0xff]  }
 0x30b   : > { %v4163_v5 = vpop.f32.mrf.mxu1  ;;  %5192 = vmatpush1.bf16.msra.mxu1 %v9600_v6  ;;  %5086 = vmatprep.mubr.bf16.mxu0 %v7104_v63  ;;  %v3831_v63 = vadd.f32 %v3830_v57, %v10630_v8 }
 0x30c   : > { %v4328_v30 = vmax.f32 %v4162_v32, 0.0  ;;  %v4164_v19 = vadd.f32 %v4163_v5, %v3811_v46  ;;  %5193 = vmatprep.subr.bf16.mxu1 %v9592_v15  ;;  %v3817_v15 = vadd.f32 %v3816_v37, %v10624_v9  ;;  %v7108_v5 = vld [vmem:[%s10397_s3 + $0x100] ss:$16 sps:$4 sm:$0xff]  }
 0x30d   : > { %v4167_v4 = vpop.f32.mrf.mxu1 }
 0x30e   : > { %v9669_v42 = vpack.c.bf16 %v4328_v30, %v4326_v62  ;;  %v4329_v28 = vmax.f32 %v4164_v19, 0.0  ;;  %v4168_v55 = vadd.f32 %v4167_v4, %v3815_v43  ;;  %v10631_v62 = vld [vmem:[#allocation5_spill] sm:$0xff]  ;;  %v10632_v19 = vld [vmem:[#allocation6_spill] sm:$0xff] }
 0x30f   : > { %v4169_v6 = vpop.f32.mrf.mxu1  ;;  %5194 = vmatpush1.bf16.msra.mxu1 %v9578_v53 }
 0x310   : > { %v9680_v59 = vpack.c.bf16 %v4329_v28, %v4327_v21  ;;  %5195 = vmatprep.subr.bf16.mxu1 %v9570_v38  ;;  %v4170_v0 = vadd.f32 %v4169_v6, %v3817_v15  ;;  %v4330_v58 = vmax.f32 %v4168_v55, 0.0  ;;  %v10633_v21 = vld [vmem:[#allocation7_spill] sm:$0xff]  ;;  %v10634_v6 = vld [vmem:[#allocation8_spill] sm:$0xff] }
 0x311   : > { %v4171_v41 = vpop.f32.mrf.mxu1 }
 0x312   : > { %v4172_v45 = vadd.f32 %v4171_v41, %v3819_v18  ;;  %5087 = vmatmul.mubr.bf16.gmra.mxu0 %v7102_v47  ;;  %v4331_v38 = vmax.f32 %v4170_v0, 0.0  ;;  %v7111_v18 = vld [vmem:[%s10397_s3 + $0x120] ss:$16 sps:$4 sm:$0xff]  }
 0x313   : > { %v4173_v53 = vpop.f32.mrf.mxu1  ;;  %5196 = vmatpush1.bf16.msra.mxu1 %v9552_v3  ;;  %5096 = vmatprep.mubr.bf16.mxu0 %v7107_v27  ;;  %v7110_v3 = vld [vmem:[%s10397_s3 + $0x104] ss:$16 sps:$4 sm:$0xff]  }
 0x314   : > { %v4332_v33 = vmax.f32 %v4172_v45, 0.0  ;;  %v4174_v37 = vadd.f32 %v4173_v53, %v3821_v12  ;;  %5197 = vmatprep.subr.bf16.mxu1 %v9538_v14  ;;  %v10628_v14 = vld [vmem:[#allocation99_spill] sm:$0xff]  ;;  %v10635_v0 = vld [vmem:[#allocation9_spill] sm:$0xff] }
 0x315   : > { %v4177_v2 = vpop.f32.mrf.mxu1  ;;  %v3827_v54 = vadd.f32 %v3826_v16, %v10628_v14  ;;  %v10636_v53 = vld [vmem:[#allocation11_spill] sm:$0xff] }
 0x316   : > { %v9687_v11 = vpack.c.bf16 %v4332_v33, %v4330_v58  ;;  %v4333_v26 = vmax.f32 %v4174_v37, 0.0  ;;  %v4178_v44 = vadd.f32 %v4177_v2, %v3825_v25  ;;  %v10637_v33 = vld [vmem:[#allocation12_spill] sm:$0xff]  ;;  %v7114_v14 = vld [vmem:[%s10397_s3 + $0x140] ss:$16 sps:$4 sm:$0xff]  }
 0x317   : > { %v4179_v50 = vpop.f32.mrf.mxu1  ;;  %5198 = vmatpush1.bf16.msra.mxu1 %v9528_v24 }
 0x318   : > { %v9698_v35 = vpack.c.bf16 %v4333_v26, %v4331_v38  ;;  %5199 = vmatprep.subr.bf16.mxu1 %v9514_v52  ;;  %v4180_v36 = vadd.f32 %v4179_v50, %v3827_v54  ;;  %v4334_v31 = vmax.f32 %v4178_v44, 0.0  ;;  %v10638_v38 = vld [vmem:[#allocation13_spill] sm:$0xff]  ;;  %v10639_v44 = vld [vmem:[#allocation15_spill] sm:$0xff] }
 0x319   : > { %v4181_v39 = vpop.f32.mrf.mxu1 }
 0x31a   : > { %v4182_v23 = vadd.f32 %v4181_v39, %v3829_v1  ;;  %5097 = vmatmul.mubr.bf16.gmra.mxu0 %v7105_v40  ;;  %v4335_v32 = vmax.f32 %v4180_v36, 0.0 }
 0x31b   : > { %v4183_v24 = vpop.f32.mrf.mxu1  ;;  %5200 = vmatpush1.bf16.msra.mxu1 %v9503_v7  ;;  %5106 = vmatprep.mubr.bf16.mxu0 %v7110_v3  ;;  %v7113_v7 = vld [vmem:[%s10397_s3 + $0x124] ss:$16 sps:$4 sm:$0xff]  }
 0x31c   : > { %v4336_v61 = vmax.f32 %v4182_v23, 0.0  ;;  %v4184_v13 = vadd.f32 %v4183_v24, %v3831_v63  ;;  %5201 = vmatprep.subr.bf16.mxu1 %v9490_v60  ;;  %v10640_v63 = vld [vmem:[#allocation102_spill] sm:$0xff]  ;;  %v10641_v23 = vld [vmem:[#allocation103_spill] sm:$0xff] }
 0x31d   : > { %v4187_v46 = vpop.f32.mrf.mxu1 }
 0x31e   : > { %v9704_v48 = vpack.c.bf16 %v4336_v61, %v4334_v31  ;;  %v4337_v52 = vmax.f32 %v4184_v13, 0.0  ;;  %v4188_v60 = vadd.f32 %v4187_v46, %v10631_v62  ;;  %v10642_v46 = vld [vmem:[#allocation104_spill] sm:$0xff]  ;;  %v7117_v62 = vld [vmem:[%s10397_s3 + $0x160] ss:$16 sps:$4 sm:$0xff]  }
 0x31f   : > { %v4189_v34 = vpop.f32.mrf.mxu1  ;;  %5202 = vmatpush1.bf16.msra.mxu1 %v9483_v29 }
 0x320   : > { %v9713_v43 = vpack.c.bf16 %v4337_v52, %v4335_v32  ;;  %v4190_v4 = vadd.f32 %v4189_v34, %v10632_v19  ;;  %v4338_v47 = vmax.f32 %v4188_v60, 0.0 }
 0x321   : > { %v4191_v30 = vpop.f32.mrf.mxu1 }
 0x322   : > { %v4192_v28 = vadd.f32 %v4191_v30, %v10633_v21  ;;  %5107 = vmatmul.mubr.bf16.gmra.mxu0 %v7108_v5  ;;  %v4339_v9 = vmax.f32 %v4190_v4, 0.0  ;;  %v7122_v30 = vld [vmem:[%s10397_s3 + $0x184] ss:$16 sps:$4 sm:$0xff]  }
 0x323   : > { %v4193_v55 = vpop.f32.mrf.mxu1  ;;  %5116 = vmatprep.mubr.bf16.mxu0 %v7113_v7  ;;  %v10643_v4 = vld [vmem:[#allocation105_spill] sm:$0xff] }
 0x324   : > { %v4340_v16 = vmax.f32 %v4192_v28, 0.0  ;;  %v4194_v29 = vadd.f32 %v4193_v55, %v10634_v6  ;;  %v10644_v55 = vld [vmem:[#allocation106_spill] sm:$0xff] }
 0x325   : > { %v4197_v27 = vpop.f32.mrf.mxu1 }
 0x326   : > { %v9719_v15 = vpack.c.bf16 %v4340_v16, %v4338_v47  ;;  %v4341_v17 = vmax.f32 %v4194_v29, 0.0  ;;  %v4198_v45 = vadd.f32 %v4197_v27, %v10635_v0  ;;  %v10645_v16 = vld [vmem:[#allocation107_spill] sm:$0xff] }
 0x327   : > { %v4199_v41 = vpop.f32.mrf.mxu1 }
 0x328   : > { %v9727_v12 = vpack.c.bf16 %v4341_v17, %v4339_v9  ;;  %v4200_v58 = vadd.f32 %v4199_v41, %v10636_v53  ;;  %v4342_v51 = vmax.f32 %v4198_v45, 0.0  ;;  %v10646_v17 = vld [vmem:[#allocation108_spill] sm:$0xff]  ;;  %v7120_v45 = vld [vmem:[%s10397_s3 + $0x180] ss:$16 sps:$4 sm:$0xff]  }
 0x329   : > { %v4201_v10 = vpop.f32.mrf.mxu1 }
 0x32a   : > { %v4202_v37 = vadd.f32 %v4201_v10, %v10637_v33  ;;  %5117 = vmatmul.mubr.bf16.gmra.mxu0 %v7111_v18  ;;  %v4343_v57 = vmax.f32 %v4200_v58, 0.0  ;;  %v7125_v10 = vld [vmem:[%s10397_s3 + $0x1a4] ss:$16 sps:$4 sm:$0xff]   ;;  %v7123_v58 = vld [vmem:[%s10397_s3 + $0x1a0] ss:$16 sps:$4 sm:$0xff]  }
 0x32b   : > { %v4203_v2 = vpop.f32.mrf.mxu1  ;;  %5126 = vmatprep.mubr.bf16.mxu0 %v7116_v49  ;;  %v7128_v33 = vld [vmem:[%s10397_s3 + $0x1c4] ss:$16 sps:$4 sm:$0xff]  }
 0x32c   : > { %v4344_v25 = vmax.f32 %v4202_v37, 0.0  ;;  %v4204_v26 = vadd.f32 %v4203_v2, %v10638_v38  ;;  %v7126_v37 = vld [vmem:[%s10397_s3 + $0x1c0] ss:$16 sps:$4 sm:$0xff]   ;;  %v7131_v2 = vld [vmem:[%s10397_s3 + $0x1e4] ss:$16 sps:$4 sm:$0xff]  }
 0x32d   : > { %v4207_v40 = vpop.f32.mrf.mxu1  ;;  %v7152_v38 = vld [vmem:[%s10397_s3 + $0xcc] ss:$16 sps:$4 sm:$0xff]  }
 0x32e   : > { %v4412_v50 = vpack.c.bf16 %v4344_v25, %v4342_v51  ;;  %v4345_v3 = vmax.f32 %v4204_v26, 0.0  ;;  %v4208_v39 = vadd.f32 %v4207_v40, %v10639_v44  ;;  %v7149_v51 = vld [vmem:[%s10397_s3 + $0xac] ss:$16 sps:$4 sm:$0xff]   ;;  %v7147_v25 = vld [vmem:[%s10397_s3 + $0xa8] ss:$16 sps:$4 sm:$0xff]  }
 0x32f   : > { %v4209_v54 = vpop.f32.mrf.mxu1  ;;  %v7150_v26 = vld [vmem:[%s10397_s3 + $0xc8] ss:$16 sps:$4 sm:$0xff]   ;;  %v7155_v40 = vld [vmem:[%s10397_s3 + $0xec] ss:$16 sps:$4 sm:$0xff]  }
 0x330   : > { %v4413_v1 = vpack.c.bf16 %v4345_v3, %v4343_v57  ;;  %v4210_v36 = vadd.f32 %v4209_v54, %v10640_v63  ;;  %v4346_v61 = vmax.f32 %v4208_v39, 0.0  ;;  %v7153_v57 = vld [vmem:[%s10397_s3 + $0xe8] ss:$16 sps:$4 sm:$0xff]   ;;  %v7164_v44 = vld [vmem:[%s10397_s3 + $0x14c] ss:$16 sps:$4 sm:$0xff]  }
 0x331   : > { %v4211_v8 = vpop.f32.mrf.mxu1  ;;  %v7156_v3 = vld [vmem:[%s10397_s3 + $0x108] ss:$16 sps:$4 sm:$0xff]  }
 0x332   : > { %v4212_v24 = vadd.f32 %v4211_v8, %v10641_v23  ;;  %5127 = vmatmul.mubr.bf16.gmra.mxu0 %v7114_v14  ;;  %v4347_v5 = vmax.f32 %v4210_v36, 0.0  ;;  %v7161_v14 = vld [vmem:[%s10397_s3 + $0x12c] ss:$16 sps:$4 sm:$0xff]   ;;  %v7162_v63 = vld [vmem:[%s10397_s3 + $0x148] ss:$16 sps:$4 sm:$0xff]  }
 0x333   : > { %v4213_v31 = vpop.f32.mrf.mxu1  ;;  %5136 = vmatprep.mubr.bf16.mxu0 %v7119_v22  ;;  %v7167_v36 = vld [vmem:[%s10397_s3 + $0x16c] ss:$16 sps:$4 sm:$0xff]  }
 0x334   : > { %v4348_v13 = vmax.f32 %v4212_v24, 0.0  ;;  %v4214_v32 = vadd.f32 %v4213_v31, %v10642_v46  ;;  %v7165_v31 = vld [vmem:[%s10397_s3 + $0x168] ss:$16 sps:$4 sm:$0xff]  }
 0x335   : > { %v4217_v52 = vpop.f32.mrf.mxu1 }
 0x336   : > { %v4414_v34 = vpack.c.bf16 %v4348_v13, %v4346_v61  ;;  %v4349_v7 = vmax.f32 %v4214_v32, 0.0  ;;  %v4218_v21 = vadd.f32 %v4217_v52, %v10643_v4  ;;  %v7170_v61 = vld [vmem:[%s10397_s3 + $0x18c] ss:$16 sps:$4 sm:$0xff]   ;;  %v7168_v32 = vld [vmem:[%s10397_s3 + $0x188] ss:$16 sps:$4 sm:$0xff]  }
 0x337   : > { %v4219_v60 = vpop.f32.mrf.mxu1  ;;  %v7173_v52 = vld [vmem:[%s10397_s3 + $0x1ac] ss:$16 sps:$4 sm:$0xff]  }
 0x338   : > { %v4415_v19 = vpack.c.bf16 %v4349_v7, %v4347_v5  ;;  %v4220_v47 = vadd.f32 %v4219_v60, %v10644_v55  ;;  %v4350_v27 = vmax.f32 %v4218_v21, 0.0  ;;  %v7171_v7 = vld [vmem:[%s10397_s3 + $0x1a8] ss:$16 sps:$4 sm:$0xff]   ;;  %v7179_v4 = vld [vmem:[%s10397_s3 + $0x1ec] ss:$16 sps:$4 sm:$0xff]  }
 0x339   : > { %v4221_v28 = vpop.f32.mrf.mxu1  ;;  %v7177_v55 = vld [vmem:[%s10397_s3 + $0x1e8] ss:$16 sps:$4 sm:$0xff]  }
 0x33a   : > { %v4222_v6 = vadd.f32 %v4221_v28, %v10645_v16  ;;  %5137 = vmatmul.mubr.bf16.gmra.mxu0 %v7117_v62  ;;  %v4351_v41 = vmax.f32 %v4220_v47, 0.0  ;;  %v7176_v62 = vld [vmem:[%s10397_s3 + $0x1cc] ss:$16 sps:$4 sm:$0xff]  }
 0x33b   : > { %v4223_v29 = vpop.f32.mrf.mxu1  ;;  %5146 = vmatprep.mubr.bf16.mxu0 %v7122_v30 }
 0x33c   : > { %v4352_v9 = vmax.f32 %v4222_v6, 0.0  ;;  %v4224_v18 = vadd.f32 %v4223_v29, %v10646_v17 }
 0x33e   : > { %v4416_v49 = vpack.c.bf16 %v4352_v9, %v4350_v27  ;;  %v4353_v0 = vmax.f32 %v4224_v18, 0.0 }
 0x340   : > { %v4417_v53 = vpack.c.bf16 %v4353_v0, %v4351_v41  ;;  %v9921_v41 = vpop.permute.xlu0 %4586  ;;  %v9925_v0 = vpop.permute.xlu1 %4591 }
 0x342   : > { %5147 = vmatmul.mubr.bf16.gmra.mxu0 %v7120_v45  ;;  %5203 = vmatprep.subr.bf16.mxu1 %v4417_v53 }
 0x343   : > { %5204 = vmatpush2.bf16.msra.mxu1 %v4416_v49  ;;  %5156 = vmatprep.mubr.bf16.mxu0 %v7125_v10 }
 0x344   : > { %5205 = vmatprep.subr.bf16.mxu1 %v4415_v19  ;;  %v7174_v19 = vld [vmem:[%s10397_s3 + $0x1c8] ss:$16 sps:$4 sm:$0xff]   ;;  %v9927_v45 = vpop.permute.xlu0 %4576  ;;  %v9931_v53 = vpop.permute.xlu1 %4581 }
 0x347   : > { %5206 = vmatpush2.bf16.msra.mxu1 %v4414_v34 }
 0x348   : > { %5207 = vmatprep.subr.bf16.mxu1 %v4413_v1  ;;  %v7159_v1 = vld [vmem:[%s10397_s3 + $0x128] ss:$16 sps:$4 sm:$0xff]  }
 0x34a   : > { %5157 = vmatmul.mubr.bf16.gmra.mxu0 %v7123_v58 }
 0x34b   : > { %5208 = vmatpush2.bf16.msra.mxu1 %v4412_v50  ;;  %5166 = vmatprep.mubr.bf16.mxu0 %v7128_v33  ;;  %v7158_v50 = vld [vmem:[%s10397_s3 + $0x10c] ss:$16 sps:$4 sm:$0xff]   ;;  %v9935_v33 = vpop.permute.xlu0 %4566 }
 0x34c   : > { %5209 = vmatprep.subr.bf16.mxu1 %v9727_v12  ;;  %v7129_v12 = vld [vmem:[%s10397_s3 + $0x1e0] ss:$16 sps:$4 sm:$0xff]  }
 0x34f   : > { %5210 = vmatpush2.bf16.msra.mxu1 %v9719_v15  ;;  %v7144_v15 = vld [vmem:[%s10397_s3 + $0x88] ss:$16 sps:$4 sm:$0xff]  }
 0x350   : > { %5211 = vmatprep.subr.bf16.mxu1 %v9713_v43  ;;  %v7146_v43 = vld [vmem:[%s10397_s3 + $0x8c] ss:$16 sps:$4 sm:$0xff]  }
 0x352   : > { %5167 = vmatmul.mubr.bf16.gmra.mxu0 %v7126_v37 }
 0x353   : > { %5212 = vmatpush2.bf16.msra.mxu1 %v9704_v48  ;;  %5176 = vmatprep.mubr.bf16.mxu0 %v7131_v2  ;;  %v7132_v48 = vld [vmem:[%s10397_s3 + $0x8] ss:$16 sps:$4 sm:$0xff]   ;;  %v9939_v2 = vpop.permute.xlu1 %4571 }
 0x354   : > { %5213 = vmatprep.subr.bf16.mxu1 %v9698_v35  ;;  %v7137_v35 = vld [vmem:[%s10397_s3 + $0x2c] ss:$16 sps:$4 sm:$0xff]  }
 0x357   : > { %5214 = vmatpush2.bf16.msra.mxu1 %v9687_v11  ;;  %v7141_v11 = vld [vmem:[%s10397_s3 + $0x68] ss:$16 sps:$4 sm:$0xff]  }
 0x358   : > { %5215 = vmatprep.subr.bf16.mxu1 %v9680_v59  ;;  %v7135_v59 = vld [vmem:[%s10397_s3 + $0x28] ss:$16 sps:$4 sm:$0xff]  }
 0x35a   : > { %5177 = vmatmul.mubr.bf16.gmra.mxu0 %v7129_v12  ;;  %v9941_v12 = vpop.permute.xlu0 %4556 }
 0x35b   : > { %5216 = vmatpush2.bf16.msra.mxu1 %v9669_v42  ;;  %v7143_v42 = vld [vmem:[%s10397_s3 + $0x6c] ss:$16 sps:$4 sm:$0xff]  }
 0x35c   : > { %5217 = vmatprep.subr.bf16.mxu1 %v9662_v20  ;;  %v7140_v20 = vld [vmem:[%s10397_s3 + $0x4c] ss:$16 sps:$4 sm:$0xff]  }
 0x35f   : > { %5218 = vmatpush2.bf16.msra.mxu1 %v9652_v56  ;;  %v7138_v56 = vld [vmem:[%s10397_s3 + $0x48] ss:$16 sps:$4 sm:$0xff]  }
 0x362   : > { %5220 = vmatmul.mubr.bf16.vlgmr.msra.gmra.mxu1 %v7132_v48 }
 0x363   : > { %5229 = vmatprep.mubr.bf16.mxu1 %v7137_v35  ;;  %v9945_v35 = vpop.permute.xlu1 %4561 }
 0x36a   : > { %5230 = vmatmul.mubr.bf16.gmra.mxu1 %v7135_v59 }
 0x36b   : > { %5239 = vmatprep.mubr.bf16.mxu1 %v7140_v20  ;;  %v9949_v20 = vpop.permute.xlu0 %4546 }
 0x372   : > { %5240 = vmatmul.mubr.bf16.gmra.mxu1 %v7138_v56 }
 0x373   : > { %5249 = vmatprep.mubr.bf16.mxu1 %v7143_v42  ;;  %v9953_v42 = vpop.permute.xlu1 %4551 }
 0x37a   : > { %5250 = vmatmul.mubr.bf16.gmra.mxu1 %v7141_v11  ;;  %v9955_v11 = vpop.permute.xlu0 %4536 }
 0x37b   : > { %5259 = vmatprep.mubr.bf16.mxu1 %v7146_v43 }
 0x382   : > { %5260 = vmatmul.mubr.bf16.gmra.mxu1 %v7144_v15  ;;  %v9959_v15 = vpop.permute.xlu1 %4541 }
 0x383   : > { %5269 = vmatprep.mubr.bf16.mxu1 %v7149_v51 }
 0x38a   : > { %5270 = vmatmul.mubr.bf16.gmra.mxu1 %v7147_v25  ;;  %v4527_v25 = vpop.permute.xlu0 %4526 }
 0x38b   : > { %5279 = vmatprep.mubr.bf16.mxu1 %v7152_v38 }
 0x392   : > { %5280 = vmatmul.mubr.bf16.gmra.mxu1 %v7150_v26  ;;  %v4532_v26 = vpop.permute.xlu1 %4531 }
 0x393   : > { %5289 = vmatprep.mubr.bf16.mxu1 %v7155_v40  ;;  %v4517_v40 = vpop.permute.xlu0 %4516 }
 0x39a   : > { %5290 = vmatmul.mubr.bf16.gmra.mxu1 %v7153_v57 }
 0x39b   : > { %5299 = vmatprep.mubr.bf16.mxu1 %v7158_v50 }
 0x3a2   : > { %v9838_v54 = vpop.f32.mrf.mxu0  ;;  %5300 = vmatmul.mubr.bf16.gmra.mxu1 %v7156_v3 }
 0x3a3   : > { %5309 = vmatprep.mubr.bf16.mxu1 %v7161_v14  ;;  %v5029_v50 = vadd.f32 %v9838_v54, %v4517_v40  ;;  %v4522_v14 = vpop.permute.xlu1 %4521 }
 0x3a4   : > { %v9840_v22 = vpop.f32.mrf.mxu0 }
 0x3a6   : > { %v9848_v39 = vpop.f32.mrf.mxu0 }
 0x3a8   : > { %v9850_v8 = vpop.f32.mrf.mxu0 }
 0x3aa   : > { %5310 = vmatmul.mubr.bf16.gmra.mxu1 %v7159_v1  ;;  %v9858_v23 = vpop.f32.mrf.mxu0  ;;  %v5031_v1 = vadd.f32 %v9840_v22, %v4517_v40 }
 0x3ab   : > { %5319 = vmatprep.mubr.bf16.mxu1 %v7164_v44  ;;  %v5039_v54 = vadd.f32 %v9858_v23, %v4527_v25 }
 0x3ac   : > { %v9860_v24 = vpop.f32.mrf.mxu0 }
 0x3ad   : > { %v5041_v22 = vadd.f32 %v9860_v24, %v4527_v25 }
 0x3ae   : > { %v9868_v13 = vpop.f32.mrf.mxu0 }
 0x3b0   : > { %v9870_v46 = vpop.f32.mrf.mxu0 }
 0x3b2   : > { %5320 = vmatmul.mubr.bf16.gmra.mxu1 %v7162_v63  ;;  %v9878_v5 = vpop.f32.mrf.mxu0 }
 0x3b3   : > { %5329 = vmatprep.mubr.bf16.mxu1 %v7167_v36  ;;  %v5049_v25 = vadd.f32 %v9878_v5, %v9955_v11 }
 0x3b4   : > { %v9880_v34 = vpop.f32.mrf.mxu0 }
 0x3b6   : > { %v9888_v60 = vpop.f32.mrf.mxu0 }
 0x3b8   : > { %v9890_v30 = vpop.f32.mrf.mxu0 }
 0x3ba   : > { %5330 = vmatmul.mubr.bf16.gmra.mxu1 %v7165_v31  ;;  %v9898_v21 = vpop.f32.mrf.mxu0  ;;  %v5033_v31 = vadd.f32 %v9848_v39, %v4522_v14 }
 0x3bb   : > { %5339 = vmatprep.mubr.bf16.mxu1 %v7170_v61 }
 0x3bc   : > { %v9900_v28 = vpop.f32.mrf.mxu0 }
 0x3be   : > { %v9905_v47 = vpop.f32.mrf.mxu0 }
 0x3c0   : > { %v9907_v16 = vpop.f32.mrf.mxu0 }
 0x3c2   : > { %5340 = vmatmul.mubr.bf16.gmra.mxu1 %v7168_v32  ;;  %v9909_v6 = vpop.f32.mrf.mxu0 }
 0x3c3   : > { %5349 = vmatprep.mubr.bf16.mxu1 %v7173_v52  ;;  %v5035_v52 = vadd.f32 %v9850_v8, %v4522_v14  ;;  %v5043_v14 = vadd.f32 %v9868_v13, %v4532_v26 }
 0x3c4   : > { %v9911_v29 = vpop.f32.mrf.mxu0 }
 0x3c6   : > { %v9913_v27 = vpop.f32.mrf.mxu0 }
 0x3c8   : > { %v9915_v9 = vpop.f32.mrf.mxu0 }
 0x3ca   : > { %5350 = vmatmul.mubr.bf16.gmra.mxu1 %v7171_v7  ;;  %v9917_v17 = vpop.f32.mrf.mxu0 }
 0x3cb   : > { %5359 = vmatprep.mubr.bf16.mxu1 %v7176_v62 }
 0x3cc   : > { %v9919_v18 = vpop.f32.mrf.mxu0 }
 0x3ce   : > { %v9923_v49 = vpop.f32.mrf.mxu0 }
 0x3d0   : > { %v9929_v10 = vpop.f32.mrf.mxu0 }
 0x3d2   : > { %5360 = vmatmul.mubr.bf16.gmra.mxu1 %v7174_v19  ;;  %v9933_v58 = vpop.f32.mrf.mxu0 }
 0x3d3   : > { %5369 = vmatprep.mubr.bf16.mxu1 %v7179_v4 }
 0x3d4   : > { %v9937_v37 = vpop.f32.mrf.mxu0 }
 0x3d6   : > { %v9943_v48 = vpop.f32.mrf.mxu0 }
 0x3d8   : > { %v9947_v59 = vpop.f32.mrf.mxu0 }
 0x3da   : > { %5370 = vmatmul.mubr.bf16.gmra.mxu1 %v7177_v55  ;;  %v9951_v56 = vpop.f32.mrf.mxu0 }
 0x3dc   : > { %v9957_v43 = vpop.f32.mrf.mxu0 }
 0x3de   : > { %v9961_v51 = vpop.f32.mrf.mxu0 }
 0x3e0   : > { %v9963_v38 = vpop.f32.mrf.mxu0 }
 0x3e2   : > { %v9965_v57 = vpop.f32.mrf.mxu0 }
 0x3e3   : > { %10647 = vst [vmem:[#allocation10_spill] sm:$0xff] %v9965_v57 }
 0x3e4   : > { %v9969_v63 = vpop.f32.mrf.mxu0 }
 0x3e6   : > { %v9973_v62 = vpop.f32.mrf.mxu0 }
 0x422   : > { %v5221_v3 = vpop.f32.mrf.mxu1 }
 0x423   : > { %v5222_v44 = vadd.f32 %v5221_v3, %v5029_v50 }
 0x424   : > { %v5223_v36 = vpop.f32.mrf.mxu1 }
 0x425   : > { %v5224_v61 = vadd.f32 %v5223_v36, %v5031_v1  ;;  %v5380_v4 = vmax.f32 %v5222_v44, 0.0  ;;  %v9979_v36 = vpop.f32.mrf.mxu0  ;;  %v5045_v44 = vadd.f32 %v9870_v46, %v4532_v26  ;;  %v9997_v26 = vpop.permute.xlu1 %4671 }
 0x426   : > { %v5225_v32 = vpop.f32.mrf.mxu1  ;;  %10653 = vst [vmem:[#allocation20_spill] sm:$0xff] %v9997_v26 }
 0x427   : > { %v5226_v7 = vadd.f32 %v5225_v32, %v5033_v31  ;;  %v5381_v50 = vmax.f32 %v5224_v61, 0.0 }
 0x428   : > { %v5227_v19 = vpop.f32.mrf.mxu1 }
 0x429   : > { %v5382_v55 = vmax.f32 %v5226_v7, 0.0  ;;  %v5228_v57 = vadd.f32 %v5227_v19, %v5035_v52  ;;  %v9985_v7 = vpop.f32.mrf.mxu0 }
 0x42a   : > { %v5231_v40 = vpop.f32.mrf.mxu1 }
 0x42b   : > { %v9977_v3 = vpack.c.bf16 %v5382_v55, %v5380_v4  ;;  %v5383_v39 = vmax.f32 %v5228_v57, 0.0  ;;  %v5232_v1 = vadd.f32 %v5231_v40, %v5039_v54 }
 0x42c   : > { %v5233_v8 = vpop.f32.mrf.mxu1 }
 0x42d   : > { %10648 = vst [vmem:[#allocation14_spill] sm:$0xff] %v9977_v3  ;;  %v9982_v31 = vpack.c.bf16 %v5383_v39, %v5381_v50  ;;  %v5234_v32 = vadd.f32 %v5233_v8, %v5041_v22  ;;  %v5384_v57 = vmax.f32 %v5232_v1, 0.0  ;;  %v9993_v22 = vpop.f32.mrf.mxu0  ;;  %v9999_v50 = vpop.permute.xlu0 %4666 }
 0x42e   : > { %v5235_v23 = vpop.f32.mrf.mxu1  ;;  %10654 = vst [vmem:[#allocation21_spill] sm:$0xff] %v9999_v50 }
 0x42f   : > { %10649 = vst [vmem:[#allocation16_spill] sm:$0xff] %v9982_v31  ;;  %v5236_v52 = vadd.f32 %v5235_v23, %v5043_v14  ;;  %v5385_v4 = vmax.f32 %v5234_v32, 0.0  ;;  %v10005_v1 = vpop.f32.mrf.mxu0  ;;  %v10011_v32 = vpop.permute.xlu1 %4661 }
 0x430   : > { %v5237_v24 = vpop.f32.mrf.mxu1  ;;  %10658 = vst [vmem:[#allocation25_spill] sm:$0xff] %v10011_v32 }
 0x431   : > { %v5386_v61 = vmax.f32 %v5236_v52, 0.0  ;;  %v5238_v19 = vadd.f32 %v5237_v24, %v5045_v44  ;;  %v10013_v23 = vpop.permute.xlu0 %4656  ;;  %v10015_v44 = vpop.f32.mrf.mxu0 }
 0x432   : > { %v5241_v54 = vpop.f32.mrf.mxu1  ;;  %10659 = vst [vmem:[#allocation39_spill] sm:$0xff] %v10013_v23  ;;  %10660 = vst [vmem:[#allocation26_spill] sm:$0xff] %v10015_v44  ;;  %v7182_v23 = vld [vmem:[%s10399_s5 + $0x4] ss:$8 sps:$4 sm:$0xff]  }
 0x433   : > { %v9989_v55 = vpack.c.bf16 %v5386_v61, %v5384_v57  ;;  %v5387_v13 = vmax.f32 %v5238_v19, 0.0  ;;  %v9991_v40 = vadd.f32 %v5241_v54, %v5049_v25  ;;  %v10021_v25 = vpop.f32.mrf.mxu0  ;;  %v10025_v61 = vpop.permute.xlu1 %4651  ;;  %5700 = vmatprep.mubr.bf16.mxu0 %v7182_v23 }
 0x434   : > { %v9995_v46 = vpop.f32.mrf.mxu1  ;;  %10662 = vst [vmem:[#allocation28_spill] sm:$0xff] %v10021_v25  ;;  %10663 = vst [vmem:[#allocation29_spill] sm:$0xff] %v10025_v61 }
 0x435   : > { %10650 = vst [vmem:[#allocation17_spill] sm:$0xff] %v9989_v55  ;;  %10651 = vst [vmem:[#allocation18_spill] sm:$0xff] %v9991_v40  ;;  %v10001_v39 = vpack.c.bf16 %v5387_v13, %v5385_v4  ;;  %v10027_v19 = vpop.permute.xlu0 %4646  ;;  %v10031_v4 = vpop.f32.mrf.mxu0 }
 0x436   : > { %10652 = vst [vmem:[#allocation19_spill] sm:$0xff] %v9995_v46  ;;  %v10003_v5 = vpop.f32.mrf.mxu1  ;;  %10664 = vst [vmem:[#allocation41_spill] sm:$0xff] %v10027_v19 }
 0x437   : > { %10655 = vst [vmem:[#allocation22_spill] sm:$0xff] %v10001_v39  ;;  %10656 = vst [vmem:[#allocation23_spill] sm:$0xff] %v10003_v5  ;;  %v10040_v50 = vpop.permute.xlu1 %4641  ;;  %v10044_v61 = vpop.f32.mrf.mxu0 }
 0x438   : > { %v10007_v8 = vpop.f32.mrf.mxu1  ;;  %10665 = vst [vmem:[#allocation30_spill] sm:$0xff] %v10031_v4  ;;  %10666 = vst [vmem:[#allocation31_spill] sm:$0xff] %v10040_v50 }
 0x439   : > { %v10042_v32 = vpop.permute.xlu0 %4636  ;;  %10668 = vst [vmem:[#allocation33_spill] sm:$0xff] %v10044_v61  ;;  %v10050_v4 = vpop.f32.mrf.mxu0 }
 0x43a   : > { %v10009_v14 = vpop.f32.mrf.mxu1  ;;  %10667 = vst [vmem:[#allocation32_spill] sm:$0xff] %v10042_v32  ;;  %10669 = vst [vmem:[#allocation34_spill] sm:$0xff] %v10050_v4 }
 0x43b   : > { %10657 = vst [vmem:[#allocation24_spill] sm:$0xff] %v10009_v14  ;;  %v10054_v55 = vpop.permute.xlu1 %4631  ;;  %v10060_v23 = vpop.f32.mrf.mxu0 }
 0x43c   : > { %v10017_v52 = vpop.f32.mrf.mxu1  ;;  %10670 = vst [vmem:[#allocation35_spill] sm:$0xff] %v10054_v55  ;;  %10672 = vst [vmem:[#allocation37_spill] sm:$0xff] %v10060_v23  ;;  %v10076_v23 = vadd.f32 %v9880_v34, %v9955_v11  ;;  %v10096_v34 = vadd.f32 %v9905_v47, %v9953_v42  ;;  %v10108_v11 = vadd.f32 %v9913_v27, %v9945_v35 }
 0x43d   : > { %v10056_v39 = vpop.permute.xlu0 %4626  ;;  %v10066_v14 = vpop.f32.mrf.mxu0  ;;  %v5079_v47 = vadd.f32 %v9917_v17, %v9935_v33  ;;  %v5103_v27 = vadd.f32 %v9961_v51, %v9925_v0  ;;  %v5085_v17 = vadd.f32 %v9929_v10, %v9939_v2  ;;  %v5093_v10 = vadd.f32 %v9943_v48, %v9931_v53 }
 0x43e   : > { %v10019_v24 = vpop.f32.mrf.mxu1  ;;  %10671 = vst [vmem:[#allocation36_spill] sm:$0xff] %v10056_v39  ;;  %10675 = vst [vmem:[#allocation42_spill] sm:$0xff] %v10066_v14  ;;  %v10084_v14 = vadd.f32 %v9890_v30, %v9959_v15  ;;  %v10102_v30 = vadd.f32 %v9909_v6, %v9941_v12  ;;  %v5081_v6 = vadd.f32 %v9919_v18, %v9935_v33 }
 0x43f   : > { %10661 = vst [vmem:[#allocation27_spill] sm:$0xff] %v10019_v24  ;;  %v10062_v5 = vpop.permute.xlu1 %4621  ;;  %v10068_v25 = vpop.f32.mrf.mxu0  ;;  %10677 = vst [vmem:[#allocation44_spill] sm:$0xff] %v10076_v23  ;;  %v10092_v24 = vadd.f32 %v9900_v28, %v9949_v20  ;;  %v5075_v28 = vadd.f32 %v9915_v9, %v9945_v35  ;;  %v5083_v9 = vadd.f32 %v9923_v49, %v9939_v2  ;;  %v10681_v2 = vld [vmem:[#allocation10_spill] sm:$0xff] }
 0x440   : > { %v10023_v57 = vpop.f32.mrf.mxu1  ;;  %10673 = vst [vmem:[#allocation38_spill] sm:$0xff] %v10062_v5  ;;  %10676 = vst [vmem:[#allocation43_spill] sm:$0xff] %v10068_v25  ;;  %v10080_v5 = vadd.f32 %v9888_v60, %v9959_v15  ;;  %v10088_v25 = vadd.f32 %v9898_v21, %v9949_v20  ;;  %v5065_v60 = vadd.f32 %v9907_v16, %v9953_v42 }
 0x441   : > { %v10064_v61 = vpop.permute.xlu0 %4616  ;;  %v5071_v21 = vadd.f32 %v9911_v29, %v9941_v12  ;;  %v10114_v20 = vpop.f32.mrf.mxu0  ;;  %v5095_v42 = vadd.f32 %v9947_v59, %v9931_v53  ;;  %v5101_v29 = vadd.f32 %v9957_v43, %v9921_v41  ;;  %v5091_v12 = vadd.f32 %v9937_v37, %v9927_v45 }
 0x442   : > { %v10029_v54 = vpop.f32.mrf.mxu1  ;;  %10674 = vst [vmem:[#allocation40_spill] sm:$0xff] %v10064_v61  ;;  %10678 = vst [vmem:[#allocation45_spill] sm:$0xff] %v10080_v5  ;;  %v5099_v18 = vadd.f32 %v9951_v56, %v9921_v41  ;;  %v5105_v43 = vadd.f32 %v9963_v38, %v9925_v0  ;;  %v5089_v49 = vadd.f32 %v9933_v58, %v9927_v45 }
 0x443   : > { %v10070_v55 = vpop.permute.xlu1 %4611  ;;  %10679 = vst [vmem:[#allocation46_spill] sm:$0xff] %v10088_v25  ;;  %10680 = vst [vmem:[#allocation47_spill] sm:$0xff] %v10114_v20  ;;  %v10139_v5 = vpop.f32.mrf.mxu0 }
 0x444   : > { %v10033_v13 = vpop.f32.mrf.mxu1 }
 0x445   : > { %v10072_v39 = vpop.permute.xlu0 %4606 }
 0x446   : > { %v10038_v26 = vpop.f32.mrf.mxu1 }
 0x447   : > { %v4602_v35 = vpop.permute.xlu1 %4601 }
 0x448   : > { %v10046_v19 = vpop.f32.mrf.mxu1  ;;  %v5113_v23 = vadd.f32 %v9973_v62, %v4602_v35 }
 0x449   : > { %v4597_v59 = vpop.permute.xlu0 %4596 }
 0x44a   : > { %v10048_v3 = vpop.f32.mrf.mxu1  ;;  %v5109_v37 = vadd.f32 %v10681_v2, %v4597_v59  ;;  %v5111_v25 = vadd.f32 %v9969_v63, %v4597_v59 }
 0x44c   : > { %v10052_v31 = vpop.f32.mrf.mxu1 }
 0x44d   : > { %v5274_v63 = vadd.f32 %v10052_v31, %v5081_v6 }
 0x44e   : > { %v10058_v40 = vpop.f32.mrf.mxu1 }
 0x450   : > { %v5277_v50 = vpop.f32.mrf.mxu1 }
 0x452   : > { %v5281_v32 = vpop.f32.mrf.mxu1 }
 0x453   : > { %v5282_v62 = vadd.f32 %v5281_v32, %v5089_v49 }
 0x454   : > { %v5283_v46 = vpop.f32.mrf.mxu1 }
 0x455   : > { %v5284_v0 = vadd.f32 %v5283_v46, %v5091_v12 }
 0x456   : > { %v5285_v4 = vpop.f32.mrf.mxu1 }
 0x458   : > { %v5287_v44 = vpop.f32.mrf.mxu1 }
 0x459   : > { %v5288_v15 = vadd.f32 %v5287_v44, %v5095_v42  ;;  %v5115_v44 = vadd.f32 %v9979_v36, %v4602_v35  ;;  %v5286_v42 = vadd.f32 %v5285_v4, %v5093_v10  ;;  %v5268_v36 = vadd.f32 %v10046_v19, %v5075_v28 }
 0x45a   : > { %v5291_v61 = vpop.f32.mrf.mxu1  ;;  %v5264_v19 = vadd.f32 %v10033_v13, %v5071_v21  ;;  %v5401_v28 = vmax.f32 %v5274_v63, 0.0  ;;  %v10686_v63 = vld [vmem:[#allocation44_spill] sm:$0xff] }
 0x45b   : > { %v5292_v41 = vadd.f32 %v5291_v61, %v5099_v18  ;;  %v5119_v61 = vadd.f32 %v9985_v7, %v10072_v39  ;;  %v10146_v18 = vpop.f32.mrf.mxu0  ;;  %v5406_v35 = vmax.f32 %v5286_v42, 0.0  ;;  %v5121_v7 = vadd.f32 %v9993_v22, %v10072_v39 }
 0x45c   : > { %v5293_v16 = vpop.f32.mrf.mxu1 }
 0x45d   : > { %v5294_v51 = vadd.f32 %v5293_v16, %v5101_v29  ;;  %v5278_v16 = vadd.f32 %v5277_v50, %v5085_v17  ;;  %v5407_v29 = vmax.f32 %v5288_v15, 0.0  ;;  %v5408_v46 = vmax.f32 %v5292_v41, 0.0  ;;  %v10154_v6 = vpop.f32.mrf.mxu0 }
 0x45e   : > { %v5295_v33 = vpop.f32.mrf.mxu1  ;;  %v5405_v50 = vmax.f32 %v5284_v0, 0.0  ;;  %v5276_v17 = vadd.f32 %v10058_v40, %v5083_v9  ;;  %v5258_v15 = vadd.f32 %v10023_v57, %v5065_v60  ;;  %v5404_v40 = vmax.f32 %v5282_v62, 0.0  ;;  %v10687_v62 = vld [vmem:[#allocation19_spill] sm:$0xff] }
 0x45f   : > { %v5296_v20 = vadd.f32 %v5295_v33, %v5103_v27  ;;  %v5409_v53 = vmax.f32 %v5294_v51, 0.0  ;;  %v5403_v33 = vmax.f32 %v5278_v16, 0.0  ;;  %v5266_v51 = vadd.f32 %v10038_v26, %v10108_v11  ;;  %v10164_v41 = vpop.f32.mrf.mxu0 }
 0x460   : > { %v5297_v56 = vpop.f32.mrf.mxu1  ;;  %v5457_v31 = vpack.c.bf16 %v5407_v29, %v5405_v50  ;;  %v5399_v57 = vmax.f32 %v5268_v36, 0.0  ;;  %v5456_v10 = vpack.c.bf16 %v5406_v35, %v5404_v40  ;;  %v5254_v26 = vadd.f32 %v10017_v52, %v10092_v24  ;;  %v10689_v36 = vld [vmem:[#allocation24_spill] sm:$0xff] }
 0x461   : > { %v5298_v38 = vadd.f32 %v5297_v56, %v5105_v43  ;;  %v5410_v45 = vmax.f32 %v5296_v20, 0.0  ;;  %v5455_v60 = vpack.c.bf16 %v5403_v33, %v5401_v28  ;;  %v5262_v11 = vadd.f32 %v10029_v54, %v10102_v30  ;;  %v10683_v54 = vld [vmem:[#allocation26_spill] sm:$0xff]  ;;  %v10691_v33 = vld [vmem:[#allocation23_spill] sm:$0xff] }
 0x462   : > { %v5301_v58 = vpop.f32.mrf.mxu1  ;;  %v5398_v29 = vmax.f32 %v5266_v51, 0.0  ;;  %v5125_v30 = vadd.f32 %v10683_v54, %v10070_v55  ;;  %v5393_v50 = vmax.f32 %v5254_v26, 0.0  ;;  %v10696_v54 = vld [vmem:[#allocation14_spill] sm:$0xff] }
 0x463   : > { %v5411_v48 = vmax.f32 %v5298_v38, 0.0  ;;  %v5302_v27 = vadd.f32 %v5301_v58, %v5109_v37  ;;  %v5458_v59 = vpack.c.bf16 %v5410_v45, %v5408_v46  ;;  %v5248_v38 = vadd.f32 %v10007_v8, %v10084_v14  ;;  %v10180_v14 = vpop.f32.mrf.mxu0 }
 0x464   : > { %v5303_v12 = vpop.f32.mrf.mxu1  ;;  %v5395_v58 = vmax.f32 %v5258_v15, 0.0  ;;  %v5244_v46 = vadd.f32 %v10687_v62, %v10686_v63 }
 0x465   : > { %v5459_v4 = vpack.c.bf16 %v5411_v48, %v5409_v53  ;;  %v5304_v20 = vadd.f32 %v5303_v12, %v5111_v25  ;;  %v5272_v25 = vadd.f32 %v10048_v3, %v5079_v47  ;;  %v5412_v49 = vmax.f32 %v5302_v27, 0.0  ;;  %v10684_v53 = vld [vmem:[#allocation40_spill] sm:$0xff]  ;;  %v10688_v12 = vld [vmem:[#allocation46_spill] sm:$0xff]  ;;  %v10192_v51 = vpop.f32.mrf.mxu0 }
 0x466   : > { %v5305_v43 = vpop.f32.mrf.mxu1  ;;  %v5123_v47 = vadd.f32 %v10005_v1, %v10070_v55  ;;  %v10682_v1 = vld [vmem:[#allocation27_spill] sm:$0xff]  ;;  %v10685_v48 = vld [vmem:[#allocation28_spill] sm:$0xff] }
 0x467   : > { %v5306_v32 = vadd.f32 %v5305_v43, %v5113_v23  ;;  %5668 = vmatprep.subr.bf16.mxu0 %v5459_v4  ;;  %v5402_v23 = vmax.f32 %v5276_v17, 0.0  ;;  %v5413_v37 = vmax.f32 %v5304_v20, 0.0  ;;  %v5400_v56 = vmax.f32 %v5272_v25, 0.0  ;;  %v10690_v17 = vld [vmem:[#allocation45_spill] sm:$0xff] }
 0x468   : > { %v5307_v9 = vpop.f32.mrf.mxu1  ;;  %5669 = vmatpush1.bf16.msra.mxu0 %v5458_v59  ;;  %v5256_v45 = vadd.f32 %v10682_v1, %v10096_v34  ;;  %v5129_v27 = vadd.f32 %v10685_v48, %v10684_v53  ;;  %v5252_v34 = vadd.f32 %v10689_v36, %v10688_v12  ;;  %v5396_v4 = vmax.f32 %v5262_v11, 0.0 }
 0x469   : > { %v5414_v22 = vmax.f32 %v5306_v32, 0.0  ;;  %v5308_v39 = vadd.f32 %v5307_v9, %v5115_v44  ;;  %5670 = vmatprep.subr.bf16.mxu0 %v5457_v31  ;;  %v5397_v44 = vmax.f32 %v5264_v19, 0.0  ;;  %v5454_v52 = vpack.c.bf16 %v5402_v23, %v5400_v56 }
 0x46a   : > { %v5311_v2 = vpop.f32.mrf.mxu1  ;;  %v5246_v55 = vadd.f32 %v10691_v33, %v10690_v17  ;;  %v5394_v15 = vmax.f32 %v5256_v45, 0.0  ;;  %v5451_v31 = vpack.c.bf16 %v5395_v58, %v5393_v50  ;;  %v5452_v32 = vpack.c.bf16 %v5398_v29, %v5396_v4  ;;  %v10694_v45 = vld [vmem:[#allocation17_spill] sm:$0xff]  ;;  %v10695_v58 = vld [vmem:[#allocation16_spill] sm:$0xff] }
 0x46b   : > { %v10160_v13 = vpack.c.bf16 %v5414_v22, %v5412_v49  ;;  %v5415_v3 = vmax.f32 %v5308_v39, 0.0  ;;  %v5312_v21 = vadd.f32 %v5311_v2, %v5119_v61  ;;  %v5453_v61 = vpack.c.bf16 %v5399_v57, %v5397_v44 }
 0x46c   : > { %v5313_v0 = vpop.f32.mrf.mxu1  ;;  %5671 = vmatpush1.bf16.msra.mxu0 %v5456_v10  ;;  %v5392_v49 = vmax.f32 %v5252_v34, 0.0  ;;  %v5389_v39 = vmax.f32 %v5244_v46, 0.0  ;;  %v5390_v23 = vmax.f32 %v5246_v55, 0.0 }
 0x46d   : > { %v10172_v16 = vpack.c.bf16 %v5415_v3, %v5413_v37  ;;  %v5314_v42 = vadd.f32 %v5313_v0, %v5121_v7  ;;  %5672 = vmatprep.subr.bf16.mxu0 %v5455_v60  ;;  %v5416_v35 = vmax.f32 %v5312_v21, 0.0  ;;  %v5391_v7 = vmax.f32 %v5248_v38, 0.0  ;;  %v5162_v37 = vpop.f32.mrf.mxu0  ;;  %v10692_v3 = vld [vmem:[#allocation18_spill] sm:$0xff] }
 0x46e   : > { %v5315_v24 = vpop.f32.mrf.mxu1  ;;  %v5450_v60 = vpack.c.bf16 %v5394_v15, %v5392_v49  ;;  %v5388_v21 = vmax.f32 %v10692_v3, 0.0  ;;  %v10693_v38 = vld [vmem:[#allocation22_spill] sm:$0xff] }
 0x46f   : > { %v5316_v8 = vadd.f32 %v5315_v24, %v5123_v47  ;;  %v5417_v25 = vmax.f32 %v5314_v42, 0.0  ;;  %v5449_v2 = vpack.c.bf16 %v5391_v7, %v5389_v39  ;;  %v5164_v56 = vpop.f32.mrf.mxu0  ;;  %v10698_v7 = vld [vmem:[#allocation21_spill] sm:$0xff] }
 0x470   : > { %v5317_v20 = vpop.f32.mrf.mxu1  ;;  %5673 = vmatpush1.bf16.msra.mxu0 %v5454_v52  ;;  %v5448_v26 = vpack.c.bf16 %v5390_v23, %v5388_v21 }
 0x471   : > { %v5418_v59 = vmax.f32 %v5316_v8, 0.0  ;;  %v5318_v43 = vadd.f32 %v5317_v20, %v5125_v30  ;;  %5674 = vmatprep.subr.bf16.mxu0 %v5453_v61  ;;  %v5168_v42 = vpop.f32.mrf.mxu0 }
 0x472   : > { %v5321_v19 = vpop.f32.mrf.mxu1 }
 0x473   : > { %v10188_v28 = vpack.c.bf16 %v5418_v59, %v5416_v35  ;;  %v5419_v40 = vmax.f32 %v5318_v43, 0.0  ;;  %v10190_v9 = vadd.f32 %v5321_v19, %v5129_v27  ;;  %v5170_v52 = vpop.f32.mrf.mxu0  ;;  %v10697_v59 = vld [vmem:[#allocation25_spill] sm:$0xff]  ;;  %v10700_v19 = vld [vmem:[#allocation39_spill] sm:$0xff] }
 0x474   : > { %v10194_v22 = vpop.f32.mrf.mxu1  ;;  %5675 = vmatpush1.bf16.msra.mxu0 %v5452_v32 }
 0x475   : > { %v10196_v57 = vpack.c.bf16 %v5419_v40, %v5417_v25  ;;  %5676 = vmatprep.subr.bf16.mxu0 %v5451_v31  ;;  %v5172_v48 = vpop.f32.mrf.mxu0  ;;  %v10699_v31 = vld [vmem:[#allocation20_spill] sm:$0xff]  ;;  %v5171_v25 = vadd.f32 %v5170_v52, %v10700_v19  ;;  %v5169_v52 = vadd.f32 %v5168_v42, %v10700_v19 }
 0x476   : > { %v10198_v10 = vpop.f32.mrf.mxu1  ;;  %v5173_v3 = vadd.f32 %v5172_v48, %v10697_v59 }
 0x477   : > { %v5174_v8 = vpop.f32.mrf.mxu0 }
 0x478   : > { %v10201_v47 = vpop.f32.mrf.mxu1  ;;  %5677 = vmatpush1.bf16.msra.mxu0 %v5450_v60  ;;  %v5175_v43 = vadd.f32 %v5174_v8, %v10697_v59  ;;  %v10702_v8 = vld [vmem:[#allocation41_spill] sm:$0xff]  ;;  %v10703_v59 = vld [vmem:[#allocation31_spill] sm:$0xff] }
 0x479   : > { %5678 = vmatprep.subr.bf16.mxu0 %v5449_v2  ;;  %v5178_v46 = vpop.f32.mrf.mxu0 }
 0x47a   : > { %v10203_v11 = vpop.f32.mrf.mxu1  ;;  %v5179_v40 = vadd.f32 %v5178_v46, %v10698_v7 }
 0x47b   : > { %v5180_v34 = vpop.f32.mrf.mxu0 }
 0x47c   : > { %v10205_v0 = vpop.f32.mrf.mxu1  ;;  %5679 = vmatpush1.bf16.msra.mxu0 %v5448_v26  ;;  %v5181_v15 = vadd.f32 %v5180_v34, %v10698_v7  ;;  %v5161_v34 = vadd.f32 %v10192_v51, %v10702_v8  ;;  %v5159_v51 = vadd.f32 %v10180_v14, %v10702_v8  ;;  %v10710_v8 = vld [vmem:[#allocation38_spill] sm:$0xff] }
 0x47d   : > { %5680 = vmatprep.subr.bf16.mxu0 %v10693_v38  ;;  %v5182_v20 = vpop.f32.mrf.mxu0  ;;  %v10701_v38 = vld [vmem:[#allocation29_spill] sm:$0xff] }
 0x47e   : > { %v10208_v44 = vpop.f32.mrf.mxu1  ;;  %v5183_v32 = vadd.f32 %v5182_v20, %v10699_v31 }
 0x47f   : > { %v5184_v55 = vpop.f32.mrf.mxu0 }
 0x480   : > { %v10210_v1 = vpop.f32.mrf.mxu1  ;;  %5681 = vmatpush1.bf16.msra.mxu0 %v10694_v45  ;;  %v5185_v39 = vadd.f32 %v5184_v55, %v10699_v31  ;;  %v5165_v45 = vadd.f32 %v5164_v56, %v10701_v38  ;;  %v5155_v56 = vadd.f32 %v10164_v41, %v10703_v59 }
 0x481   : > { %5682 = vmatprep.subr.bf16.mxu0 %v10695_v58 }
 0x482   : > { %v10214_v29 = vpop.f32.mrf.mxu1 }
 0x484   : > { %v10216_v24 = vpop.f32.mrf.mxu1  ;;  %5683 = vmatpush1.bf16.msra.mxu0 %v10696_v54 }
 0x486   : > { %v10219_v30 = vpop.f32.mrf.mxu1 }
 0x488   : > { %v5347_v27 = vpop.f32.mrf.mxu1 }
 0x48a   : > { %v5351_v61 = vpop.f32.mrf.mxu1 }
 0x48b   : > { %v5352_v41 = vadd.f32 %v5351_v61, %v5159_v51 }
 0x48c   : > { %v5353_v63 = vpop.f32.mrf.mxu1 }
 0x48e   : > { %v5355_v62 = vpop.f32.mrf.mxu1 }
 0x490   : > { %v5357_v12 = vpop.f32.mrf.mxu1 }
 0x491   : > { %v5358_v7 = vadd.f32 %v5357_v12, %v5165_v45  ;;  %v10704_v12 = vld [vmem:[#allocation32_spill] sm:$0xff]  ;;  %v10709_v45 = vld [vmem:[#allocation43_spill] sm:$0xff] }
 0x492   : > { %v5361_v36 = vpop.f32.mrf.mxu1  ;;  %v5151_v19 = vadd.f32 %v10146_v18, %v10704_v12  ;;  %v5149_v18 = vadd.f32 %v10139_v5, %v10704_v12  ;;  %v10711_v5 = vld [vmem:[#allocation34_spill] sm:$0xff] }
 0x493   : > { %v5362_v48 = vadd.f32 %v5361_v36, %v5169_v52  ;;  %v5153_v36 = vadd.f32 %v10154_v6, %v10703_v59 }
 0x494   : > { %v5363_v50 = vpop.f32.mrf.mxu1  ;;  %v5344_v14 = vadd.f32 %v10216_v24, %v5151_v19  ;;  %v5342_v24 = vadd.f32 %v10214_v29, %v5149_v18 }
 0x495   : > { %v5364_v58 = vadd.f32 %v5363_v50, %v5171_v25  ;;  %v5354_v50 = vadd.f32 %v5353_v63, %v5161_v34  ;;  %v5348_v25 = vadd.f32 %v5347_v27, %v5155_v56  ;;  %v5436_v63 = vmax.f32 %v5362_v48, 0.0 }
 0x496   : > { %v5365_v4 = vpop.f32.mrf.mxu1  ;;  %v5346_v27 = vadd.f32 %v10219_v30, %v5153_v36  ;;  %v5135_v34 = vadd.f32 %v10711_v5, %v10710_v8  ;;  %v5429_v52 = vmax.f32 %v5344_v14, 0.0  ;;  %v5428_v56 = vmax.f32 %v5342_v24, 0.0  ;;  %v7197_v36 = vld [vmem:[%s10399_s5 + $0x54] ss:$8 sps:$4 sm:$0xff]   ;;  %v5511_v14 = vpop.permute.xlu0 %5510 }
 0x497   : > { %v5366_v46 = vadd.f32 %v5365_v4, %v5173_v3  ;;  %v10707_v3 = vld [vmem:[#allocation36_spill] sm:$0xff] }
 0x498   : > { %v5367_v17 = vpop.f32.mrf.mxu1  ;;  %v5328_v29 = vadd.f32 %v10201_v47, %v5135_v34 }
 0x499   : > { %v5368_v23 = vadd.f32 %v5367_v17, %v5175_v43  ;;  %v5163_v43 = vadd.f32 %v5162_v37, %v10701_v38  ;;  %v5438_v4 = vmax.f32 %v5366_v46, 0.0  ;;  %v10712_v46 = vld [vmem:[#allocation37_spill] sm:$0xff] }
 0x49a   : > { %v5371_v33 = vpop.f32.mrf.mxu1 }
 0x49b   : > { %v5372_v21 = vadd.f32 %v5371_v33, %v5179_v40  ;;  %v5439_v55 = vmax.f32 %v5368_v23, 0.0  ;;  %v5356_v42 = vadd.f32 %v5355_v62, %v5163_v43  ;;  %v5435_v40 = vmax.f32 %v5358_v7, 0.0 }
 0x49c   : > { %v5373_v35 = vpop.f32.mrf.mxu1  ;;  %v5433_v62 = vmax.f32 %v5354_v50, 0.0  ;;  %v5430_v7 = vmax.f32 %v5346_v27, 0.0 }
 0x49d   : > { %v5374_v60 = vadd.f32 %v5373_v35, %v5181_v15  ;;  %v5440_v33 = vmax.f32 %v5372_v21, 0.0  ;;  %v5437_v15 = vmax.f32 %v5364_v58, 0.0  ;;  %v10708_v21 = vld [vmem:[#allocation42_spill] sm:$0xff] }
 0x49e   : > { %v5375_v49 = vpop.f32.mrf.mxu1  ;;  %v5141_v6 = vadd.f32 %v10708_v21, %v10707_v3  ;;  %v5471_v38 = vpack.c.bf16 %v5435_v40, %v5433_v62  ;;  %v5468_v51 = vpack.c.bf16 %v5430_v7, %v5428_v56  ;;  %v7194_v40 = vld [vmem:[%s10399_s5 + $0x44] ss:$8 sps:$4 sm:$0xff]  }
 0x49f   : > { %v5376_v2 = vadd.f32 %v5375_v49, %v5183_v32  ;;  %v5441_v17 = vmax.f32 %v5374_v60, 0.0  ;;  %v5473_v37 = vpack.c.bf16 %v5439_v55, %v5437_v15  ;;  %v10705_v49 = vld [vmem:[#allocation35_spill] sm:$0xff]  ;;  %v5434_v60 = vmax.f32 %v5356_v42, 0.0 }
 0x4a0   : > { %v5377_v26 = vpop.f32.mrf.mxu1  ;;  %v5143_v58 = vadd.f32 %v10709_v45, %v10705_v49  ;;  %v5334_v30 = vadd.f32 %v10205_v0, %v5141_v6 }
 0x4a1   : > { %v5378_v54 = vadd.f32 %v5377_v26, %v5185_v39  ;;  %v5442_v20 = vmax.f32 %v5376_v2, 0.0  ;;  %v10706_v39 = vld [vmem:[#allocation47_spill] sm:$0xff]  ;;  %v5472_v2 = vpack.c.bf16 %v5438_v4, %v5436_v63  ;;  %v5431_v26 = vmax.f32 %v5348_v25, 0.0  ;;  %v7200_v63 = vld [vmem:[%s10399_s5 + $0x64] ss:$8 sps:$4 sm:$0xff]  }
 0x4a2   : > { %v5145_v23 = vadd.f32 %v10706_v39, %v10705_v49  ;;  %v5425_v15 = vmax.f32 %v5334_v30, 0.0  ;;  %v7189_v25 = vld [vmem:[%s10399_s5 + $0x30] ss:$8 sps:$4 sm:$0xff]   ;;  %v7198_v49 = vld [vmem:[%s10399_s5 + $0x60] ss:$8 sps:$4 sm:$0xff]  }
 0x4a3   : > { %v5443_v35 = vmax.f32 %v5378_v54, 0.0  ;;  %v5474_v32 = vpack.c.bf16 %v5442_v20, %v5440_v33  ;;  %v5432_v54 = vmax.f32 %v5352_v41, 0.0  ;;  %v5139_v20 = vadd.f32 %v10712_v46, %v10707_v3  ;;  %v10714_v33 = vld [vmem:[#allocation33_spill] sm:$0xff]  ;;  %v7195_v41 = vld [vmem:[%s10399_s5 + $0x50] ss:$8 sps:$4 sm:$0xff]  }
 0x4a4   : > { %v5338_v61 = vadd.f32 %v10210_v1, %v5145_v23  ;;  %v5336_v1 = vadd.f32 %v10208_v44, %v5143_v58  ;;  %v5469_v48 = vpack.c.bf16 %v5431_v26, %v5429_v52  ;;  %v5133_v59 = vadd.f32 %v10714_v33, %v10710_v8  ;;  %v7203_v39 = vld [vmem:[%s10399_s5 + $0x74] ss:$8 sps:$4 sm:$0xff]   ;;  %v7201_v23 = vld [vmem:[%s10399_s5 + $0x70] ss:$8 sps:$4 sm:$0xff]   ;;  %v5521_v58 = vpop.permute.xlu0 %5520 }
 0x4a5   : > { %v5475_v31 = vpack.c.bf16 %v5443_v35, %v5441_v17  ;;  %v5470_v55 = vpack.c.bf16 %v5434_v60, %v5432_v54  ;;  %v10713_v17 = vld [vmem:[#allocation30_spill] sm:$0xff]  ;;  %v5332_v0 = vadd.f32 %v10203_v11, %v5139_v20  ;;  %v5420_v11 = vmax.f32 %v10190_v9, 0.0  ;;  %v7185_v9 = vld [vmem:[%s10399_s5 + $0x14] ss:$8 sps:$4 sm:$0xff]  }
 0x4a6   : > { %v5131_v35 = vadd.f32 %v10713_v17, %v10684_v53  ;;  %v5427_v43 = vmax.f32 %v5338_v61, 0.0  ;;  %v5326_v44 = vadd.f32 %v10198_v10, %v5133_v59  ;;  %v5423_v53 = vmax.f32 %v5328_v29, 0.0  ;;  %v7180_v10 = vld [vmem:[%s10399_s5] ss:$8 sps:$4 sm:$0xff]  }
 0x4a7   : > { %5684 = vmatprep.subr.bf16.mxu0 %v5475_v31  ;;  %v5426_v31 = vmax.f32 %v5336_v1, 0.0  ;;  %v5424_v47 = vmax.f32 %v5332_v0, 0.0 }
 0x4a8   : > { %5685 = vmatpush2.bf16.msra.mxu0 %v5474_v32  ;;  %v5324_v50 = vadd.f32 %v10194_v22, %v5131_v35  ;;  %v5467_v42 = vpack.c.bf16 %v5427_v43, %v5425_v15  ;;  %v5422_v32 = vmax.f32 %v5326_v44, 0.0  ;;  %v5531_v43 = vpop.permute.xlu0 %5530 }
 0x4a9   : > { %5686 = vmatprep.subr.bf16.mxu0 %v5473_v37  ;;  %v5466_v12 = vpack.c.bf16 %v5426_v31, %v5424_v47  ;;  %v7192_v37 = vld [vmem:[%s10399_s5 + $0x40] ss:$8 sps:$4 sm:$0xff]  }
 0x4aa   : > { %v5421_v4 = vmax.f32 %v5324_v50, 0.0  ;;  %v5464_v22 = vpack.c.bf16 %v5422_v32, %v5420_v11 }
 0x4ac   : > { %5687 = vmatpush2.bf16.msra.mxu0 %v5472_v2  ;;  %v5465_v19 = vpack.c.bf16 %v5423_v53, %v5421_v4  ;;  %v5516_v2 = vpop.permute.xlu1 %5515 }
 0x4ad   : > { %5688 = vmatprep.subr.bf16.mxu0 %v5471_v38 }
 0x4b0   : > { %5689 = vmatpush2.bf16.msra.mxu0 %v5470_v55  ;;  %v5526_v46 = vpop.permute.xlu1 %5525 }
 0x4b1   : > { %5690 = vmatprep.subr.bf16.mxu0 %v5469_v48 }
 0x4b4   : > { %5691 = vmatpush2.bf16.msra.mxu0 %v5468_v51  ;;  %v5536_v44 = vpop.permute.xlu1 %5535 }
 0x4b5   : > { %5692 = vmatprep.subr.bf16.mxu0 %v5467_v42 }
 0x4b8   : > { %5693 = vmatpush2.bf16.msra.mxu0 %v5466_v12  ;;  %v5541_v12 = vpop.permute.xlu0 %5540 }
 0x4b9   : > { %5694 = vmatprep.subr.bf16.mxu0 %v5465_v19 }
 0x4bc   : > { %5695 = vmatpush2.bf16.msra.mxu0 %v5464_v22 }
 0x4bd   : > { %5696 = vmatprep.subr.bf16.mxu0 %v10196_v57  ;;  %v7183_v57 = vld [vmem:[%s10399_s5 + $0x10] ss:$8 sps:$4 sm:$0xff]  }
 0x4c0   : > { %5697 = vmatpush2.bf16.msra.mxu0 %v10188_v28  ;;  %v7191_v28 = vld [vmem:[%s10399_s5 + $0x34] ss:$8 sps:$4 sm:$0xff]  }
 0x4c1   : > { %5698 = vmatprep.subr.bf16.mxu0 %v10172_v16  ;;  %v7188_v16 = vld [vmem:[%s10399_s5 + $0x24] ss:$8 sps:$4 sm:$0xff]  }
 0x4c4   : > { %5699 = vmatpush2.bf16.msra.mxu0 %v10160_v13  ;;  %v7186_v13 = vld [vmem:[%s10399_s5 + $0x20] ss:$8 sps:$4 sm:$0xff]  }
 0x4c7   : > { %5701 = vmatmul.mubr.bf16.vlgmr.msra.gmra.mxu0 %v7180_v10 }
 0x4c8   : > { %5710 = vmatprep.mubr.bf16.mxu0 %v7185_v9 }
 0x4cf   : > { %5711 = vmatmul.mubr.bf16.gmra.mxu0 %v7183_v57 }
 0x4d0   : > { %5720 = vmatprep.mubr.bf16.mxu0 %v7188_v16 }
 0x4d7   : > { %5721 = vmatmul.mubr.bf16.gmra.mxu0 %v7186_v13  ;;  %v5546_v13 = vpop.permute.xlu1 %5545 }
 0x4d8   : > { %5730 = vmatprep.mubr.bf16.mxu0 %v7191_v28 }
 0x4df   : > { %5731 = vmatmul.mubr.bf16.gmra.mxu0 %v7189_v25 }
 0x4e0   : > { %5740 = vmatprep.mubr.bf16.mxu0 %v7194_v40 }
 0x4e7   : > { %5741 = vmatmul.mubr.bf16.gmra.mxu0 %v7192_v37 }
 0x4e8   : > { %5750 = vmatprep.mubr.bf16.mxu0 %v7197_v36 }
 0x4ef   : > { %5751 = vmatmul.mubr.bf16.gmra.mxu0 %v7195_v41 }
 0x4f0   : > { %5760 = vmatprep.mubr.bf16.mxu0 %v7200_v63 }
 0x4f7   : > { %5761 = vmatmul.mubr.bf16.gmra.mxu0 %v7198_v49  ;;  %v5551_v49 = vpop.permute.xlu0 %5550 }
 0x4f8   : > { %5770 = vmatprep.mubr.bf16.mxu0 %v7203_v39 }
 0x4ff   : > { %5771 = vmatmul.mubr.bf16.gmra.mxu0 %v7201_v23 }
 0x587   : > { %v5702_v62 = vpop.f32.mrf.mxu0 }
 0x588   : > { %v5703_v18 = vadd.f32 %v5702_v62, %v5511_v14 }
 0x589   : > { %v5704_v27 = vpop.f32.mrf.mxu0 }
 0x58a   : > { %v5705_v60 = vadd.f32 %v5704_v27, %v5511_v14  ;;  %v5781_v21 = vmax.f32 %v5703_v18, 0.0 }
 0x58b   : > { %v5706_v3 = vpop.f32.mrf.mxu0 }
 0x58c   : > { %v5782_v6 = vmax.f32 %v5705_v60, 0.0  ;;  %v5707_v61 = vadd.f32 %v5706_v3, %v5516_v2 }
 0x58d   : > { %v5708_v26 = vpop.f32.mrf.mxu0 }
 0x58e   : > { %v6492_v38 = vpack.c.bf16 %v5782_v6, %v5781_v21  ;;  %v5709_v45 = vadd.f32 %v5708_v26, %v5516_v2  ;;  %v5783_v54 = vmax.f32 %v5707_v61, 0.0  ;;  %v5556_v2 = vpop.permute.xlu1 %5555 }
 0x58f   : > { %v5712_v24 = vpop.f32.mrf.mxu0 }
 0x590   : > { %5909 = vst [vmem:[%s10320_s16] sm:$0xff] %v6492_v38  ;;  %v5784_v8 = vmax.f32 %v5709_v45, 0.0  ;;  %v5713_v5 = vadd.f32 %v5712_v24, %v5521_v58 }
 0x591   : > { %v5714_v34 = vpop.f32.mrf.mxu0 }
 0x592   : > { %v6493_v30 = vpack.c.bf16 %v5784_v8, %v5783_v54  ;;  %v5715_v52 = vadd.f32 %v5714_v34, %v5521_v58  ;;  %v5785_v1 = vmax.f32 %v5713_v5, 0.0  ;;  %v5561_v58 = vpop.permute.xlu0 %5560 }
 0x593   : > { %v5716_v20 = vpop.f32.mrf.mxu0 }
 0x594   : > { %5910 = vst [vmem:[%s10320_s16 + $0x8] sm:$0xff] %v6493_v30  ;;  %v5786_v7 = vmax.f32 %v5715_v52, 0.0  ;;  %v5717_v55 = vadd.f32 %v5716_v20, %v5526_v46 }
 0x595   : > { %v5718_v17 = vpop.f32.mrf.mxu0 }
 0x596   : > { %v6494_v35 = vpack.c.bf16 %v5786_v7, %v5785_v1  ;;  %v5719_v29 = vadd.f32 %v5718_v17, %v5526_v46  ;;  %v5787_v33 = vmax.f32 %v5717_v55, 0.0  ;;  %v5566_v46 = vpop.permute.xlu1 %5565 }
 0x597   : > { %v5722_v48 = vpop.f32.mrf.mxu0 }
 0x598   : > { %5911 = vst [vmem:[%s10320_s16 + $0x10] sm:$0xff] %v6494_v35  ;;  %v5788_v59 = vmax.f32 %v5719_v29, 0.0  ;;  %v5723_v0 = vadd.f32 %v5722_v48, %v5531_v43 }
 0x599   : > { %v5724_v56 = vpop.f32.mrf.mxu0 }
 0x59a   : > { %v6495_v50 = vpack.c.bf16 %v5788_v59, %v5787_v33  ;;  %v5725_v15 = vadd.f32 %v5724_v56, %v5531_v43  ;;  %v5789_v51 = vmax.f32 %v5723_v0, 0.0  ;;  %v5571_v43 = vpop.permute.xlu0 %5570 }
 0x59b   : > { %v5726_v31 = vpop.f32.mrf.mxu0 }
 0x59c   : > { %5912 = vst [vmem:[%s10320_s16 + $0x18] sm:$0xff] %v6495_v50  ;;  %v5790_v53 = vmax.f32 %v5725_v15, 0.0  ;;  %v5727_v42 = vadd.f32 %v5726_v31, %v5536_v44 }
 0x59d   : > { %v5728_v47 = vpop.f32.mrf.mxu0 }
 0x59e   : > { %v6496_v4 = vpack.c.bf16 %v5790_v53, %v5789_v51  ;;  %v5729_v32 = vadd.f32 %v5728_v47, %v5536_v44  ;;  %v5791_v11 = vmax.f32 %v5727_v42, 0.0  ;;  %v5576_v44 = vpop.permute.xlu1 %5575 }
 0x59f   : > { %v5732_v19 = vpop.f32.mrf.mxu0 }
 0x5a0   : > { %5913 = vst [vmem:[%s10320_s16 + $0x20] sm:$0xff] %v6496_v4  ;;  %v5792_v22 = vmax.f32 %v5729_v32, 0.0  ;;  %v5733_v10 = vadd.f32 %v5732_v19, %v5541_v12 }
 0x5a1   : > { %v5734_v9 = vpop.f32.mrf.mxu0 }
 0x5a2   : > { %v6497_v57 = vpack.c.bf16 %v5792_v22, %v5791_v11  ;;  %v5735_v16 = vadd.f32 %v5734_v9, %v5541_v12  ;;  %v5793_v25 = vmax.f32 %v5733_v10, 0.0  ;;  %v5581_v12 = vpop.permute.xlu0 %5580 }
 0x5a3   : > { %v5736_v28 = vpop.f32.mrf.mxu0 }
 0x5a4   : > { %5914 = vst [vmem:[%s10320_s16 + $0x28] sm:$0xff] %v6497_v57  ;;  %v5794_v40 = vmax.f32 %v5735_v16, 0.0  ;;  %v5737_v37 = vadd.f32 %v5736_v28, %v5546_v13 }
 0x5a5   : > { %v5738_v36 = vpop.f32.mrf.mxu0 }
 0x5a6   : > { %v6498_v41 = vpack.c.bf16 %v5794_v40, %v5793_v25  ;;  %v5739_v63 = vadd.f32 %v5738_v36, %v5546_v13  ;;  %v5795_v23 = vmax.f32 %v5737_v37, 0.0  ;;  %v5586_v13 = vpop.permute.xlu1 %5585 }
 0x5a7   : > { %v5742_v39 = vpop.f32.mrf.mxu0 }
 0x5a8   : > { %5915 = vst [vmem:[%s10320_s16 + $0x30] sm:$0xff] %v6498_v41  ;;  %v5796_v14 = vmax.f32 %v5739_v63, 0.0  ;;  %v5743_v62 = vadd.f32 %v5742_v39, %v5551_v49 }
 0x5a9   : > { %v5744_v18 = vpop.f32.mrf.mxu0 }
 0x5aa   : > { %v6499_v27 = vpack.c.bf16 %v5796_v14, %v5795_v23  ;;  %v5745_v60 = vadd.f32 %v5744_v18, %v5551_v49  ;;  %v5797_v21 = vmax.f32 %v5743_v62, 0.0 }
 0x5ab   : > { %v5746_v3 = vpop.f32.mrf.mxu0 }
 0x5ac   : > { %5916 = vst [vmem:[%s10320_s16 + $0x38] sm:$0xff] %v6499_v27  ;;  %v5798_v6 = vmax.f32 %v5745_v60, 0.0  ;;  %v5747_v61 = vadd.f32 %v5746_v3, %v5556_v2 }
 0x5ad   : > { %v5748_v26 = vpop.f32.mrf.mxu0 }
 0x5ae   : > { %v6500_v38 = vpack.c.bf16 %v5798_v6, %v5797_v21  ;;  %v5749_v45 = vadd.f32 %v5748_v26, %v5556_v2  ;;  %v5799_v54 = vmax.f32 %v5747_v61, 0.0 }
 0x5af   : > { %v5752_v24 = vpop.f32.mrf.mxu0 }
 0x5b0   : > { %5917 = vst [vmem:[%s10320_s16 + $0x40] sm:$0xff] %v6500_v38  ;;  %v5800_v8 = vmax.f32 %v5749_v45, 0.0  ;;  %v5753_v5 = vadd.f32 %v5752_v24, %v5561_v58 }
 0x5b1   : > { %v5754_v34 = vpop.f32.mrf.mxu0 }
 0x5b2   : > { %v6501_v30 = vpack.c.bf16 %v5800_v8, %v5799_v54  ;;  %v5755_v52 = vadd.f32 %v5754_v34, %v5561_v58  ;;  %v5801_v1 = vmax.f32 %v5753_v5, 0.0 }
 0x5b3   : > { %v5756_v20 = vpop.f32.mrf.mxu0 }
 0x5b4   : > { %5918 = vst [vmem:[%s10320_s16 + $0x48] sm:$0xff] %v6501_v30  ;;  %v5802_v7 = vmax.f32 %v5755_v52, 0.0  ;;  %v5757_v55 = vadd.f32 %v5756_v20, %v5566_v46 }
 0x5b5   : > { %v5758_v17 = vpop.f32.mrf.mxu0 }
 0x5b6   : > { %v6502_v35 = vpack.c.bf16 %v5802_v7, %v5801_v1  ;;  %v5759_v29 = vadd.f32 %v5758_v17, %v5566_v46  ;;  %v5803_v33 = vmax.f32 %v5757_v55, 0.0 }
 0x5b7   : > { %v5762_v48 = vpop.f32.mrf.mxu0 }
 0x5b8   : > { %5919 = vst [vmem:[%s10320_s16 + $0x50] sm:$0xff] %v6502_v35  ;;  %v5804_v59 = vmax.f32 %v5759_v29, 0.0  ;;  %v5763_v0 = vadd.f32 %v5762_v48, %v5571_v43 }
 0x5b9   : > { %v5764_v56 = vpop.f32.mrf.mxu0 }
 0x5ba   : > { %v6503_v50 = vpack.c.bf16 %v5804_v59, %v5803_v33  ;;  %v5765_v15 = vadd.f32 %v5764_v56, %v5571_v43  ;;  %v5805_v51 = vmax.f32 %v5763_v0, 0.0 }
 0x5bb   : > { %v5766_v31 = vpop.f32.mrf.mxu0 }
 0x5bc   : > { %5920 = vst [vmem:[%s10320_s16 + $0x58] sm:$0xff] %v6503_v50  ;;  %v5806_v53 = vmax.f32 %v5765_v15, 0.0  ;;  %v5767_v42 = vadd.f32 %v5766_v31, %v5576_v44 }
 0x5bd   : > { %v5768_v47 = vpop.f32.mrf.mxu0 }
 0x5be   : > { %v6504_v4 = vpack.c.bf16 %v5806_v53, %v5805_v51  ;;  %v5769_v32 = vadd.f32 %v5768_v47, %v5576_v44  ;;  %v5807_v11 = vmax.f32 %v5767_v42, 0.0 }
 0x5bf   : > { %v5772_v19 = vpop.f32.mrf.mxu0 }
 0x5c0   : > { %5921 = vst [vmem:[%s10320_s16 + $0x60] sm:$0xff] %v6504_v4  ;;  %v5808_v22 = vmax.f32 %v5769_v32, 0.0  ;;  %v5773_v10 = vadd.f32 %v5772_v19, %v5581_v12 }
 0x5c1   : > { %v5774_v9 = vpop.f32.mrf.mxu0 }
 0x5c2   : > { %v6505_v57 = vpack.c.bf16 %v5808_v22, %v5807_v11  ;;  %v5775_v16 = vadd.f32 %v5774_v9, %v5581_v12  ;;  %v5809_v25 = vmax.f32 %v5773_v10, 0.0 }
 0x5c3   : > { %v5776_v28 = vpop.f32.mrf.mxu0 }
 0x5c4   : > { %5922 = vst [vmem:[%s10320_s16 + $0x68] sm:$0xff] %v6505_v57  ;;  %v5810_v40 = vmax.f32 %v5775_v16, 0.0  ;;  %v5777_v37 = vadd.f32 %v5776_v28, %v5586_v13 }
 0x5c5   : > { %v5778_v36 = vpop.f32.mrf.mxu0 }
 0x5c6   : > { %v6506_v41 = vpack.c.bf16 %v5810_v40, %v5809_v25  ;;  %v5779_v63 = vadd.f32 %v5778_v36, %v5586_v13  ;;  %v5811_v49 = vmax.f32 %v5777_v37, 0.0 }
 0x5c8   : > { %5923 = vst [vmem:[%s10320_s16 + $0x70] sm:$0xff] %v6506_v41  ;;  %v5812_v39 = vmax.f32 %v5779_v63, 0.0 }
 0x5ca   : > { %v6507_v23 = vpack.c.bf16 %v5812_v39, %v5811_v49 }
 0x5cc   : > { %5924 = vst [vmem:[%s10320_s16 + $0x78] sm:$0xff] %v6507_v23 }
 0x5cd   : > { %7217 = shalt.err (!%p7214_p5)
}
 0x5ce   : > { %s7218_s12 = scalar_lea.hbm %s10342_s21, 2048  ;;  %s7222_s16 = scalar_lea.hbm %s10401_s7, 4096 }
 0x5cf   : > { %p7219_p6 = scmp.ne.s32.totalorder %s10342_s21, %s7218_s12  ;;  %p7223_p10 = scmp.lt.s32.totalorder %s10342_s21, %s10401_s7 }
 0x5d0   : > { %p7224_p11 = scmp.lt.s32.totalorder %s7222_s16, %s7218_s12 }
 0x5d1   : > { %p7220_p7 = pnand %p7219_p6, %p7366_p4 }
 0x5d2   : > { %p7225_p12 = por %p7224_p11, %p7223_p10 }
 0x5d3   : > { %p7221_p9 = pneg %p7220_p7 }
 0x5d5   : > { %p7226_p13 = pnand %p7225_p12, %p7221_p9 }
 0x5d7   : > { %7229 = shalt.err (!%p7226_p13)
}
 0x5d8   : > { %s7284_s20 = smov 128   ;;  %s7285_s27 = smov 8  }
 0x5d9   : > { %6542 = dma.vmem_to_hbm [thread:$0]  (%p7366_p4), %s10344_s18, 2048, %s10342_s21, %s10349_s22, %s7284_s20, %s7284_s20, %s7285_s27  }
 0x5da PF: > { %p6548_p0 = scmp.ge.s32.totalorder %s7280_s29, 2  ;;  %s5956_s23 = sand.u32 1, %s7260_s24  }
 0x5db   : > { %s5957_s30 = scalar_lea.sflag [#allocation3], %s5956_s23 }
 0x5dc   : > { %p6545_p1 = pnand %p6548_p0, %p7373_p8 }
 0x5de   : > { %p6546_p2 = pneg %p6545_p1 }
 0x5e0   : > { %7255 = dma.done.wait (%p6546_p2), %s5957_s30, 2048  }
 0x5e1   : > { %7257 = vsyncadd (%p6546_p2), %s5957_s30, 4294965248  ;;  %s20_s29 = sadd.s32 1, %s7280_s29   ;;  %s10715_s24 = smov %s7264_s25 }
 0x5e2   : > { %p17_p3 = scmp.ge.s32.totalorder %s20_s29, 4   ;;  %s10716_s25 = smov %s7268_s26 }
 0x5e3   : > { %s10717_s26 = smov %s7379_s14  ;;  %s10718_s27 = smov %s7276_s28 }
 0x5e4   : > { %s10719_s28 = smov %s10721_s9  ;;  %19 = sbr.rel (!%p17_p3) target bundleno = 4 (0x4), region = 83 }
 0x5e9   :  { %5962 = vsyncpa [#allocation3], 1 }
 0x5ea   :  { %5964 = vsyncpa [#allocation3 + $0x1], 1 }

</bundles_post_ra>
